<compile_context>
chip_gen: v6e
topology: v6e:2x2x1
jax: 0.10.0
libtpu: 0.0.40
codegen_flags: <defaults>
</compile_context>

<pallas_src>
import functools
import math

import numpy as np
import jax
import jax.numpy as jnp
from jax.experimental import pallas as pl
from jax.experimental.pallas import tpu as pltpu


# ----------------------------------------------------------------------------
# In-kernel helpers
# ----------------------------------------------------------------------------
def _layernorm(x, gamma, beta, eps=1e-5):
    mean = jnp.mean(x, axis=-1, keepdims=True)
    var = jnp.mean((x - mean) ** 2, axis=-1, keepdims=True)
    return (x - mean) * jax.lax.rsqrt(var + eps) * gamma + beta


def _gelu_exact(x):
    # PyTorch nn.GELU default (erf-based, not tanh approximation).
    return 0.5 * x * (1.0 + jax.lax.erf(x * (1.0 / math.sqrt(2.0))))


# ----------------------------------------------------------------------------
# Tiling helpers (wrapper side)
# ----------------------------------------------------------------------------
def _row_tile(rows):
    """Large, 8-aligned row tiles; keep >=2 grid steps when there is work."""
    if rows >= 1024:
        tm = 512
    elif rows >= 16:
        tm = max(8, ((rows // 2) // 8) * 8)
    else:
        tm = rows
    rows_p = ((rows + tm - 1) // tm) * tm
    return tm, rows_p


def _pad_rows(a, rows_p):
    r = a.shape[0]
    if r == rows_p:
        return a
    pad = jnp.zeros((rows_p - r,) + a.shape[1:], a.dtype)
    return jnp.concatenate([a, pad], axis=0)


def _pick_wb(nW, nWB, N):
    """Windows per grid step: aim for >=128 matmul rows, >=2 grid steps,
    and Wb | nW so a window group shares one image's shift-mask slice."""
    target = max(1, -(-128 // N))
    divs = [d for d in range(1, nW + 1) if nW % d == 0]
    cands = [d for d in divs if d >= target]
    wb = min(cands) if cands else max(divs)
    while wb > 1 and nWB // wb < 2:          # keep both v7x TCs busy
        wb = max(d for d in divs if d < wb)
    return wb


# ----------------------------------------------------------------------------
# Kernel 1: fused LayerNorm1 + batched-window, head-packed self-attention
# ----------------------------------------------------------------------------
def window_attn_kernel(x_ref, g1_ref, b1_ref,
                       wq_ref, bq_ref, wk_ref, bk_ref, wv_ref, bv_ref,
                       wproj_ref, bproj_ref, bias_ref, hmask_ref, bsum_ref,
                       o_ref, *, num_heads):
    Wb, N, C = x_ref.shape
    HN = num_heads * N
    R = Wb * N

    # ---- LayerNorm1 on the flattened (Wb*N, C) slab (f32 elementwise) ----
    x = x_ref[...].reshape(R, C)
    xn = _layernorm(x, g1_ref[0], b1_ref[0]).astype(jnp.bfloat16)

    # ---- Q/K/V projections as three lane-aligned dots (scale folded in Wq) --
    q = (jnp.dot(xn, wq_ref[...], preferred_element_type=jnp.float32)
         + bq_ref[0]).reshape(Wb, N, C).astype(jnp.bfloat16)
    k = (jnp.dot(xn, wk_ref[...], preferred_element_type=jnp.float32)
         + bk_ref[0]).reshape(Wb, N, C).astype(jnp.bfloat16)
    v = (jnp.dot(xn, wv_ref[...], preferred_element_type=jnp.float32)
         + bv_ref[0]).reshape(Wb, N, C).astype(jnp.bfloat16)

    # ---- head packing: tile K/V along sublanes and mask block-diagonally ---
    # hmask[h*N + m, c] = 1 iff channel c belongs to head h, so the single
    # batched dot below yields per-head scores for ALL heads at once; no
    # per-head loop, no Dh-wide lane slices, no lane concatenates.
    hmask = hmask_ref[...]                                      # (HN, C) bf16
    k_exp = jnp.concatenate([k] * num_heads, axis=1) * hmask    # (Wb, HN, C)
    v_exp = jnp.concatenate([v] * num_heads, axis=1) * hmask    # (Wb, HN, C)

    s = jax.lax.dot_general(q, k_exp, (((2,), (2,)), ((0,), (0,))),
                            preferred_element_type=jnp.float32)  # (Wb, N, HN)
    # relative-position bias (+ shift mask for SW-MSA); broadcasts over Wb
    # when the bias block is (1, N, HN) (W-MSA: no mask streamed at all).
    s = s + bias_ref[...]

    # per-head softmax: subtracting the GLOBAL row max is equivalent (the
    # constant cancels inside each head block) and avoids a blockwise max.
    s = s - jnp.max(s, axis=-1, keepdims=True)
    p = jnp.exp(s).reshape(R, HN)                                # f32
    # per-head row sums via a block-diagonal ones matmul (MXU, f32 operands
    # for numerical fidelity), EUP reciprocal.
    denom = jnp.dot(p, bsum_ref[...],
                    preferred_element_type=jnp.float32)          # (R, HN)
    p = (p * pl.reciprocal(denom, approx=True)).astype(jnp.bfloat16)
    p = p.reshape(Wb, N, HN)

    # context comes back with heads already concatenated along the lane dim.
    ctx = jax.lax.dot_general(p, v_exp, (((2,), (1,)), ((0,), (0,))),
                              preferred_element_type=jnp.float32)  # (Wb, N, C)

    # ---- one big output projection on the (Wb*N, C) slab ----
    y = jnp.dot(ctx.reshape(R, C).astype(jnp.bfloat16), wproj_ref[...],
                preferred_element_type=jnp.float32) + bproj_ref[0]
    o_ref[...] = y.reshape(Wb, N, C).astype(o_ref.dtype)


def window_attention_pallas(xw, g1, b1, wq, bq, wk, bk, wv, bv, wproj, bproj,
                            bias_flat, hmask, bsum, *, num_heads, wb):
    nWB, N, C = xw.shape
    HN = num_heads * N
    nb = bias_flat.shape[0]
    if nb == 1:                                   # W-MSA: shared bias, no mask
        bias_spec = pl.BlockSpec((1, N, HN), lambda i: (0, 0, 0))
    else:                                         # SW-MSA: per-window-group
        nbg = nb // wb
        bias_spec = pl.BlockSpec((wb, N, HN), lambda i: (i % nbg, 0, 0))

    kernel = functools.partial(window_attn_kernel, num_heads=num_heads)
    return pl.pallas_call(
        kernel,
        out_shape=jax.ShapeDtypeStruct((nWB, N, C), jnp.float32),
        grid=(nWB // wb,),
        in_specs=[
            pl.BlockSpec((wb, N, C), lambda i: (i, 0, 0)),    # token windows
            pl.BlockSpec((1, C), lambda i: (0, 0)),           # gamma1
            pl.BlockSpec((1, C), lambda i: (0, 0)),           # beta1
            pl.BlockSpec((C, C), lambda i: (0, 0)),           # Wq (bf16, scaled)
            pl.BlockSpec((1, C), lambda i: (0, 0)),           # bq (scaled)
            pl.BlockSpec((C, C), lambda i: (0, 0)),           # Wk (bf16)
            pl.BlockSpec((1, C), lambda i: (0, 0)),           # bk
            pl.BlockSpec((C, C), lambda i: (0, 0)),           # Wv (bf16)
            pl.BlockSpec((1, C), lambda i: (0, 0)),           # bv
            pl.BlockSpec((C, C), lambda i: (0, 0)),           # Wproj (bf16)
            pl.BlockSpec((1, C), lambda i: (0, 0)),           # bproj
            bias_spec,                                        # rel bias (+mask)
            pl.BlockSpec((HN, C), lambda i: (0, 0)),          # head mask (bf16)
            pl.BlockSpec((HN, HN), lambda i: (0, 0)),         # block-sum (f32)
        ],
        out_specs=pl.BlockSpec((wb, N, C), lambda i: (i, 0, 0)),
        compiler_params=pltpu.CompilerParams(
            dimension_semantics=("parallel",)),
    )(xw, g1, b1, wq, bq, wk, bk, wv, bv, wproj, bproj, bias_flat, hmask, bsum)


# ----------------------------------------------------------------------------
# Kernel 2: fused residual-1 + LayerNorm2 + MLP (fc1 -> GELU -> fc2) + residual
# ----------------------------------------------------------------------------
def mlp_kernel(sc_ref, a_ref, g2_ref, b2_ref, w1_ref, bb1_ref, w2_ref, bb2_ref,
               o_ref):
    x = sc_ref[...] + a_ref[...]                       # shortcut + attn branch
    xn = _layernorm(x, g2_ref[0], b2_ref[0]).astype(jnp.bfloat16)
    h = jnp.dot(xn, w1_ref[...],
                preferred_element_type=jnp.float32) + bb1_ref[0]
    h = _gelu_exact(h).astype(jnp.bfloat16)            # exact erf GELU in f32
    y = jnp.dot(h, w2_ref[...],
                preferred_element_type=jnp.float32) + bb2_ref[0]
    o_ref[...] = (x + y).astype(o_ref.dtype)


def mlp_residual_pallas(shortcut, attn, g2, b2, w1, bb1, w2, bb2):
    rows, C = shortcut.shape
    Hd = w1.shape[1]
    tm, rows_p = _row_tile(rows)
    sc = _pad_rows(shortcut, rows_p)
    at = _pad_rows(attn, rows_p)
    out = pl.pallas_call(
        mlp_kernel,
        out_shape=jax.ShapeDtypeStruct((rows_p, C), jnp.float32),
        grid=(rows_p // tm,),
        in_specs=[
            pl.BlockSpec((tm, C), lambda i: (i, 0)),
            pl.BlockSpec((tm, C), lambda i: (i, 0)),
            pl.BlockSpec((1, C), lambda i: (0, 0)),
            pl.BlockSpec((1, C), lambda i: (0, 0)),
            pl.BlockSpec((C, Hd), lambda i: (0, 0)),
            pl.BlockSpec((1, Hd), lambda i: (0, 0)),
            pl.BlockSpec((Hd, C), lambda i: (0, 0)),
            pl.BlockSpec((1, C), lambda i: (0, 0)),
        ],
        out_specs=pl.BlockSpec((tm, C), lambda i: (i, 0)),
        compiler_params=pltpu.CompilerParams(
            dimension_semantics=("parallel",)),
    )(sc, at, g2, b2, w1, bb1, w2, bb2)
    return out[:rows]


# ----------------------------------------------------------------------------
# Kernel 3: RSTB 3x3 conv (as im2col matmul) fused with the outer residual add
# ----------------------------------------------------------------------------
def conv_residual_kernel(cols_ref, w_ref, b_ref, res_ref, o_ref):
    y = jnp.dot(cols_ref[...].astype(jnp.bfloat16), w_ref[...],
                preferred_element_type=jnp.float32) + b_ref[0]
    o_ref[...] = (y + res_ref[...]).astype(o_ref.dtype)


def conv_residual_pallas(cols, w, b, res):
    rows, K = cols.shape
    C = w.shape[1]
    tm, rows_p = _row_tile(rows)
    cols_p = _pad_rows(cols, rows_p)
    res_p = _pad_rows(res, rows_p)
    out = pl.pallas_call(
        conv_residual_kernel,
        out_shape=jax.ShapeDtypeStruct((rows_p, C), jnp.float32),
        grid=(rows_p // tm,),
        in_specs=[
            pl.BlockSpec((tm, K), lambda i: (i, 0)),
            pl.BlockSpec((K, C), lambda i: (0, 0)),
            pl.BlockSpec((1, C), lambda i: (0, 0)),
            pl.BlockSpec((tm, C), lambda i: (i, 0)),
        ],
        out_specs=pl.BlockSpec((tm, C), lambda i: (i, 0)),
        compiler_params=pltpu.CompilerParams(
            dimension_semantics=("parallel",)),
    )(cols_p, w, b, res_p)
    return out[:rows]


# ----------------------------------------------------------------------------
# Plain-JAX glue: window partition / reverse, shift mask, relative pos index
# ----------------------------------------------------------------------------
def window_partition(x, ws):
    B, H, W, C = x.shape
    x = x.reshape(B, H // ws, ws, W // ws, ws, C)
    return x.transpose(0, 1, 3, 2, 4, 5).reshape(-1, ws, ws, C)


def window_reverse(windows, ws, H, W):
    B = windows.shape[0] // (H * W // ws // ws)
    x = windows.reshape(B, H // ws, W // ws, ws, ws, -1)
    return x.transpose(0, 1, 3, 2, 4, 5).reshape(B, H, W, -1)


def calculate_mask_np(H, W, window_size, shift_size):
    img_mask = np.zeros((1, H, W, 1), np.float32)
    h_slices = (slice(0, -window_size),
                slice(-window_size, -shift_size),
                slice(-shift_size, None))
    w_slices = h_slices
    cnt = 0
    for h in h_slices:
        for w in w_slices:
            img_mask[:, h, w, :] = cnt
            cnt += 1
    mw = img_mask.reshape(1, H // window_size, window_size,
                          W // window_size, window_size, 1)
    mw = mw.transpose(0, 1, 3, 2, 4, 5).reshape(-1, window_size * window_size)
    attn_mask = mw[:, None, :] - mw[:, :, None]
    attn_mask = np.where(attn_mask != 0, -100.0, 0.0).astype(np.float32)
    return attn_mask                               # (nW, N, N)


def relative_position_index_np(ws):
    coords = np.stack(np.meshgrid(np.arange(ws), np.arange(ws), indexing="ij"))
    cf = coords.reshape(2, -1)                     # (2, N)
    rel = cf[:, :, None] - cf[:, None, :]          # (2, N, N)
    rel = rel.transpose(1, 2, 0).astype(np.int64)  # (N, N, 2)
    rel[:, :, 0] += ws - 1
    rel[:, :, 1] += ws - 1
    rel[:, :, 0] *= 2 * ws - 1
    return rel.sum(-1)                             # (N, N)


# ----------------------------------------------------------------------------
# One SwinTransformerBlock forward (W-MSA when shift_size == 0, else SW-MSA)
# ----------------------------------------------------------------------------
def swin_block_forward(x, x_size, p, *, window_size, shift_size, num_heads):
    H, W = x_size
    B, L, C = x.shape
    ws = window_size
    N = ws * ws
    nW = (H // ws) * (W // ws)
    HN = num_heads * N
    Dh = C // num_heads
    scale = Dh ** -0.5

    # relative position bias laid out head-packed: flat[n, h*N + m] = bias[h,n,m]
    rpi = relative_position_index_np(ws).reshape(-1)                 # (N*N,)
    rel = p["rpb_table"][rpi].reshape(N, N, num_heads)               # (N,N,H)
    rel_flat = jnp.transpose(rel, (0, 2, 1)).reshape(N, HN)          # (N, HN)

    if shift_size > 0:       # SW-MSA: fold the shift mask into the bias slab
        m = calculate_mask_np(H, W, ws, shift_size)                  # (nW,N,N)
        m_flat = np.tile(m[:, :, None, :],
                         (1, 1, num_heads, 1)).reshape(nW, N, HN)
        bias_flat = rel_flat[None] + jnp.asarray(m_flat)             # (nW,N,HN)
    else:                    # W-MSA: no zeros-mask is built or streamed
        bias_flat = rel_flat[None]                                   # (1,N,HN)

    # constant head-packing masks (block-diagonal selectors)
    hm = np.zeros((HN, C), np.float32)
    for h in range(num_heads):
        hm[h * N:(h + 1) * N, h * Dh:(h + 1) * Dh] = 1.0
    hmask = jnp.asarray(hm, jnp.bfloat16)
    bsum = jnp.asarray(np.kron(np.eye(num_heads, dtype=np.float32),
                               np.ones((N, N), np.float32)), jnp.float32)

    # split Wqkv into three lane-aligned (C, C) projections; fold the qk scale
    # into the Q weight/bias; bf16 MXU weights.
    wq = (p["wqkv"][:, :C] * scale).astype(jnp.bfloat16)
    wk = p["wqkv"][:, C:2 * C].astype(jnp.bfloat16)
    wv = p["wqkv"][:, 2 * C:].astype(jnp.bfloat16)
    bq = p["bqkv"][:, :C] * scale
    bk = p["bqkv"][:, C:2 * C]
    bv = p["bqkv"][:, 2 * C:]
    wproj = p["wproj"].astype(jnp.bfloat16)

    shortcut = x
    xi = x.reshape(B, H, W, C)
    if shift_size > 0:
        xi = jnp.roll(xi, (-shift_size, -shift_size), axis=(1, 2))
    xw = window_partition(xi, ws).reshape(-1, N, C)                  # (nWB,N,C)
    nWB = xw.shape[0]
    wb = _pick_wb(nW, nWB, N)                    # windows batched per grid step

    attn = window_attention_pallas(
        xw, p["g1"], p["b1"], wq, bq, wk, bk, wv, bv, wproj, p["bproj"],
        bias_flat, hmask, bsum, num_heads=num_heads, wb=wb)

    aw = attn.reshape(-1, ws, ws, C)
    xr = window_reverse(aw, ws, H, W)
    if shift_size > 0:
        xr = jnp.roll(xr, (shift_size, shift_size), axis=(1, 2))

    # residual-1 + LayerNorm2 + MLP + residual-2, fused over large row tiles
    out = mlp_residual_pallas(
        shortcut.reshape(B * L, C), xr.reshape(B * L, C),
        p["g2"], p["b2"], p["w1"].astype(jnp.bfloat16), p["bb1"],
        p["w2"].astype(jnp.bfloat16), p["bb2"])
    return out.reshape(B, L, C)


# ----------------------------------------------------------------------------
# RSTB forward: BasicLayer (depth Swin blocks) -> 3x3 conv -> + x
# ----------------------------------------------------------------------------
def rstb_forward(x, params, *, x_size, window_size, num_heads, depth):
    H, W = x_size
    B, L, C = x.shape
    y = x
    for i in range(depth):                       # alternate W-MSA / SW-MSA
        shift = 0 if i % 2 == 0 else window_size // 2
        y = swin_block_forward(y, x_size, params["blocks"][i],
                               window_size=window_size, shift_size=shift,
                               num_heads=num_heads)

    # patch_unembed -> conv3x3(pad=1) -> patch_embed  ==  im2col matmul on the
    # channels-last image; fused with the outer "+ x" residual in Kernel 3.
    img = y.reshape(B, H, W, C)
    imgp = jnp.pad(img, ((0, 0), (1, 1), (1, 1), (0, 0)))
    cols = jnp.concatenate(
        [imgp[:, dy:dy + H, dx:dx + W, :] for dy in range(3) for dx in range(3)],
        axis=-1).reshape(B * L, 9 * C)
    wc = params["conv_w"].reshape(9 * C, C).astype(jnp.bfloat16)
    out = conv_residual_pallas(cols, wc, params["conv_b"], x.reshape(B * L, C))
    return out.reshape(B, L, C)


# ----------------------------------------------------------------------------
# Deterministic synthetic parameters
# ----------------------------------------------------------------------------
def init_params(key, dim, num_heads, window_size, mlp_ratio, depth):
    hidden = int(dim * mlp_ratio)
    std = 0.02
    keys = jax.random.split(key, depth + 1)
    blocks = []
    for i in range(depth):
        ks = jax.random.split(keys[i], 5)
        blocks.append({
            "g1": jnp.ones((1, dim), jnp.float32),
            "b1": jnp.zeros((1, dim), jnp.float32),
            # nn.Linear weights stored transposed: (in, out)
            "wqkv": std * jax.random.normal(ks[0], (dim, 3 * dim), jnp.float32),
            "bqkv": jnp.zeros((1, 3 * dim), jnp.float32),
            "wproj": std * jax.random.normal(ks[1], (dim, dim), jnp.float32),
            "bproj": jnp.zeros((1, dim), jnp.float32),
            "rpb_table": std * jax.random.truncated_normal(
                ks[2], -2.0, 2.0,
                ((2 * window_size - 1) ** 2, num_heads), jnp.float32),
            "g2": jnp.ones((1, dim), jnp.float32),
            "b2": jnp.zeros((1, dim), jnp.float32),
            "w1": std * jax.random.normal(ks[3], (dim, hidden), jnp.float32),
            "bb1": jnp.zeros((1, hidden), jnp.float32),
            "w2": std * jax.random.normal(ks[4], (hidden, dim), jnp.float32),
            "bb2": jnp.zeros((1, dim), jnp.float32),
        })
    kc = jax.random.split(keys[depth], 2)
    # conv weight stored (ky, kx, Cin, Cout) to match the im2col column order.
    conv_w = std * jax.random.normal(kc[0], (3, 3, dim, dim), jnp.float32)
    conv_b = jnp.zeros((1, dim), jnp.float32)
    return {"blocks": blocks, "conv_w": conv_w, "conv_b": conv_b}


# ----------------------------------------------------------------------------
if __name__ == "__main__":
    # Small RSTB: dim=32, 4 heads, window=4, depth=2 (W-MSA + SW-MSA), 8x8 grid.
    dim = 32
    num_heads = 4
    window_size = 4
    mlp_ratio = 4.0
    depth = 2
    H = W = 8
    B = 2

    key = jax.random.PRNGKey(0)
    kx, kp = jax.random.split(key)
    x = jax.random.normal(kx, (B, H * W, dim), jnp.float32)
    params = init_params(kp, dim, num_heads, window_size, mlp_ratio, depth)

    fwd = jax.jit(functools.partial(
        rstb_forward, x_size=(H, W), window_size=window_size,
        num_heads=num_heads, depth=depth))
    out = fwd(x, params)
    out = jax.block_until_ready(out)
    assert out.shape == (B, H * W, dim) and out.dtype == jnp.float32
    print("KERNEL_OK")
</pallas_src>

<mosaic_0001>
module attributes {stable_mosaic.version = 11 : i64} {
  func.func @window_attn_kernel(%arg0: i32, %arg1: memref<4x16x32xf32, #tpu.memory_space<vmem>>, %arg2: memref<1x32xf32, #tpu.memory_space<vmem>>, %arg3: memref<1x32xf32, #tpu.memory_space<vmem>>, %arg4: memref<32x32xbf16, #tpu.memory_space<vmem>>, %arg5: memref<1x32xf32, #tpu.memory_space<vmem>>, %arg6: memref<32x32xbf16, #tpu.memory_space<vmem>>, %arg7: memref<1x32xf32, #tpu.memory_space<vmem>>, %arg8: memref<32x32xbf16, #tpu.memory_space<vmem>>, %arg9: memref<1x32xf32, #tpu.memory_space<vmem>>, %arg10: memref<32x32xbf16, #tpu.memory_space<vmem>>, %arg11: memref<1x32xf32, #tpu.memory_space<vmem>>, %arg12: memref<1x16x64xf32, #tpu.memory_space<vmem>>, %arg13: memref<64x32xbf16, #tpu.memory_space<vmem>>, %arg14: memref<64x64xf32, #tpu.memory_space<vmem>>, %arg15: memref<4x16x32xf32, #tpu.memory_space<vmem>>) attributes {dimension_semantics = [#tpu.dimension_semantics<parallel>], iteration_bounds = array<i64: 2>, scalar_prefetch = 0 : i64, scratch_operands = 0 : i64, tpu.core_type = #tpu.core_type<tc>, window_params = [{transform_indices = @transform_0, window_bounds = array<i64: 4, 16, 32>}, {pipeline_mode = #tpu.pipeline_mode<synchronous>, transform_indices = @transform_1, window_bounds = array<i64: 1, 32>}, {pipeline_mode = #tpu.pipeline_mode<synchronous>, transform_indices = @transform_2, window_bounds = array<i64: 1, 32>}, {pipeline_mode = #tpu.pipeline_mode<synchronous>, transform_indices = @transform_3, window_bounds = array<i64: 32, 32>}, {pipeline_mode = #tpu.pipeline_mode<synchronous>, transform_indices = @transform_4, window_bounds = array<i64: 1, 32>}, {pipeline_mode = #tpu.pipeline_mode<synchronous>, transform_indices = @transform_5, window_bounds = array<i64: 32, 32>}, {pipeline_mode = #tpu.pipeline_mode<synchronous>, transform_indices = @transform_6, window_bounds = array<i64: 1, 32>}, {pipeline_mode = #tpu.pipeline_mode<synchronous>, transform_indices = @transform_7, window_bounds = array<i64: 32, 32>}, {pipeline_mode = #tpu.pipeline_mode<synchronous>, transform_indices = @transform_8, window_bounds = array<i64: 1, 32>}, {pipeline_mode = #tpu.pipeline_mode<synchronous>, transform_indices = @transform_9, window_bounds = array<i64: 32, 32>}, {pipeline_mode = #tpu.pipeline_mode<synchronous>, transform_indices = @transform_10, window_bounds = array<i64: 1, 32>}, {pipeline_mode = #tpu.pipeline_mode<synchronous>, transform_indices = @transform_11, window_bounds = array<i64: 1, 16, 64>}, {pipeline_mode = #tpu.pipeline_mode<synchronous>, transform_indices = @transform_12, window_bounds = array<i64: 64, 32>}, {pipeline_mode = #tpu.pipeline_mode<synchronous>, transform_indices = @transform_13, window_bounds = array<i64: 64, 64>}, {transform_indices = @transform_14, window_bounds = array<i64: 4, 16, 32>}]} {
    %c0 = arith.constant 0 : index
    %c0_0 = arith.constant 0 : index
    %c0_1 = arith.constant 0 : index
    %0 = vector.load %arg1[%c0, %c0_0, %c0_1] : memref<4x16x32xf32, #tpu.memory_space<vmem>>, vector<4x16x32xf32>
    %1 = vector.shape_cast %0 : vector<4x16x32xf32> to vector<64x32xf32>
    %c0_2 = arith.constant 0 : index
    %c0_3 = arith.constant 0 : index
    %2 = vector.load %arg2[%c0_2, %c0_3] : memref<1x32xf32, #tpu.memory_space<vmem>>, vector<1x32xf32>
    %3 = vector.shape_cast %2 : vector<1x32xf32> to vector<32xf32>
    %c0_4 = arith.constant 0 : index
    %c0_5 = arith.constant 0 : index
    %4 = vector.load %arg3[%c0_4, %c0_5] : memref<1x32xf32, #tpu.memory_space<vmem>>, vector<1x32xf32>
    %5 = vector.shape_cast %4 : vector<1x32xf32> to vector<32xf32>
    %cst = arith.constant dense<0.000000e+00> : vector<64xf32>
    %6 = vector.multi_reduction <add>, %1, %cst [1] : vector<64x32xf32> to vector<64xf32>
    %7 = vector.shape_cast %6 : vector<64xf32> to vector<64x1xf32>
    %cst_6 = arith.constant 3.200000e+01 : f32
    %8 = vector.broadcast %cst_6 : f32 to vector<64x1xf32>
    %9 = arith.divf %7, %8 : vector<64x1xf32>
    %10 = vector.broadcast %9 : vector<64x1xf32> to vector<64x32xf32>
    %11 = arith.subf %1, %10 : vector<64x32xf32>
    %12 = arith.mulf %11, %11 : vector<64x32xf32>
    %cst_7 = arith.constant dense<0.000000e+00> : vector<64xf32>
    %13 = vector.multi_reduction <add>, %12, %cst_7 [1] : vector<64x32xf32> to vector<64xf32>
    %14 = vector.shape_cast %13 : vector<64xf32> to vector<64x1xf32>
    %cst_8 = arith.constant 3.200000e+01 : f32
    %15 = vector.broadcast %cst_8 : f32 to vector<64x1xf32>
    %16 = arith.divf %14, %15 : vector<64x1xf32>
    %17 = vector.broadcast %9 : vector<64x1xf32> to vector<64x32xf32>
    %18 = arith.subf %1, %17 : vector<64x32xf32>
    %cst_9 = arith.constant 9.99999974E-6 : f32
    %19 = vector.broadcast %cst_9 : f32 to vector<64x1xf32>
    %20 = arith.addf %16, %19 : vector<64x1xf32>
    %21 = math.rsqrt %20 : vector<64x1xf32>
    %22 = vector.broadcast %21 : vector<64x1xf32> to vector<64x32xf32>
    %23 = arith.mulf %18, %22 : vector<64x32xf32>
    %24 = vector.shape_cast %3 : vector<32xf32> to vector<1x32xf32>
    %25 = vector.broadcast %24 : vector<1x32xf32> to vector<64x32xf32>
    %26 = arith.mulf %23, %25 : vector<64x32xf32>
    %27 = vector.shape_cast %5 : vector<32xf32> to vector<1x32xf32>
    %28 = vector.broadcast %27 : vector<1x32xf32> to vector<64x32xf32>
    %29 = arith.addf %26, %28 : vector<64x32xf32>
    %30 = arith.truncf %29 : vector<64x32xf32> to vector<64x32xbf16>
    %c0_10 = arith.constant 0 : index
    %c0_11 = arith.constant 0 : index
    %31 = vector.load %arg4[%c0_10, %c0_11] : memref<32x32xbf16, #tpu.memory_space<vmem>>, vector<32x32xbf16>
    %cst_12 = arith.constant dense<0.000000e+00> : vector<64x32xf32>
    %32 = tpu.matmul %30, %31, %cst_12 {dimension_numbers = #tpu.dot_dimension_numbers<[1], [0], [0], [1], [0, 0, 1, 1], [], []>} : vector<64x32xbf16>, vector<32x32xbf16>, vector<64x32xf32> -> vector<64x32xf32>
    %c0_13 = arith.constant 0 : index
    %c0_14 = arith.constant 0 : index
    %33 = vector.load %arg5[%c0_13, %c0_14] : memref<1x32xf32, #tpu.memory_space<vmem>>, vector<1x32xf32>
    %34 = vector.shape_cast %33 : vector<1x32xf32> to vector<32xf32>
    %35 = vector.shape_cast %34 : vector<32xf32> to vector<1x32xf32>
    %36 = vector.broadcast %35 : vector<1x32xf32> to vector<64x32xf32>
    %37 = arith.addf %32, %36 : vector<64x32xf32>
    %38 = vector.shape_cast %37 : vector<64x32xf32> to vector<4x16x32xf32>
    %39 = arith.truncf %38 : vector<4x16x32xf32> to vector<4x16x32xbf16>
    %c0_15 = arith.constant 0 : index
    %c0_16 = arith.constant 0 : index
    %40 = vector.load %arg6[%c0_15, %c0_16] : memref<32x32xbf16, #tpu.memory_space<vmem>>, vector<32x32xbf16>
    %cst_17 = arith.constant dense<0.000000e+00> : vector<64x32xf32>
    %41 = tpu.matmul %30, %40, %cst_17 {dimension_numbers = #tpu.dot_dimension_numbers<[1], [0], [0], [1], [0, 0, 1, 1], [], []>} : vector<64x32xbf16>, vector<32x32xbf16>, vector<64x32xf32> -> vector<64x32xf32>
    %c0_18 = arith.constant 0 : index
    %c0_19 = arith.constant 0 : index
    %42 = vector.load %arg7[%c0_18, %c0_19] : memref<1x32xf32, #tpu.memory_space<vmem>>, vector<1x32xf32>
    %43 = vector.shape_cast %42 : vector<1x32xf32> to vector<32xf32>
    %44 = vector.shape_cast %43 : vector<32xf32> to vector<1x32xf32>
    %45 = vector.broadcast %44 : vector<1x32xf32> to vector<64x32xf32>
    %46 = arith.addf %41, %45 : vector<64x32xf32>
    %47 = vector.shape_cast %46 : vector<64x32xf32> to vector<4x16x32xf32>
    %48 = arith.truncf %47 : vector<4x16x32xf32> to vector<4x16x32xbf16>
    %c0_20 = arith.constant 0 : index
    %c0_21 = arith.constant 0 : index
    %49 = vector.load %arg8[%c0_20, %c0_21] : memref<32x32xbf16, #tpu.memory_space<vmem>>, vector<32x32xbf16>
    %cst_22 = arith.constant dense<0.000000e+00> : vector<64x32xf32>
    %50 = tpu.matmul %30, %49, %cst_22 {dimension_numbers = #tpu.dot_dimension_numbers<[1], [0], [0], [1], [0, 0, 1, 1], [], []>} : vector<64x32xbf16>, vector<32x32xbf16>, vector<64x32xf32> -> vector<64x32xf32>
    %c0_23 = arith.constant 0 : index
    %c0_24 = arith.constant 0 : index
    %51 = vector.load %arg9[%c0_23, %c0_24] : memref<1x32xf32, #tpu.memory_space<vmem>>, vector<1x32xf32>
    %52 = vector.shape_cast %51 : vector<1x32xf32> to vector<32xf32>
    %53 = vector.shape_cast %52 : vector<32xf32> to vector<1x32xf32>
    %54 = vector.broadcast %53 : vector<1x32xf32> to vector<64x32xf32>
    %55 = arith.addf %50, %54 : vector<64x32xf32>
    %56 = vector.shape_cast %55 : vector<64x32xf32> to vector<4x16x32xf32>
    %57 = arith.truncf %56 : vector<4x16x32xf32> to vector<4x16x32xbf16>
    %c0_25 = arith.constant 0 : index
    %c0_26 = arith.constant 0 : index
    %58 = vector.load %arg13[%c0_25, %c0_26] : memref<64x32xbf16, #tpu.memory_space<vmem>>, vector<64x32xbf16>
    %59 = tpu.concatenate %48, %48, %48, %48 in 1 : vector<4x16x32xbf16>, vector<4x16x32xbf16>, vector<4x16x32xbf16>, vector<4x16x32xbf16> -> vector<4x64x32xbf16>
    %60 = vector.shape_cast %58 : vector<64x32xbf16> to vector<1x64x32xbf16>
    %61 = vector.broadcast %60 : vector<1x64x32xbf16> to vector<4x64x32xbf16>
    %62 = arith.mulf %59, %61 : vector<4x64x32xbf16>
    %63 = tpu.concatenate %57, %57, %57, %57 in 1 : vector<4x16x32xbf16>, vector<4x16x32xbf16>, vector<4x16x32xbf16>, vector<4x16x32xbf16> -> vector<4x64x32xbf16>
    %64 = vector.shape_cast %58 : vector<64x32xbf16> to vector<1x64x32xbf16>
    %65 = vector.broadcast %64 : vector<1x64x32xbf16> to vector<4x64x32xbf16>
    %66 = arith.mulf %63, %65 : vector<4x64x32xbf16>
    %cst_27 = arith.constant dense<0.000000e+00> : vector<4x16x64xf32>
    %67 = tpu.matmul %39, %62, %cst_27 {dimension_numbers = #tpu.dot_dimension_numbers<[2], [2], [1], [1], [0, 0, 0, 1, 1, 1], [0], [0]>} : vector<4x16x32xbf16>, vector<4x64x32xbf16>, vector<4x16x64xf32> -> vector<4x16x64xf32>
    %c0_28 = arith.constant 0 : index
    %c0_29 = arith.constant 0 : index
    %c0_30 = arith.constant 0 : index
    %68 = vector.load %arg12[%c0_28, %c0_29, %c0_30] : memref<1x16x64xf32, #tpu.memory_space<vmem>>, vector<1x16x64xf32>
    %69 = vector.broadcast %68 : vector<1x16x64xf32> to vector<4x16x64xf32>
    %70 = arith.addf %67, %69 : vector<4x16x64xf32>
    %cst_31 = arith.constant dense<0xFF800000> : vector<4x16xf32>
    %71 = vector.multi_reduction <maximumf>, %70, %cst_31 [2] : vector<4x16x64xf32> to vector<4x16xf32>
    %72 = vector.shape_cast %71 : vector<4x16xf32> to vector<4x16x1xf32>
    %73 = vector.broadcast %72 : vector<4x16x1xf32> to vector<4x16x64xf32>
    %74 = arith.subf %70, %73 : vector<4x16x64xf32>
    %75 = math.exp %74 : vector<4x16x64xf32>
    %76 = vector.shape_cast %75 : vector<4x16x64xf32> to vector<64x64xf32>
    %c0_32 = arith.constant 0 : index
    %c0_33 = arith.constant 0 : index
    %77 = vector.load %arg14[%c0_32, %c0_33] : memref<64x64xf32, #tpu.memory_space<vmem>>, vector<64x64xf32>
    %cst_34 = arith.constant dense<0.000000e+00> : vector<64x64xf32>
    %78 = tpu.matmul %76, %77, %cst_34 {dimension_numbers = #tpu.dot_dimension_numbers<[1], [0], [0], [1], [0, 0, 1, 1], [], []>} : vector<64x64xf32>, vector<64x64xf32>, vector<64x64xf32> -> vector<64x64xf32>
    %79 = tpu.reciprocal %78 {approx = true} : vector<64x64xf32> -> vector<64x64xf32>
    %80 = arith.mulf %76, %79 : vector<64x64xf32>
    %81 = arith.truncf %80 : vector<64x64xf32> to vector<64x64xbf16>
    %82 = vector.shape_cast %81 : vector<64x64xbf16> to vector<4x16x64xbf16>
    %cst_35 = arith.constant dense<0.000000e+00> : vector<4x16x32xf32>
    %83 = tpu.matmul %82, %66, %cst_35 {dimension_numbers = #tpu.dot_dimension_numbers<[2], [1], [1], [2], [0, 0, 0, 1, 1, 2], [0], [0]>} : vector<4x16x64xbf16>, vector<4x64x32xbf16>, vector<4x16x32xf32> -> vector<4x16x32xf32>
    %84 = vector.shape_cast %83 : vector<4x16x32xf32> to vector<64x32xf32>
    %85 = arith.truncf %84 : vector<64x32xf32> to vector<64x32xbf16>
    %c0_36 = arith.constant 0 : index
    %c0_37 = arith.constant 0 : index
    %86 = vector.load %arg10[%c0_36, %c0_37] : memref<32x32xbf16, #tpu.memory_space<vmem>>, vector<32x32xbf16>
    %cst_38 = arith.constant dense<0.000000e+00> : vector<64x32xf32>
    %87 = tpu.matmul %85, %86, %cst_38 {dimension_numbers = #tpu.dot_dimension_numbers<[1], [0], [0], [1], [0, 0, 1, 1], [], []>} : vector<64x32xbf16>, vector<32x32xbf16>, vector<64x32xf32> -> vector<64x32xf32>
    %c0_39 = arith.constant 0 : index
    %c0_40 = arith.constant 0 : index
    %88 = vector.load %arg11[%c0_39, %c0_40] : memref<1x32xf32, #tpu.memory_space<vmem>>, vector<1x32xf32>
    %89 = vector.shape_cast %88 : vector<1x32xf32> to vector<32xf32>
    %90 = vector.shape_cast %89 : vector<32xf32> to vector<1x32xf32>
    %91 = vector.broadcast %90 : vector<1x32xf32> to vector<64x32xf32>
    %92 = arith.addf %87, %91 : vector<64x32xf32>
    %93 = vector.shape_cast %92 : vector<64x32xf32> to vector<4x16x32xf32>
    %c0_41 = arith.constant 0 : index
    %c0_42 = arith.constant 0 : index
    %c0_43 = arith.constant 0 : index
    %94 = vector.load %arg15[%c0_41, %c0_42, %c0_43] : memref<4x16x32xf32, #tpu.memory_space<vmem>>, vector<4x16x32xf32>
    tpu.vector_store %arg15[%c0_41, %c0_42, %c0_43], %93 {strides = array<i32>} : memref<4x16x32xf32, #tpu.memory_space<vmem>>, vector<4x16x32xf32>,
    return
  }
  func.func @transform_0(%arg0: i32) -> (i32, i32, i32) {
    %c0_i32 = arith.constant 0 : i32
    %c0_i32_0 = arith.constant 0 : i32
    %c0_i32_1 = arith.constant 0 : i32
    return %arg0, %c0_i32, %c0_i32_0 : i32, i32, i32
  }
  func.func @transform_1(%arg0: i32) -> (i32, i32) {
    %c0_i32 = arith.constant 0 : i32
    %c0_i32_0 = arith.constant 0 : i32
    %c0_i32_1 = arith.constant 0 : i32
    return %c0_i32, %c0_i32_0 : i32, i32
  }
  func.func @transform_2(%arg0: i32) -> (i32, i32) {
    %c0_i32 = arith.constant 0 : i32
    %c0_i32_0 = arith.constant 0 : i32
    %c0_i32_1 = arith.constant 0 : i32
    return %c0_i32, %c0_i32_0 : i32, i32
  }
  func.func @transform_3(%arg0: i32) -> (i32, i32) {
    %c0_i32 = arith.constant 0 : i32
    %c0_i32_0 = arith.constant 0 : i32
    %c0_i32_1 = arith.constant 0 : i32
    return %c0_i32, %c0_i32_0 : i32, i32
  }
  func.func @transform_4(%arg0: i32) -> (i32, i32) {
    %c0_i32 = arith.constant 0 : i32
    %c0_i32_0 = arith.constant 0 : i32
    %c0_i32_1 = arith.constant 0 : i32
    return %c0_i32, %c0_i32_0 : i32, i32
  }
  func.func @transform_5(%arg0: i32) -> (i32, i32) {
    %c0_i32 = arith.constant 0 : i32
    %c0_i32_0 = arith.constant 0 : i32
    %c0_i32_1 = arith.constant 0 : i32
    return %c0_i32, %c0_i32_0 : i32, i32
  }
  func.func @transform_6(%arg0: i32) -> (i32, i32) {
    %c0_i32 = arith.constant 0 : i32
    %c0_i32_0 = arith.constant 0 : i32
    %c0_i32_1 = arith.constant 0 : i32
    return %c0_i32, %c0_i32_0 : i32, i32
  }
  func.func @transform_7(%arg0: i32) -> (i32, i32) {
    %c0_i32 = arith.constant 0 : i32
    %c0_i32_0 = arith.constant 0 : i32
    %c0_i32_1 = arith.constant 0 : i32
    return %c0_i32, %c0_i32_0 : i32, i32
  }
  func.func @transform_8(%arg0: i32) -> (i32, i32) {
    %c0_i32 = arith.constant 0 : i32
    %c0_i32_0 = arith.constant 0 : i32
    %c0_i32_1 = arith.constant 0 : i32
    return %c0_i32, %c0_i32_0 : i32, i32
  }
  func.func @transform_9(%arg0: i32) -> (i32, i32) {
    %c0_i32 = arith.constant 0 : i32
    %c0_i32_0 = arith.constant 0 : i32
    %c0_i32_1 = arith.constant 0 : i32
    return %c0_i32, %c0_i32_0 : i32, i32
  }
  func.func @transform_10(%arg0: i32) -> (i32, i32) {
    %c0_i32 = arith.constant 0 : i32
    %c0_i32_0 = arith.constant 0 : i32
    %c0_i32_1 = arith.constant 0 : i32
    return %c0_i32, %c0_i32_0 : i32, i32
  }
  func.func @transform_11(%arg0: i32) -> (i32, i32, i32) {
    %c0_i32 = arith.constant 0 : i32
    %c0_i32_0 = arith.constant 0 : i32
    %c0_i32_1 = arith.constant 0 : i32
    %c0_i32_2 = arith.constant 0 : i32
    return %c0_i32, %c0_i32_0, %c0_i32_1 : i32, i32, i32
  }
  func.func @transform_12(%arg0: i32) -> (i32, i32) {
    %c0_i32 = arith.constant 0 : i32
    %c0_i32_0 = arith.constant 0 : i32
    %c0_i32_1 = arith.constant 0 : i32
    return %c0_i32, %c0_i32_0 : i32, i32
  }
  func.func @transform_13(%arg0: i32) -> (i32, i32) {
    %c0_i32 = arith.constant 0 : i32
    %c0_i32_0 = arith.constant 0 : i32
    %c0_i32_1 = arith.constant 0 : i32
    return %c0_i32, %c0_i32_0 : i32, i32
  }
  func.func @transform_14(%arg0: i32) -> (i32, i32, i32) {
    %c0_i32 = arith.constant 0 : i32
    %c0_i32_0 = arith.constant 0 : i32
    %c0_i32_1 = arith.constant 0 : i32
    return %arg0, %c0_i32, %c0_i32_0 : i32, i32, i32
  }
}

module attributes {stable_mosaic.version = 11 : i64} {
  func.func @mlp_kernel(%arg0: i32, %arg1: memref<64x32xf32, #tpu.memory_space<vmem>>, %arg2: memref<64x32xf32, #tpu.memory_space<vmem>>, %arg3: memref<1x32xf32, #tpu.memory_space<vmem>>, %arg4: memref<1x32xf32, #tpu.memory_space<vmem>>, %arg5: memref<32x128xbf16, #tpu.memory_space<vmem>>, %arg6: memref<1x128xf32, #tpu.memory_space<vmem>>, %arg7: memref<128x32xbf16, #tpu.memory_space<vmem>>, %arg8: memref<1x32xf32, #tpu.memory_space<vmem>>, %arg9: memref<64x32xf32, #tpu.memory_space<vmem>>) attributes {dimension_semantics = [#tpu.dimension_semantics<parallel>], iteration_bounds = array<i64: 2>, scalar_prefetch = 0 : i64, scratch_operands = 0 : i64, tpu.core_type = #tpu.core_type<tc>, window_params = [{transform_indices = @transform_0, window_bounds = array<i64: 64, 32>}, {transform_indices = @transform_1, window_bounds = array<i64: 64, 32>}, {pipeline_mode = #tpu.pipeline_mode<synchronous>, transform_indices = @transform_2, window_bounds = array<i64: 1, 32>}, {pipeline_mode = #tpu.pipeline_mode<synchronous>, transform_indices = @transform_3, window_bounds = array<i64: 1, 32>}, {pipeline_mode = #tpu.pipeline_mode<synchronous>, transform_indices = @transform_4, window_bounds = array<i64: 32, 128>}, {pipeline_mode = #tpu.pipeline_mode<synchronous>, transform_indices = @transform_5, window_bounds = array<i64: 1, 128>}, {pipeline_mode = #tpu.pipeline_mode<synchronous>, transform_indices = @transform_6, window_bounds = array<i64: 128, 32>}, {pipeline_mode = #tpu.pipeline_mode<synchronous>, transform_indices = @transform_7, window_bounds = array<i64: 1, 32>}, {transform_indices = @transform_8, window_bounds = array<i64: 64, 32>}]} {
    %c0 = arith.constant 0 : index
    %c0_0 = arith.constant 0 : index
    %0 = vector.load %arg1[%c0, %c0_0] : memref<64x32xf32, #tpu.memory_space<vmem>>, vector<64x32xf32>
    %c0_1 = arith.constant 0 : index
    %c0_2 = arith.constant 0 : index
    %1 = vector.load %arg2[%c0_1, %c0_2] : memref<64x32xf32, #tpu.memory_space<vmem>>, vector<64x32xf32>
    %2 = arith.addf %0, %1 : vector<64x32xf32>
    %c0_3 = arith.constant 0 : index
    %c0_4 = arith.constant 0 : index
    %3 = vector.load %arg3[%c0_3, %c0_4] : memref<1x32xf32, #tpu.memory_space<vmem>>, vector<1x32xf32>
    %4 = vector.shape_cast %3 : vector<1x32xf32> to vector<32xf32>
    %c0_5 = arith.constant 0 : index
    %c0_6 = arith.constant 0 : index
    %5 = vector.load %arg4[%c0_5, %c0_6] : memref<1x32xf32, #tpu.memory_space<vmem>>, vector<1x32xf32>
    %6 = vector.shape_cast %5 : vector<1x32xf32> to vector<32xf32>
    %cst = arith.constant dense<0.000000e+00> : vector<64xf32>
    %7 = vector.multi_reduction <add>, %2, %cst [1] : vector<64x32xf32> to vector<64xf32>
    %8 = vector.shape_cast %7 : vector<64xf32> to vector<64x1xf32>
    %cst_7 = arith.constant 3.200000e+01 : f32
    %9 = vector.broadcast %cst_7 : f32 to vector<64x1xf32>
    %10 = arith.divf %8, %9 : vector<64x1xf32>
    %11 = vector.broadcast %10 : vector<64x1xf32> to vector<64x32xf32>
    %12 = arith.subf %2, %11 : vector<64x32xf32>
    %13 = arith.mulf %12, %12 : vector<64x32xf32>
    %cst_8 = arith.constant dense<0.000000e+00> : vector<64xf32>
    %14 = vector.multi_reduction <add>, %13, %cst_8 [1] : vector<64x32xf32> to vector<64xf32>
    %15 = vector.shape_cast %14 : vector<64xf32> to vector<64x1xf32>
    %cst_9 = arith.constant 3.200000e+01 : f32
    %16 = vector.broadcast %cst_9 : f32 to vector<64x1xf32>
    %17 = arith.divf %15, %16 : vector<64x1xf32>
    %18 = vector.broadcast %10 : vector<64x1xf32> to vector<64x32xf32>
    %19 = arith.subf %2, %18 : vector<64x32xf32>
    %cst_10 = arith.constant 9.99999974E-6 : f32
    %20 = vector.broadcast %cst_10 : f32 to vector<64x1xf32>
    %21 = arith.addf %17, %20 : vector<64x1xf32>
    %22 = math.rsqrt %21 : vector<64x1xf32>
    %23 = vector.broadcast %22 : vector<64x1xf32> to vector<64x32xf32>
    %24 = arith.mulf %19, %23 : vector<64x32xf32>
    %25 = vector.shape_cast %4 : vector<32xf32> to vector<1x32xf32>
    %26 = vector.broadcast %25 : vector<1x32xf32> to vector<64x32xf32>
    %27 = arith.mulf %24, %26 : vector<64x32xf32>
    %28 = vector.shape_cast %6 : vector<32xf32> to vector<1x32xf32>
    %29 = vector.broadcast %28 : vector<1x32xf32> to vector<64x32xf32>
    %30 = arith.addf %27, %29 : vector<64x32xf32>
    %31 = arith.truncf %30 : vector<64x32xf32> to vector<64x32xbf16>
    %c0_11 = arith.constant 0 : index
    %c0_12 = arith.constant 0 : index
    %32 = vector.load %arg5[%c0_11, %c0_12] : memref<32x128xbf16, #tpu.memory_space<vmem>>, vector<32x128xbf16>
    %cst_13 = arith.constant dense<0.000000e+00> : vector<64x128xf32>
    %33 = tpu.matmul %31, %32, %cst_13 {dimension_numbers = #tpu.dot_dimension_numbers<[1], [0], [0], [1], [0, 0, 1, 1], [], []>} : vector<64x32xbf16>, vector<32x128xbf16>, vector<64x128xf32> -> vector<64x128xf32>
    %c0_14 = arith.constant 0 : index
    %c0_15 = arith.constant 0 : index
    %34 = vector.load %arg6[%c0_14, %c0_15] : memref<1x128xf32, #tpu.memory_space<vmem>>, vector<1x128xf32>
    %35 = vector.shape_cast %34 : vector<1x128xf32> to vector<128xf32>
    %36 = vector.shape_cast %35 : vector<128xf32> to vector<1x128xf32>
    %37 = vector.broadcast %36 : vector<1x128xf32> to vector<64x128xf32>
    %38 = arith.addf %33, %37 : vector<64x128xf32>
    %cst_16 = arith.constant 5.000000e-01 : f32
    %39 = vector.broadcast %cst_16 : f32 to vector<64x128xf32>
    %40 = arith.mulf %39, %38 : vector<64x128xf32>
    %cst_17 = arith.constant 0.707106769 : f32
    %41 = vector.broadcast %cst_17 : f32 to vector<64x128xf32>
    %42 = arith.mulf %38, %41 : vector<64x128xf32>
    %43 = math.erf %42 : vector<64x128xf32>
    %cst_18 = arith.constant 1.000000e+00 : f32
    %44 = vector.broadcast %cst_18 : f32 to vector<64x128xf32>
    %45 = arith.addf %44, %43 : vector<64x128xf32>
    %46 = arith.mulf %40, %45 : vector<64x128xf32>
    %47 = arith.truncf %46 : vector<64x128xf32> to vector<64x128xbf16>
    %c0_19 = arith.constant 0 : index
    %c0_20 = arith.constant 0 : index
    %48 = vector.load %arg7[%c0_19, %c0_20] : memref<128x32xbf16, #tpu.memory_space<vmem>>, vector<128x32xbf16>
    %cst_21 = arith.constant dense<0.000000e+00> : vector<64x32xf32>
    %49 = tpu.matmul %47, %48, %cst_21 {dimension_numbers = #tpu.dot_dimension_numbers<[1], [0], [0], [1], [0, 0, 1, 1], [], []>} : vector<64x128xbf16>, vector<128x32xbf16>, vector<64x32xf32> -> vector<64x32xf32>
    %c0_22 = arith.constant 0 : index
    %c0_23 = arith.constant 0 : index
    %50 = vector.load %arg8[%c0_22, %c0_23] : memref<1x32xf32, #tpu.memory_space<vmem>>, vector<1x32xf32>
    %51 = vector.shape_cast %50 : vector<1x32xf32> to vector<32xf32>
    %52 = vector.shape_cast %51 : vector<32xf32> to vector<1x32xf32>
    %53 = vector.broadcast %52 : vector<1x32xf32> to vector<64x32xf32>
    %54 = arith.addf %49, %53 : vector<64x32xf32>
    %55 = arith.addf %2, %54 : vector<64x32xf32>
    %c0_24 = arith.constant 0 : index
    %c0_25 = arith.constant 0 : index
    %56 = vector.load %arg9[%c0_24, %c0_25] : memref<64x32xf32, #tpu.memory_space<vmem>>, vector<64x32xf32>
    tpu.vector_store %arg9[%c0_24, %c0_25], %55 {strides = array<i32>} : memref<64x32xf32, #tpu.memory_space<vmem>>, vector<64x32xf32>,
    return
  }
  func.func @transform_0(%arg0: i32) -> (i32, i32) {
    %c0_i32 = arith.constant 0 : i32
    %c0_i32_0 = arith.constant 0 : i32
    return %arg0, %c0_i32 : i32, i32
  }
  func.func @transform_1(%arg0: i32) -> (i32, i32) {
    %c0_i32 = arith.constant 0 : i32
    %c0_i32_0 = arith.constant 0 : i32
    return %arg0, %c0_i32 : i32, i32
  }
  func.func @transform_2(%arg0: i32) -> (i32, i32) {
    %c0_i32 = arith.constant 0 : i32
    %c0_i32_0 = arith.constant 0 : i32
    %c0_i32_1 = arith.constant 0 : i32
    return %c0_i32, %c0_i32_0 : i32, i32
  }
  func.func @transform_3(%arg0: i32) -> (i32, i32) {
    %c0_i32 = arith.constant 0 : i32
    %c0_i32_0 = arith.constant 0 : i32
    %c0_i32_1 = arith.constant 0 : i32
    return %c0_i32, %c0_i32_0 : i32, i32
  }
  func.func @transform_4(%arg0: i32) -> (i32, i32) {
    %c0_i32 = arith.constant 0 : i32
    %c0_i32_0 = arith.constant 0 : i32
    %c0_i32_1 = arith.constant 0 : i32
    return %c0_i32, %c0_i32_0 : i32, i32
  }
  func.func @transform_5(%arg0: i32) -> (i32, i32) {
    %c0_i32 = arith.constant 0 : i32
    %c0_i32_0 = arith.constant 0 : i32
    %c0_i32_1 = arith.constant 0 : i32
    return %c0_i32, %c0_i32_0 : i32, i32
  }
  func.func @transform_6(%arg0: i32) -> (i32, i32) {
    %c0_i32 = arith.constant 0 : i32
    %c0_i32_0 = arith.constant 0 : i32
    %c0_i32_1 = arith.constant 0 : i32
    return %c0_i32, %c0_i32_0 : i32, i32
  }
  func.func @transform_7(%arg0: i32) -> (i32, i32) {
    %c0_i32 = arith.constant 0 : i32
    %c0_i32_0 = arith.constant 0 : i32
    %c0_i32_1 = arith.constant 0 : i32
    return %c0_i32, %c0_i32_0 : i32, i32
  }
  func.func @transform_8(%arg0: i32) -> (i32, i32) {
    %c0_i32 = arith.constant 0 : i32
    %c0_i32_0 = arith.constant 0 : i32
    return %arg0, %c0_i32 : i32, i32
  }
}

module attributes {stable_mosaic.version = 11 : i64} {
  func.func @window_attn_kernel(%arg0: i32, %arg1: memref<4x16x32xf32, #tpu.memory_space<vmem>>, %arg2: memref<1x32xf32, #tpu.memory_space<vmem>>, %arg3: memref<1x32xf32, #tpu.memory_space<vmem>>, %arg4: memref<32x32xbf16, #tpu.memory_space<vmem>>, %arg5: memref<1x32xf32, #tpu.memory_space<vmem>>, %arg6: memref<32x32xbf16, #tpu.memory_space<vmem>>, %arg7: memref<1x32xf32, #tpu.memory_space<vmem>>, %arg8: memref<32x32xbf16, #tpu.memory_space<vmem>>, %arg9: memref<1x32xf32, #tpu.memory_space<vmem>>, %arg10: memref<32x32xbf16, #tpu.memory_space<vmem>>, %arg11: memref<1x32xf32, #tpu.memory_space<vmem>>, %arg12: memref<4x16x64xf32, #tpu.memory_space<vmem>>, %arg13: memref<64x32xbf16, #tpu.memory_space<vmem>>, %arg14: memref<64x64xf32, #tpu.memory_space<vmem>>, %arg15: memref<4x16x32xf32, #tpu.memory_space<vmem>>) attributes {dimension_semantics = [#tpu.dimension_semantics<parallel>], iteration_bounds = array<i64: 2>, scalar_prefetch = 0 : i64, scratch_operands = 0 : i64, tpu.core_type = #tpu.core_type<tc>, window_params = [{transform_indices = @transform_0, window_bounds = array<i64: 4, 16, 32>}, {pipeline_mode = #tpu.pipeline_mode<synchronous>, transform_indices = @transform_1, window_bounds = array<i64: 1, 32>}, {pipeline_mode = #tpu.pipeline_mode<synchronous>, transform_indices = @transform_2, window_bounds = array<i64: 1, 32>}, {pipeline_mode = #tpu.pipeline_mode<synchronous>, transform_indices = @transform_3, window_bounds = array<i64: 32, 32>}, {pipeline_mode = #tpu.pipeline_mode<synchronous>, transform_indices = @transform_4, window_bounds = array<i64: 1, 32>}, {pipeline_mode = #tpu.pipeline_mode<synchronous>, transform_indices = @transform_5, window_bounds = array<i64: 32, 32>}, {pipeline_mode = #tpu.pipeline_mode<synchronous>, transform_indices = @transform_6, window_bounds = array<i64: 1, 32>}, {pipeline_mode = #tpu.pipeline_mode<synchronous>, transform_indices = @transform_7, window_bounds = array<i64: 32, 32>}, {pipeline_mode = #tpu.pipeline_mode<synchronous>, transform_indices = @transform_8, window_bounds = array<i64: 1, 32>}, {pipeline_mode = #tpu.pipeline_mode<synchronous>, transform_indices = @transform_9, window_bounds = array<i64: 32, 32>}, {pipeline_mode = #tpu.pipeline_mode<synchronous>, transform_indices = @transform_10, window_bounds = array<i64: 1, 32>}, {transform_indices = @transform_11, window_bounds = array<i64: 4, 16, 64>}, {pipeline_mode = #tpu.pipeline_mode<synchronous>, transform_indices = @transform_12, window_bounds = array<i64: 64, 32>}, {pipeline_mode = #tpu.pipeline_mode<synchronous>, transform_indices = @transform_13, window_bounds = array<i64: 64, 64>}, {transform_indices = @transform_14, window_bounds = array<i64: 4, 16, 32>}]} {
    %c0 = arith.constant 0 : index
    %c0_0 = arith.constant 0 : index
    %c0_1 = arith.constant 0 : index
    %0 = vector.load %arg1[%c0, %c0_0, %c0_1] : memref<4x16x32xf32, #tpu.memory_space<vmem>>, vector<4x16x32xf32>
    %1 = vector.shape_cast %0 : vector<4x16x32xf32> to vector<64x32xf32>
    %c0_2 = arith.constant 0 : index
    %c0_3 = arith.constant 0 : index
    %2 = vector.load %arg2[%c0_2, %c0_3] : memref<1x32xf32, #tpu.memory_space<vmem>>, vector<1x32xf32>
    %3 = vector.shape_cast %2 : vector<1x32xf32> to vector<32xf32>
    %c0_4 = arith.constant 0 : index
    %c0_5 = arith.constant 0 : index
    %4 = vector.load %arg3[%c0_4, %c0_5] : memref<1x32xf32, #tpu.memory_space<vmem>>, vector<1x32xf32>
    %5 = vector.shape_cast %4 : vector<1x32xf32> to vector<32xf32>
    %cst = arith.constant dense<0.000000e+00> : vector<64xf32>
    %6 = vector.multi_reduction <add>, %1, %cst [1] : vector<64x32xf32> to vector<64xf32>
    %7 = vector.shape_cast %6 : vector<64xf32> to vector<64x1xf32>
    %cst_6 = arith.constant 3.200000e+01 : f32
    %8 = vector.broadcast %cst_6 : f32 to vector<64x1xf32>
    %9 = arith.divf %7, %8 : vector<64x1xf32>
    %10 = vector.broadcast %9 : vector<64x1xf32> to vector<64x32xf32>
    %11 = arith.subf %1, %10 : vector<64x32xf32>
    %12 = arith.mulf %11, %11 : vector<64x32xf32>
    %cst_7 = arith.constant dense<0.000000e+00> : vector<64xf32>
    %13 = vector.multi_reduction <add>, %12, %cst_7 [1] : vector<64x32xf32> to vector<64xf32>
    %14 = vector.shape_cast %13 : vector<64xf32> to vector<64x1xf32>
    %cst_8 = arith.constant 3.200000e+01 : f32
    %15 = vector.broadcast %cst_8 : f32 to vector<64x1xf32>
    %16 = arith.divf %14, %15 : vector<64x1xf32>
    %17 = vector.broadcast %9 : vector<64x1xf32> to vector<64x32xf32>
    %18 = arith.subf %1, %17 : vector<64x32xf32>
    %cst_9 = arith.constant 9.99999974E-6 : f32
    %19 = vector.broadcast %cst_9 : f32 to vector<64x1xf32>
    %20 = arith.addf %16, %19 : vector<64x1xf32>
    %21 = math.rsqrt %20 : vector<64x1xf32>
    %22 = vector.broadcast %21 : vector<64x1xf32> to vector<64x32xf32>
    %23 = arith.mulf %18, %22 : vector<64x32xf32>
    %24 = vector.shape_cast %3 : vector<32xf32> to vector<1x32xf32>
    %25 = vector.broadcast %24 : vector<1x32xf32> to vector<64x32xf32>
    %26 = arith.mulf %23, %25 : vector<64x32xf32>
    %27 = vector.shape_cast %5 : vector<32xf32> to vector<1x32xf32>
    %28 = vector.broadcast %27 : vector<1x32xf32> to vector<64x32xf32>
    %29 = arith.addf %26, %28 : vector<64x32xf32>
    %30 = arith.truncf %29 : vector<64x32xf32> to vector<64x32xbf16>
    %c0_10 = arith.constant 0 : index
    %c0_11 = arith.constant 0 : index
    %31 = vector.load %arg4[%c0_10, %c0_11] : memref<32x32xbf16, #tpu.memory_space<vmem>>, vector<32x32xbf16>
    %cst_12 = arith.constant dense<0.000000e+00> : vector<64x32xf32>
    %32 = tpu.matmul %30, %31, %cst_12 {dimension_numbers = #tpu.dot_dimension_numbers<[1], [0], [0], [1], [0, 0, 1, 1], [], []>} : vector<64x32xbf16>, vector<32x32xbf16>, vector<64x32xf32> -> vector<64x32xf32>
    %c0_13 = arith.constant 0 : index
    %c0_14 = arith.constant 0 : index
    %33 = vector.load %arg5[%c0_13, %c0_14] : memref<1x32xf32, #tpu.memory_space<vmem>>, vector<1x32xf32>
    %34 = vector.shape_cast %33 : vector<1x32xf32> to vector<32xf32>
    %35 = vector.shape_cast %34 : vector<32xf32> to vector<1x32xf32>
    %36 = vector.broadcast %35 : vector<1x32xf32> to vector<64x32xf32>
    %37 = arith.addf %32, %36 : vector<64x32xf32>
    %38 = vector.shape_cast %37 : vector<64x32xf32> to vector<4x16x32xf32>
    %39 = arith.truncf %38 : vector<4x16x32xf32> to vector<4x16x32xbf16>
    %c0_15 = arith.constant 0 : index
    %c0_16 = arith.constant 0 : index
    %40 = vector.load %arg6[%c0_15, %c0_16] : memref<32x32xbf16, #tpu.memory_space<vmem>>, vector<32x32xbf16>
    %cst_17 = arith.constant dense<0.000000e+00> : vector<64x32xf32>
    %41 = tpu.matmul %30, %40, %cst_17 {dimension_numbers = #tpu.dot_dimension_numbers<[1], [0], [0], [1], [0, 0, 1, 1], [], []>} : vector<64x32xbf16>, vector<32x32xbf16>, vector<64x32xf32> -> vector<64x32xf32>
    %c0_18 = arith.constant 0 : index
    %c0_19 = arith.constant 0 : index
    %42 = vector.load %arg7[%c0_18, %c0_19] : memref<1x32xf32, #tpu.memory_space<vmem>>, vector<1x32xf32>
    %43 = vector.shape_cast %42 : vector<1x32xf32> to vector<32xf32>
    %44 = vector.shape_cast %43 : vector<32xf32> to vector<1x32xf32>
    %45 = vector.broadcast %44 : vector<1x32xf32> to vector<64x32xf32>
    %46 = arith.addf %41, %45 : vector<64x32xf32>
    %47 = vector.shape_cast %46 : vector<64x32xf32> to vector<4x16x32xf32>
    %48 = arith.truncf %47 : vector<4x16x32xf32> to vector<4x16x32xbf16>
    %c0_20 = arith.constant 0 : index
    %c0_21 = arith.constant 0 : index
    %49 = vector.load %arg8[%c0_20, %c0_21] : memref<32x32xbf16, #tpu.memory_space<vmem>>, vector<32x32xbf16>
    %cst_22 = arith.constant dense<0.000000e+00> : vector<64x32xf32>
    %50 = tpu.matmul %30, %49, %cst_22 {dimension_numbers = #tpu.dot_dimension_numbers<[1], [0], [0], [1], [0, 0, 1, 1], [], []>} : vector<64x32xbf16>, vector<32x32xbf16>, vector<64x32xf32> -> vector<64x32xf32>
    %c0_23 = arith.constant 0 : index
    %c0_24 = arith.constant 0 : index
    %51 = vector.load %arg9[%c0_23, %c0_24] : memref<1x32xf32, #tpu.memory_space<vmem>>, vector<1x32xf32>
    %52 = vector.shape_cast %51 : vector<1x32xf32> to vector<32xf32>
    %53 = vector.shape_cast %52 : vector<32xf32> to vector<1x32xf32>
    %54 = vector.broadcast %53 : vector<1x32xf32> to vector<64x32xf32>
    %55 = arith.addf %50, %54 : vector<64x32xf32>
    %56 = vector.shape_cast %55 : vector<64x32xf32> to vector<4x16x32xf32>
    %57 = arith.truncf %56 : vector<4x16x32xf32> to vector<4x16x32xbf16>
    %c0_25 = arith.constant 0 : index
    %c0_26 = arith.constant 0 : index
    %58 = vector.load %arg13[%c0_25, %c0_26] : memref<64x32xbf16, #tpu.memory_space<vmem>>, vector<64x32xbf16>
    %59 = tpu.concatenate %48, %48, %48, %48 in 1 : vector<4x16x32xbf16>, vector<4x16x32xbf16>, vector<4x16x32xbf16>, vector<4x16x32xbf16> -> vector<4x64x32xbf16>
    %60 = vector.shape_cast %58 : vector<64x32xbf16> to vector<1x64x32xbf16>
    %61 = vector.broadcast %60 : vector<1x64x32xbf16> to vector<4x64x32xbf16>
    %62 = arith.mulf %59, %61 : vector<4x64x32xbf16>
    %63 = tpu.concatenate %57, %57, %57, %57 in 1 : vector<4x16x32xbf16>, vector<4x16x32xbf16>, vector<4x16x32xbf16>, vector<4x16x32xbf16> -> vector<4x64x32xbf16>
    %64 = vector.shape_cast %58 : vector<64x32xbf16> to vector<1x64x32xbf16>
    %65 = vector.broadcast %64 : vector<1x64x32xbf16> to vector<4x64x32xbf16>
    %66 = arith.mulf %63, %65 : vector<4x64x32xbf16>
    %cst_27 = arith.constant dense<0.000000e+00> : vector<4x16x64xf32>
    %67 = tpu.matmul %39, %62, %cst_27 {dimension_numbers = #tpu.dot_dimension_numbers<[2], [2], [1], [1], [0, 0, 0, 1, 1, 1], [0], [0]>} : vector<4x16x32xbf16>, vector<4x64x32xbf16>, vector<4x16x64xf32> -> vector<4x16x64xf32>
    %c0_28 = arith.constant 0 : index
    %c0_29 = arith.constant 0 : index
    %c0_30 = arith.constant 0 : index
    %68 = vector.load %arg12[%c0_28, %c0_29, %c0_30] : memref<4x16x64xf32, #tpu.memory_space<vmem>>, vector<4x16x64xf32>
    %69 = arith.addf %67, %68 : vector<4x16x64xf32>
    %cst_31 = arith.constant dense<0xFF800000> : vector<4x16xf32>
    %70 = vector.multi_reduction <maximumf>, %69, %cst_31 [2] : vector<4x16x64xf32> to vector<4x16xf32>
    %71 = vector.shape_cast %70 : vector<4x16xf32> to vector<4x16x1xf32>
    %72 = vector.broadcast %71 : vector<4x16x1xf32> to vector<4x16x64xf32>
    %73 = arith.subf %69, %72 : vector<4x16x64xf32>
    %74 = math.exp %73 : vector<4x16x64xf32>
    %75 = vector.shape_cast %74 : vector<4x16x64xf32> to vector<64x64xf32>
    %c0_32 = arith.constant 0 : index
    %c0_33 = arith.constant 0 : index
    %76 = vector.load %arg14[%c0_32, %c0_33] : memref<64x64xf32, #tpu.memory_space<vmem>>, vector<64x64xf32>
    %cst_34 = arith.constant dense<0.000000e+00> : vector<64x64xf32>
    %77 = tpu.matmul %75, %76, %cst_34 {dimension_numbers = #tpu.dot_dimension_numbers<[1], [0], [0], [1], [0, 0, 1, 1], [], []>} : vector<64x64xf32>, vector<64x64xf32>, vector<64x64xf32> -> vector<64x64xf32>
    %78 = tpu.reciprocal %77 {approx = true} : vector<64x64xf32> -> vector<64x64xf32>
    %79 = arith.mulf %75, %78 : vector<64x64xf32>
    %80 = arith.truncf %79 : vector<64x64xf32> to vector<64x64xbf16>
    %81 = vector.shape_cast %80 : vector<64x64xbf16> to vector<4x16x64xbf16>
    %cst_35 = arith.constant dense<0.000000e+00> : vector<4x16x32xf32>
    %82 = tpu.matmul %81, %66, %cst_35 {dimension_numbers = #tpu.dot_dimension_numbers<[2], [1], [1], [2], [0, 0, 0, 1, 1, 2], [0], [0]>} : vector<4x16x64xbf16>, vector<4x64x32xbf16>, vector<4x16x32xf32> -> vector<4x16x32xf32>
    %83 = vector.shape_cast %82 : vector<4x16x32xf32> to vector<64x32xf32>
    %84 = arith.truncf %83 : vector<64x32xf32> to vector<64x32xbf16>
    %c0_36 = arith.constant 0 : index
    %c0_37 = arith.constant 0 : index
    %85 = vector.load %arg10[%c0_36, %c0_37] : memref<32x32xbf16, #tpu.memory_space<vmem>>, vector<32x32xbf16>
    %cst_38 = arith.constant dense<0.000000e+00> : vector<64x32xf32>
    %86 = tpu.matmul %84, %85, %cst_38 {dimension_numbers = #tpu.dot_dimension_numbers<[1], [0], [0], [1], [0, 0, 1, 1], [], []>} : vector<64x32xbf16>, vector<32x32xbf16>, vector<64x32xf32> -> vector<64x32xf32>
    %c0_39 = arith.constant 0 : index
    %c0_40 = arith.constant 0 : index
    %87 = vector.load %arg11[%c0_39, %c0_40] : memref<1x32xf32, #tpu.memory_space<vmem>>, vector<1x32xf32>
    %88 = vector.shape_cast %87 : vector<1x32xf32> to vector<32xf32>
    %89 = vector.shape_cast %88 : vector<32xf32> to vector<1x32xf32>
    %90 = vector.broadcast %89 : vector<1x32xf32> to vector<64x32xf32>
    %91 = arith.addf %86, %90 : vector<64x32xf32>
    %92 = vector.shape_cast %91 : vector<64x32xf32> to vector<4x16x32xf32>
    %c0_41 = arith.constant 0 : index
    %c0_42 = arith.constant 0 : index
    %c0_43 = arith.constant 0 : index
    %93 = vector.load %arg15[%c0_41, %c0_42, %c0_43] : memref<4x16x32xf32, #tpu.memory_space<vmem>>, vector<4x16x32xf32>
    tpu.vector_store %arg15[%c0_41, %c0_42, %c0_43], %92 {strides = array<i32>} : memref<4x16x32xf32, #tpu.memory_space<vmem>>, vector<4x16x32xf32>,
    return
  }
  func.func @transform_0(%arg0: i32) -> (i32, i32, i32) {
    %c0_i32 = arith.constant 0 : i32
    %c0_i32_0 = arith.constant 0 : i32
    %c0_i32_1 = arith.constant 0 : i32
    return %arg0, %c0_i32, %c0_i32_0 : i32, i32, i32
  }
  func.func @transform_1(%arg0: i32) -> (i32, i32) {
    %c0_i32 = arith.constant 0 : i32
    %c0_i32_0 = arith.constant 0 : i32
    %c0_i32_1 = arith.constant 0 : i32
    return %c0_i32, %c0_i32_0 : i32, i32
  }
  func.func @transform_2(%arg0: i32) -> (i32, i32) {
    %c0_i32 = arith.constant 0 : i32
    %c0_i32_0 = arith.constant 0 : i32
    %c0_i32_1 = arith.constant 0 : i32
    return %c0_i32, %c0_i32_0 : i32, i32
  }
  func.func @transform_3(%arg0: i32) -> (i32, i32) {
    %c0_i32 = arith.constant 0 : i32
    %c0_i32_0 = arith.constant 0 : i32
    %c0_i32_1 = arith.constant 0 : i32
    return %c0_i32, %c0_i32_0 : i32, i32
  }
  func.func @transform_4(%arg0: i32) -> (i32, i32) {
    %c0_i32 = arith.constant 0 : i32
    %c0_i32_0 = arith.constant 0 : i32
    %c0_i32_1 = arith.constant 0 : i32
    return %c0_i32, %c0_i32_0 : i32, i32
  }
  func.func @transform_5(%arg0: i32) -> (i32, i32) {
    %c0_i32 = arith.constant 0 : i32
    %c0_i32_0 = arith.constant 0 : i32
    %c0_i32_1 = arith.constant 0 : i32
    return %c0_i32, %c0_i32_0 : i32, i32
  }
  func.func @transform_6(%arg0: i32) -> (i32, i32) {
    %c0_i32 = arith.constant 0 : i32
    %c0_i32_0 = arith.constant 0 : i32
    %c0_i32_1 = arith.constant 0 : i32
    return %c0_i32, %c0_i32_0 : i32, i32
  }
  func.func @transform_7(%arg0: i32) -> (i32, i32) {
    %c0_i32 = arith.constant 0 : i32
    %c0_i32_0 = arith.constant 0 : i32
    %c0_i32_1 = arith.constant 0 : i32
    return %c0_i32, %c0_i32_0 : i32, i32
  }
  func.func @transform_8(%arg0: i32) -> (i32, i32) {
    %c0_i32 = arith.constant 0 : i32
    %c0_i32_0 = arith.constant 0 : i32
    %c0_i32_1 = arith.constant 0 : i32
    return %c0_i32, %c0_i32_0 : i32, i32
  }
  func.func @transform_9(%arg0: i32) -> (i32, i32) {
    %c0_i32 = arith.constant 0 : i32
    %c0_i32_0 = arith.constant 0 : i32
    %c0_i32_1 = arith.constant 0 : i32
    return %c0_i32, %c0_i32_0 : i32, i32
  }
  func.func @transform_10(%arg0: i32) -> (i32, i32) {
    %c0_i32 = arith.constant 0 : i32
    %c0_i32_0 = arith.constant 0 : i32
    %c0_i32_1 = arith.constant 0 : i32
    return %c0_i32, %c0_i32_0 : i32, i32
  }
  func.func @transform_11(%arg0: i32) -> (i32, i32, i32) {
    %c1_i32 = arith.constant 1 : i32
    %c0_i32 = arith.constant 0 : i32
    %0 = arith.cmpi eq, %c1_i32, %c0_i32 : i32
    %c1_i32_0 = arith.constant 1 : i32
    %1 = arith.select %0, %c1_i32_0, %c1_i32 : i32
    %2 = arith.remsi %arg0, %1 : i32
    %c0_i32_1 = arith.constant 0 : i32
    %3 = arith.cmpi ne, %2, %c0_i32_1 : i32
    %c0_i32_2 = arith.constant 0 : i32
    %4 = arith.cmpi slt, %2, %c0_i32_2 : i32
    %c0_i32_3 = arith.constant 0 : i32
    %5 = arith.cmpi slt, %1, %c0_i32_3 : i32
    %6 = arith.xori %4, %5 : i1
    %7 = arith.andi %6, %3 : i1
    %8 = arith.addi %2, %1 : i32
    %9 = arith.select %7, %8, %2 : i32
    %c0_i32_4 = arith.constant 0 : i32
    %c0_i32_5 = arith.constant 0 : i32
    %c0_i32_6 = arith.constant 0 : i32
    return %9, %c0_i32_4, %c0_i32_5 : i32, i32, i32
  }
  func.func @transform_12(%arg0: i32) -> (i32, i32) {
    %c0_i32 = arith.constant 0 : i32
    %c0_i32_0 = arith.constant 0 : i32
    %c0_i32_1 = arith.constant 0 : i32
    return %c0_i32, %c0_i32_0 : i32, i32
  }
  func.func @transform_13(%arg0: i32) -> (i32, i32) {
    %c0_i32 = arith.constant 0 : i32
    %c0_i32_0 = arith.constant 0 : i32
    %c0_i32_1 = arith.constant 0 : i32
    return %c0_i32, %c0_i32_0 : i32, i32
  }
  func.func @transform_14(%arg0: i32) -> (i32, i32, i32) {
    %c0_i32 = arith.constant 0 : i32
    %c0_i32_0 = arith.constant 0 : i32
    %c0_i32_1 = arith.constant 0 : i32
    return %arg0, %c0_i32, %c0_i32_0 : i32, i32, i32
  }
}

module attributes {stable_mosaic.version = 11 : i64} {
  func.func @conv_residual_kernel(%arg0: i32, %arg1: memref<64x288xf32, #tpu.memory_space<vmem>>, %arg2: memref<288x32xbf16, #tpu.memory_space<vmem>>, %arg3: memref<1x32xf32, #tpu.memory_space<vmem>>, %arg4: memref<64x32xf32, #tpu.memory_space<vmem>>, %arg5: memref<64x32xf32, #tpu.memory_space<vmem>>) attributes {dimension_semantics = [#tpu.dimension_semantics<parallel>], iteration_bounds = array<i64: 2>, scalar_prefetch = 0 : i64, scratch_operands = 0 : i64, tpu.core_type = #tpu.core_type<tc>, window_params = [{transform_indices = @transform_0, window_bounds = array<i64: 64, 288>}, {pipeline_mode = #tpu.pipeline_mode<synchronous>, transform_indices = @transform_1, window_bounds = array<i64: 288, 32>}, {pipeline_mode = #tpu.pipeline_mode<synchronous>, transform_indices = @transform_2, window_bounds = array<i64: 1, 32>}, {transform_indices = @transform_3, window_bounds = array<i64: 64, 32>}, {transform_indices = @transform_4, window_bounds = array<i64: 64, 32>}]} {
    %c0 = arith.constant 0 : index
    %c0_0 = arith.constant 0 : index
    %0 = vector.load %arg1[%c0, %c0_0] : memref<64x288xf32, #tpu.memory_space<vmem>>, vector<64x288xf32>
    %1 = arith.truncf %0 : vector<64x288xf32> to vector<64x288xbf16>
    %c0_1 = arith.constant 0 : index
    %c0_2 = arith.constant 0 : index
    %2 = vector.load %arg2[%c0_1, %c0_2] : memref<288x32xbf16, #tpu.memory_space<vmem>>, vector<288x32xbf16>
    %cst = arith.constant dense<0.000000e+00> : vector<64x32xf32>
    %3 = tpu.matmul %1, %2, %cst {dimension_numbers = #tpu.dot_dimension_numbers<[1], [0], [0], [1], [0, 0, 1, 1], [], []>} : vector<64x288xbf16>, vector<288x32xbf16>, vector<64x32xf32> -> vector<64x32xf32>
    %c0_3 = arith.constant 0 : index
    %c0_4 = arith.constant 0 : index
    %4 = vector.load %arg3[%c0_3, %c0_4] : memref<1x32xf32, #tpu.memory_space<vmem>>, vector<1x32xf32>
    %5 = vector.shape_cast %4 : vector<1x32xf32> to vector<32xf32>
    %6 = vector.shape_cast %5 : vector<32xf32> to vector<1x32xf32>
    %7 = vector.broadcast %6 : vector<1x32xf32> to vector<64x32xf32>
    %8 = arith.addf %3, %7 : vector<64x32xf32>
    %c0_5 = arith.constant 0 : index
    %c0_6 = arith.constant 0 : index
    %9 = vector.load %arg4[%c0_5, %c0_6] : memref<64x32xf32, #tpu.memory_space<vmem>>, vector<64x32xf32>
    %10 = arith.addf %8, %9 : vector<64x32xf32>
    %c0_7 = arith.constant 0 : index
    %c0_8 = arith.constant 0 : index
    %11 = vector.load %arg5[%c0_7, %c0_8] : memref<64x32xf32, #tpu.memory_space<vmem>>, vector<64x32xf32>
    tpu.vector_store %arg5[%c0_7, %c0_8], %10 {strides = array<i32>} : memref<64x32xf32, #tpu.memory_space<vmem>>, vector<64x32xf32>,
    return
  }
  func.func @transform_0(%arg0: i32) -> (i32, i32) {
    %c0_i32 = arith.constant 0 : i32
    %c0_i32_0 = arith.constant 0 : i32
    return %arg0, %c0_i32 : i32, i32
  }
  func.func @transform_1(%arg0: i32) -> (i32, i32) {
    %c0_i32 = arith.constant 0 : i32
    %c0_i32_0 = arith.constant 0 : i32
    %c0_i32_1 = arith.constant 0 : i32
    return %c0_i32, %c0_i32_0 : i32, i32
  }
  func.func @transform_2(%arg0: i32) -> (i32, i32) {
    %c0_i32 = arith.constant 0 : i32
    %c0_i32_0 = arith.constant 0 : i32
    %c0_i32_1 = arith.constant 0 : i32
    return %c0_i32, %c0_i32_0 : i32, i32
  }
  func.func @transform_3(%arg0: i32) -> (i32, i32) {
    %c0_i32 = arith.constant 0 : i32
    %c0_i32_0 = arith.constant 0 : i32
    return %arg0, %c0_i32 : i32, i32
  }
  func.func @transform_4(%arg0: i32) -> (i32, i32) {
    %c0_i32 = arith.constant 0 : i32
    %c0_i32_0 = arith.constant 0 : i32
    return %arg0, %c0_i32 : i32, i32
  }
}

</mosaic_0001>

<bundles_post_ra>
// kernel: rstb_forward.6
= control target key start
LH: loop header
LB: loop body
LE: loop exit
PB: predicated region body
PF: predicated region fallthrough
CT: control target
= control target key end

     0   :  { %s1048_s27 = smov 0   ;;  %s1223_s0 = inlined_call_operand.vmem [shape: f32[128,32], index: 0, kind: input, shape index: {}]   ;;  %s1224_s1 = inlined_call_operand.vmem [shape: f32[128,32], index: 1, kind: input, shape index: {}]   ;;  %s1225_s2 = inlined_call_operand.vmem [shape: f32[1,32], index: 2, kind: input, shape index: {}]   ;;  %s1226_s3 = inlined_call_operand.vmem [shape: f32[1,32], index: 3, kind: input, shape index: {}]   ;;  %s1227_s4 = inlined_call_operand.vmem [shape: bf16[32,128], index: 4, kind: input, shape index: {}]   ;;  %s1228_s5 = inlined_call_operand.vmem [shape: f32[1,128], index: 5, kind: input, shape index: {}]   ;;  %s1229_s6 = inlined_call_operand.vmem [shape: bf16[128,32], index: 6, kind: input, shape index: {}]   ;;  %s1230_s7 = inlined_call_operand.vmem [shape: f32[1,32], index: 7, kind: input, shape index: {}]   ;;  %s1231_s8 = inlined_call_operand.vmem [shape: f32[128,32], index: 8, kind: output, shape index: {}]  }
   0x1 LB: > { %s860_s28 = sadd.s32 4294967295, %s1001_s27   ;;  %p864_p0 = scmp.ge.s32.totalorder %s1001_s27, 1  ;;  %s1001_s27 = sphi %s1048_s27, %s18_s27  }
   0x2   : > { %p274_p1 = scmp.lt.s32.totalorder %s1001_s27, 3 }
   0x4   : > { %p275_p2 = pnand %p864_p0, %p274_p1 }
   0x5   : > { %s865_s29 = sshll.u32 (!%p275_p2), %s860_s28, 3 }
   0x6   : > { %278 = sbr.rel (%p275_p2) target bundleno = 772 (0x304), region = 52  ;;  %p314_p3 = scmp.lt.s32.totalorder (!%p275_p2), %s865_s29, 15 }
   0xb   : > { %s1233_s29 = smov (!%p314_p3, %s865_s29), 15  ;;  %vm358_vm0 = vcmask 261120  }
   0xc   : > { %s1056_s30 = sshll.u32 %s1233_s29, 3 }
   0xd   : > { %s317_s11 = scalar_lea.vmem %s1223_s0, %s1056_s30  ;;  %s323_s14 = scalar_lea.vmem %s1224_s1, %s1056_s30 }
   0xe   : > { %v332_v0 = vld [vmem:[%s317_s11] sm:$0xff]  ;;  %v334_v2 = vld [vmem:[%s317_s11 + $0x10] sm:$0xff]  ;;  %v333_v5 = vld [vmem:[%s317_s11 + $0x8] sm:$0xff]  ;;  %s329_s25 = scalar_lea.vmem %s1231_s8, %s1056_s30 }
   0xf   : > { %v340_v1 = vld [vmem:[%s323_s14] sm:$0xff]  ;;  %v342_v4 = vld [vmem:[%s323_s14 + $0x10] sm:$0xff]  ;;  %v341_v6 = vld [vmem:[%s323_s14 + $0x8] sm:$0xff] }
  0x10   : > { %v1066_v3 = vadd.f32 %v340_v1, %v332_v0  ;;  %v1068_v7 = vadd.f32 %v342_v4, %v334_v2  ;;  %v1070_v8 = vadd.f32 %v341_v6, %v333_v5  ;;  %v335_v9 = vld [vmem:[%s317_s11 + $0x18] sm:$0xff]  ;;  %v336_v11 = vld [vmem:[%s317_s11 + $0x20] sm:$0xff]  ;;  %v337_v15 = vld [vmem:[%s317_s11 + $0x28] sm:$0xff] }
  0x11   : > { %v343_v10 = vld [vmem:[%s323_s14 + $0x18] sm:$0xff]  ;;  %v344_v14 = vld [vmem:[%s323_s14 + $0x20] sm:$0xff]  ;;  %v345_v16 = vld [vmem:[%s323_s14 + $0x28] sm:$0xff] }
  0x12   : > { %v359_v12 = vsel %vm358_vm0, %v1066_v3, 0.0  ;;  %v1074_v13 = vadd.f32 %v343_v10, %v335_v9  ;;  %v365_v17 = vsel %vm358_vm0, %v1068_v7, 0.0  ;;  %v362_v18 = vsel %vm358_vm0, %v1070_v8, 0.0  ;;  %v338_v22 = vld [vmem:[%s317_s11 + $0x30] sm:$0xff]  ;;  %v339_v24 = vld [vmem:[%s317_s11 + $0x38] sm:$0xff] }
  0x13   : > { %360 = vadd.xlane.f32.xlu0 %v359_v12  ;;  %366 = vadd.xlane.f32.xlu1 %v365_v17  ;;  %v1080_v19 = vadd.f32 %v344_v14, %v336_v11  ;;  %v1084_v21 = vadd.f32 %v345_v16, %v337_v15  ;;  %v346_v23 = vld [vmem:[%s323_s14 + $0x30] sm:$0xff]  ;;  %v347_v25 = vld [vmem:[%s323_s14 + $0x38] sm:$0xff]  ;;  %v953_v11 = vld [vmem:[%s1227_s4 + $0x8] sm:$0xff]  }
  0x14   : > { %v368_v20 = vsel %vm358_vm0, %v1074_v13, 0.0  ;;  %v1088_v27 = vadd.f32 %v346_v23, %v338_v22  ;;  %v1092_v29 = vadd.f32 %v347_v25, %v339_v24  ;;  %v954_v12 = vld [vmem:[%s1227_s4] sm:$0xff]   ;;  %909 = vmatprep.subr.bf16.mxu0 %v953_v11 }
  0x15   : > { %v371_v26 = vsel %vm358_vm0, %v1080_v19, 0.0  ;;  %v374_v28 = vsel %vm358_vm0, %v1084_v21, 0.0  ;;  %910 = vmatpush3.bf16.msra.mxu0 %v953_v11 }
  0x16   : > { %v377_v30 = vsel %vm358_vm0, %v1088_v27, 0.0  ;;  %v380_v31 = vsel %vm358_vm0, %v1092_v29, 0.0  ;;  %911 = vmatprep.subr.bf16.mxu0 %v954_v12 }
  0x17   : > { %363 = vadd.xlane.f32.xlu0 %v362_v18  ;;  %369 = vadd.xlane.f32.xlu1 %v368_v20 }
  0x19   : > { %912 = vmatpush3.bf16.msra.mxu0 %v954_v12 }
  0x1b   : > { %372 = vadd.xlane.f32.xlu0 %v371_v26  ;;  %375 = vadd.xlane.f32.xlu1 %v374_v28 }
  0x1f   : > { %378 = vadd.xlane.f32.xlu0 %v377_v30  ;;  %381 = vadd.xlane.f32.xlu1 %v380_v31 }
  0x9c   : > { %v361_v32 = vpop.xlane.xlu0 %360  ;;  %v367_v34 = vpop.xlane.xlu1 %366 }
  0x9d   : > { %v384_v33 = vmul.f32 0.03125, %v361_v32  ;;  %v386_v35 = vmul.f32 0.03125, %v367_v34 }
  0x9f   : > { %v1099_v36 = vsub.f32 %v1066_v3, %v384_v33  ;;  %v1102_v37 = vsub.f32 %v1068_v7, %v386_v35 }
  0xa0   : > { %v364_v38 = vpop.xlane.xlu0 %363  ;;  %v370_v40 = vpop.xlane.xlu1 %369 }
  0xa1   : > { %v385_v39 = vmul.f32 0.03125, %v364_v38  ;;  %v400_v41 = vmul.f32 %v1099_v36, %v1099_v36  ;;  %v387_v42 = vmul.f32 0.03125, %v370_v40  ;;  %v402_v43 = vmul.f32 %v1102_v37, %v1102_v37 }
  0xa3   : > { %v1109_v44 = vsub.f32 %v1070_v8, %v385_v39  ;;  %v408_v45 = vsel %vm358_vm0, %v400_v41, 0.0  ;;  %v1113_v46 = vsub.f32 %v1074_v13, %v387_v42  ;;  %v414_v50 = vsel %vm358_vm0, %v402_v43, 0.0 }
  0xa4   : > { %409 = vadd.xlane.f32.xlu0 %v408_v45  ;;  %v373_v47 = vpop.xlane.xlu0 %372  ;;  %v376_v49 = vpop.xlane.xlu1 %375 }
  0xa5   : > { %v388_v48 = vmul.f32 0.03125, %v373_v47  ;;  %v401_v51 = vmul.f32 %v1109_v44, %v1109_v44  ;;  %v389_v52 = vmul.f32 0.03125, %v376_v49  ;;  %v403_v53 = vmul.f32 %v1113_v46, %v1113_v46 }
  0xa7   : > { %v1121_v54 = vsub.f32 %v1080_v19, %v388_v48  ;;  %v411_v55 = vsel %vm358_vm0, %v401_v51, 0.0  ;;  %v1125_v56 = vsub.f32 %v1084_v21, %v389_v52  ;;  %v417_v60 = vsel %vm358_vm0, %v403_v53, 0.0  ;;  %v871_v48 = vld [vmem:[%s1225_s2] ss:$0 sm:$0xff] }
  0xa8   : > { %415 = vadd.xlane.f32.xlu0 %v414_v50  ;;  %412 = vadd.xlane.f32.xlu1 %v411_v55  ;;  %v379_v57 = vpop.xlane.xlu0 %378  ;;  %v382_v59 = vpop.xlane.xlu1 %381  ;;  %v872_v53 = vld [vmem:[%s1226_s3] ss:$0 sm:$0xff] }
  0xa9   : > { %v390_v58 = vmul.f32 0.03125, %v379_v57  ;;  %v404_v61 = vmul.f32 %v1121_v54, %v1121_v54  ;;  %v391_v62 = vmul.f32 0.03125, %v382_v59  ;;  %v405_v63 = vmul.f32 %v1125_v56, %v1125_v56 }
  0xab   : > { %v1133_v0 = vsub.f32 %v1088_v27, %v390_v58  ;;  %v420_v1 = vsel %vm358_vm0, %v404_v61, 0.0  ;;  %v1137_v2 = vsub.f32 %v1092_v29, %v391_v62  ;;  %v423_v4 = vsel %vm358_vm0, %v405_v63, 0.0 }
  0xac   : > { %418 = vadd.xlane.f32.xlu1 %v417_v60  ;;  %421 = vadd.xlane.f32.xlu0 %v420_v1 }
  0xad   : > { %v406_v5 = vmul.f32 %v1133_v0, %v1133_v0  ;;  %v407_v6 = vmul.f32 %v1137_v2, %v1137_v2 }
  0xaf   : > { %v426_v9 = vsel %vm358_vm0, %v406_v5, 0.0  ;;  %v429_v10 = vsel %vm358_vm0, %v407_v6, 0.0 }
  0xb0   : > { %424 = vadd.xlane.f32.xlu1 %v423_v4  ;;  %427 = vadd.xlane.f32.xlu0 %v426_v9 }
  0xb4   : > { %430 = vadd.xlane.f32.xlu1 %v429_v10 }
 0x12d   : > { %v410_v14 = vpop.xlane.xlu0 %409 }
 0x12e   : > { %v432_v15 = vmul.f32 0.03125, %v410_v14 }
 0x130   : > { %v440_v16 = vadd.f32 1e-05, %v432_v15 }
 0x131   : > { %v413_v17 = vpop.xlane.xlu1 %412  ;;  %v416_v18 = vpop.xlane.xlu0 %415 }
 0x132   : > { %963 = vrsqrt.f32 %v440_v16  ;;  %v433_v20 = vmul.f32 0.03125, %v413_v17  ;;  %v434_v22 = vmul.f32 0.03125, %v416_v18 }
 0x134   : > { %v441_v23 = vadd.f32 1e-05, %v433_v20  ;;  %v442_v24 = vadd.f32 1e-05, %v434_v22 }
 0x135   : > { %v419_v25 = vpop.xlane.xlu1 %418  ;;  %v422_v26 = vpop.xlane.xlu0 %421 }
 0x136   : > { %965 = vrsqrt.f32 %v441_v23  ;;  %v435_v28 = vmul.f32 0.03125, %v419_v25  ;;  %v436_v30 = vmul.f32 0.03125, %v422_v26  ;;  %v958_v25 = vld [vmem:[%s1229_s6 + $0x20] sm:$0xff]   ;;  %v959_v26 = vld [vmem:[%s1229_s6 + $0x18] sm:$0xff]  }
 0x137   : > { %967 = vrsqrt.f32 %v442_v24  ;;  %v957_v24 = vld [vmem:[%s1229_s6 + $0x28] sm:$0xff]  }
 0x138   : > { %v443_v31 = vadd.f32 1e-05, %v435_v28  ;;  %v444_v32 = vadd.f32 1e-05, %v436_v30  ;;  %v960_v28 = vld [vmem:[%s1229_s6 + $0x10] sm:$0xff]   ;;  %v961_v30 = vld [vmem:[%s1229_s6 + $0x8] sm:$0xff]  }
 0x139   : > { %v425_v33 = vpop.xlane.xlu1 %424  ;;  %v428_v34 = vpop.xlane.xlu0 %427 }
 0x13a   : > { %969 = vrsqrt.f32 %v443_v31  ;;  %v437_v35 = vmul.f32 0.03125, %v425_v33  ;;  %v438_v38 = vmul.f32 0.03125, %v428_v34  ;;  %v962_v31 = vld [vmem:[%s1229_s6] sm:$0xff]  }
 0x13b   : > { %971 = vrsqrt.f32 %v444_v32  ;;  %v873_v32 = vld [vmem:[%s1228_s5] ss:$0 sm:$0xff] }
 0x13c   : > { %v445_v39 = vadd.f32 1e-05, %v437_v35  ;;  %v446_v40 = vadd.f32 1e-05, %v438_v38 }
 0x13d   : > { %v431_v41 = vpop.xlane.xlu1 %430 }
 0x13e   : > { %973 = vrsqrt.f32 %v445_v39  ;;  %v439_v42 = vmul.f32 0.03125, %v431_v41 }
 0x13f   : > { %v964_v43 = vpop.eup %963  ;;  %975 = vrsqrt.f32 %v446_v40 }
 0x140   : > { %v447_v45 = vadd.f32 1e-05, %v439_v42  ;;  %v456_v47 = vmul.f32 %v964_v43, %v1099_v36 }
 0x142   : > { %977 = vrsqrt.f32 %v447_v45  ;;  %v470_v52 = vmul.f32 %v871_v48, %v456_v47 }
 0x143   : > { %v966_v49 = vpop.eup %965 }
 0x144   : > { %v968_v50 = vpop.eup %967  ;;  %v457_v51 = vmul.f32 %v966_v49, %v1109_v44  ;;  %v484_v36 = vadd.f32 %v872_v53, %v470_v52 }
 0x145   : > { %v458_v55 = vmul.f32 %v968_v50, %v1102_v37 }
 0x146   : > { %v471_v57 = vmul.f32 %v871_v48, %v457_v51 }
 0x147   : > { %v970_v58 = vpop.eup %969  ;;  %v472_v62 = vmul.f32 %v871_v48, %v458_v55 }
 0x148   : > { %v972_v59 = vpop.eup %971  ;;  %v485_v60 = vadd.f32 %v872_v53, %v471_v57  ;;  %v459_v61 = vmul.f32 %v970_v58, %v1113_v46 }
 0x149   : > { %v460_v63 = vmul.f32 %v972_v59, %v1121_v54  ;;  %v486_v6 = vadd.f32 %v872_v53, %v472_v62 }
 0x14a   : > { %v492_v1 = vpack.c.bf16 %v485_v60, %v484_v36  ;;  %v473_v4 = vmul.f32 %v871_v48, %v459_v61 }
 0x14b   : > { %v974_v44 = vpop.eup %973  ;;  %v474_v10 = vmul.f32 %v871_v48, %v460_v63 }
 0x14c   : > { %v976_v5 = vpop.eup %975  ;;  %913 = vmatprep.mubr.msk.bf16.mxu0 %vm358_vm0, %v492_v1  ;;  %v487_v9 = vadd.f32 %v872_v53, %v473_v4  ;;  %v461_v37 = vmul.f32 %v974_v44, %v1125_v56 }
 0x14d   : > { %v462_v11 = vmul.f32 %v976_v5, %v1133_v0  ;;  %v488_v46 = vadd.f32 %v872_v53, %v474_v10  ;;  %v955_v0 = vld [vmem:[%s1229_s6 + $0x38] sm:$0xff]  }
 0x14e   : > { %v493_v12 = vpack.c.bf16 %v487_v9, %v486_v6  ;;  %v475_v14 = vmul.f32 %v871_v48, %v461_v37  ;;  %921 = vmatprep.subr.bf16.mxu1 %v955_v0 }
 0x14f   : > { %v978_v15 = vpop.eup %977  ;;  %v476_v17 = vmul.f32 %v871_v48, %v462_v11  ;;  %922 = vmatpush3.bf16.msra.mxu1 %v955_v0 }
 0x150   : > { %914 = vmatmul.mubr.msk.bf16.vlgmr.msra.gmra.mxu0 %vm358_vm0, %v493_v12  ;;  %v489_v54 = vadd.f32 %v872_v53, %v475_v14  ;;  %v463_v16 = vmul.f32 %v978_v15, %v1137_v2  ;;  %v956_v2 = vld [vmem:[%s1229_s6 + $0x30] sm:$0xff]  }
 0x151   : > { %v490_v22 = vadd.f32 %v872_v53, %v476_v17  ;;  %923 = vmatprep.subr.bf16.mxu1 %v956_v2 }
 0x152   : > { %v494_v18 = vpack.c.bf16 %v489_v54, %v488_v46  ;;  %v477_v20 = vmul.f32 %v871_v48, %v463_v16 }
 0x153   : > { %924 = vmatpush3.bf16.msra.mxu1 %v956_v2 }
 0x154   : > { %917 = vmatprep.mubr.msk.bf16.mxu0 %vm358_vm0, %v494_v18  ;;  %v491_v23 = vadd.f32 %v872_v53, %v477_v20  ;;  %925 = vmatprep.subr.bf16.mxu1 %v957_v24 }
 0x156   : > { %v495_v56 = vpack.c.bf16 %v491_v23, %v490_v22 }
 0x157   : > { %926 = vmatpush3.bf16.msra.mxu1 %v957_v24 }
 0x158   : > { %918 = vmatmul.mubr.msk.bf16.gmra.mxu0 %vm358_vm0, %v495_v56  ;;  %927 = vmatprep.subr.bf16.mxu1 %v958_v25 }
 0x15b   : > { %928 = vmatpush3.bf16.msra.mxu1 %v958_v25 }
 0x15c   : > { %929 = vmatprep.subr.bf16.mxu1 %v959_v26 }
 0x15f   : > { %930 = vmatpush3.bf16.msra.mxu1 %v959_v26 }
 0x160   : > { %931 = vmatprep.subr.bf16.mxu1 %v960_v28 }
 0x163   : > { %932 = vmatpush3.bf16.msra.mxu1 %v960_v28 }
 0x164   : > { %933 = vmatprep.subr.bf16.mxu1 %v961_v30 }
 0x167   : > { %934 = vmatpush3.bf16.msra.mxu1 %v961_v30 }
 0x168   : > { %935 = vmatprep.subr.bf16.mxu1 %v962_v31 }
 0x16b   : > { %936 = vmatpush3.bf16.msra.mxu1 %v962_v31 }
 0x210   : > { %v915_v33 = vpop.f32.mrf.mxu0 }
 0x211   : > { %v574_v34 = vadd.f32 %v915_v33, %v873_v32 }
 0x212   : > { %v565_v35 = vpop.f32.mrf.mxu0 }
 0x213   : > { %v566_v38 = vadd.f32 %v873_v32, %v565_v35  ;;  %v606_v39 = vmul.f32 0.70710677, %v574_v34  ;;  %v598_v12 = vmul.f32 0.5, %v574_v34 }
 0x214   : > { %v916_v40 = vpop.f32.mrf.mxu0 }
 0x215   : > { %v604_v41 = vmul.f32 0.70710677, %v566_v38  ;;  %v577_v42 = vadd.f32 %v916_v40, %v873_v32  ;;  %v596_v37 = vmul.f32 0.5, %v566_v38 }
 0x216   : > { %v568_v43 = vpop.f32.mrf.mxu0 }
 0x217   : > { %979 = verf.f32 %v604_v41  ;;  %v607_v45 = vmul.f32 0.70710677, %v577_v42  ;;  %v569_v47 = vadd.f32 %v873_v32, %v568_v43  ;;  %v599_v9 = vmul.f32 0.5, %v577_v42 }
 0x218   : > { %981 = verf.f32 %v606_v39  ;;  %v919_v48 = vpop.f32.mrf.mxu0  ;;  %v880_v39 = vld [vmem:[%s1230_s7] ss:$0 sm:$0xff] }
 0x219   : > { %983 = verf.f32 %v607_v45  ;;  %v605_v49 = vmul.f32 0.70710677, %v569_v47  ;;  %v590_v50 = vadd.f32 %v919_v48, %v873_v32  ;;  %v597_v10 = vmul.f32 0.5, %v569_v47 }
 0x21a   : > { %v581_v51 = vpop.f32.mrf.mxu0 }
 0x21b   : > { %985 = verf.f32 %v605_v49  ;;  %v582_v52 = vadd.f32 %v873_v32, %v581_v51  ;;  %v610_v53 = vmul.f32 0.70710677, %v590_v50  ;;  %v602_v30 = vmul.f32 0.5, %v590_v50 }
 0x21c   : > { %v920_v55 = vpop.f32.mrf.mxu0 }
 0x21d   : > { %v608_v57 = vmul.f32 0.70710677, %v582_v52  ;;  %v593_v58 = vadd.f32 %v920_v55, %v873_v32  ;;  %v600_v25 = vmul.f32 0.5, %v582_v52 }
 0x21e   : > { %v584_v59 = vpop.f32.mrf.mxu0 }
 0x21f   : > { %987 = verf.f32 %v608_v57  ;;  %v611_v36 = vmul.f32 0.70710677, %v593_v58  ;;  %v585_v60 = vadd.f32 %v873_v32, %v584_v59  ;;  %v603_v24 = vmul.f32 0.5, %v593_v58 }
 0x220   : > { %989 = verf.f32 %v610_v53 }
 0x221   : > { %991 = verf.f32 %v611_v36  ;;  %v609_v61 = vmul.f32 0.70710677, %v585_v60  ;;  %v601_v26 = vmul.f32 0.5, %v585_v60 }
 0x223   : > { %993 = verf.f32 %v609_v61 }
 0x224   : > { %v980_v62 = vpop.eup %979 }
 0x225   : > { %v982_v63 = vpop.eup %981  ;;  %v620_v44 = vadd.f32 1.0, %v980_v62 }
 0x226   : > { %v984_v1 = vpop.eup %983  ;;  %v622_v6 = vadd.f32 1.0, %v982_v63 }
 0x227   : > { %v623_v4 = vadd.f32 1.0, %v984_v1  ;;  %v628_v15 = vmul.f32 %v620_v44, %v596_v37 }
 0x228   : > { %v986_v5 = vpop.eup %985  ;;  %v630_v16 = vmul.f32 %v622_v6, %v598_v12 }
 0x229   : > { %v621_v11 = vadd.f32 1.0, %v986_v5  ;;  %v631_v14 = vmul.f32 %v623_v4, %v599_v9 }
 0x22b   : > { %v629_v46 = vmul.f32 %v621_v11, %v597_v10  ;;  %v637_v22 = vpack.c.bf16 %v631_v14, %v630_v16 }
 0x22c   : > { %v988_v54 = vpop.eup %987 }
 0x22d   : > { %v990_v17 = vpop.eup %989  ;;  %v636_v18 = vpack.c.bf16 %v629_v46, %v628_v15  ;;  %v624_v23 = vadd.f32 1.0, %v988_v54 }
 0x22e   : > { %v992_v20 = vpop.eup %991  ;;  %v626_v2 = vadd.f32 1.0, %v990_v17 }
 0x22f   : > { %v627_v56 = vadd.f32 1.0, %v992_v20  ;;  %937 = vmatprep.mubr.bf16.mxu1 %v636_v18  ;;  %v632_v32 = vmul.f32 %v624_v23, %v600_v25 }
 0x230   : > { %v994_v0 = vpop.eup %993  ;;  %938 = vmatmul.mubr.bf16.vlgmr.msra.gmra.mxu1 %v637_v22  ;;  %v634_v34 = vmul.f32 %v626_v2, %v602_v30 }
 0x231   : > { %v625_v28 = vadd.f32 1.0, %v994_v0  ;;  %v635_v31 = vmul.f32 %v627_v56, %v603_v24 }
 0x233   : > { %v633_v33 = vmul.f32 %v625_v28, %v601_v26  ;;  %v639_v38 = vpack.c.bf16 %v635_v31, %v634_v34 }
 0x235   : > { %v638_v35 = vpack.c.bf16 %v633_v33, %v632_v32 }
 0x237   : > { %941 = vmatprep.mubr.bf16.mxu1 %v638_v35 }
 0x238   : > { %942 = vmatmul.mubr.bf16.gmra.mxu1 %v639_v38 }
 0x2f0   : > { %v939_v40 = vpop.f32.mrf.mxu1 }
 0x2f1   : > { %v754_v41 = vadd.f32 %v939_v40, %v880_v39 }
 0x2f2   : > { %v745_v42 = vpop.f32.mrf.mxu1 }
 0x2f3   : > { %v778_v43 = vadd.f32 %v754_v41, %v1068_v7  ;;  %v746_v45 = vadd.f32 %v880_v39, %v745_v42 }
 0x2f4   : > { %v940_v47 = vpop.f32.mrf.mxu1 }
 0x2f5   : > { %786 = vst.msk [vmem:[%s329_s25 + $0x10] sm:$0xff] %vm358_vm0, %v778_v43  ;;  %v776_v48 = vadd.f32 %v746_v45, %v1066_v3  ;;  %v757_v49 = vadd.f32 %v940_v47, %v880_v39 }
 0x2f6   : > { %v748_v50 = vpop.f32.mrf.mxu1 }
 0x2f7   : > { %784 = vst.msk [vmem:[%s329_s25] sm:$0xff] %vm358_vm0, %v776_v48  ;;  %v779_v51 = vadd.f32 %v757_v49, %v1074_v13  ;;  %v749_v52 = vadd.f32 %v880_v39, %v748_v50 }
 0x2f8   : > { %v943_v53 = vpop.f32.mrf.mxu1 }
 0x2f9   : > { %787 = vst.msk [vmem:[%s329_s25 + $0x18] sm:$0xff] %vm358_vm0, %v779_v51  ;;  %v777_v55 = vadd.f32 %v749_v52, %v1070_v8  ;;  %v770_v57 = vadd.f32 %v943_v53, %v880_v39 }
 0x2fa   : > { %v761_v7 = vpop.f32.mrf.mxu1 }
 0x2fb   : > { %785 = vst.msk [vmem:[%s329_s25 + $0x8] sm:$0xff] %vm358_vm0, %v777_v55  ;;  %v782_v58 = vadd.f32 %v770_v57, %v1088_v27  ;;  %v762_v59 = vadd.f32 %v880_v39, %v761_v7 }
 0x2fc   : > { %v944_v3 = vpop.f32.mrf.mxu1 }
 0x2fd   : > { %790 = vst.msk [vmem:[%s329_s25 + $0x30] sm:$0xff] %vm358_vm0, %v782_v58  ;;  %v780_v36 = vadd.f32 %v762_v59, %v1080_v19  ;;  %v773_v60 = vadd.f32 %v944_v3, %v880_v39 }
 0x2fe   : > { %v764_v13 = vpop.f32.mrf.mxu1 }
 0x2ff   : > { %788 = vst.msk [vmem:[%s329_s25 + $0x20] sm:$0xff] %vm358_vm0, %v780_v36  ;;  %v783_v61 = vadd.f32 %v773_v60, %v1092_v29  ;;  %v765_v62 = vadd.f32 %v880_v39, %v764_v13 }
 0x301   : > { %791 = vst.msk [vmem:[%s329_s25 + $0x38] sm:$0xff] %vm358_vm0, %v783_v61  ;;  %v781_v8 = vadd.f32 %v765_v62, %v1084_v21 }
 0x303   : > { %789 = vst.msk [vmem:[%s329_s25 + $0x28] sm:$0xff] %vm358_vm0, %v781_v8 }
 0x304 PF: > { %s18_s27 = sadd.s32 1, %s1001_s27  }
 0x305   : > { %p15_p4 = scmp.ge.s32.totalorder %s18_s27, 4  }
 0x307   :  { %17 = sbr.rel (!%p15_p4) target bundleno = 1 (0x1), region = 85 }

// kernel: rstb_forward.5
= control target key start
LH: loop header
LB: loop body
LE: loop exit
PB: predicated region body
PF: predicated region fallthrough
CT: control target
= control target key end

     0   :  { %s2231_s29 = smov 0   ;;  %s2703_s0 = inlined_call_operand.vmem [shape: f32[8,16,32], index: 0, kind: input, shape index: {}]   ;;  %s2704_s1 = inlined_call_operand.vmem [shape: f32[1,32], index: 1, kind: input, shape index: {}]   ;;  %s2705_s2 = inlined_call_operand.vmem [shape: f32[1,32], index: 2, kind: input, shape index: {}]   ;;  %s2706_s3 = inlined_call_operand.vmem [shape: bf16[32,32], index: 3, kind: input, shape index: {}]   ;;  %s2707_s4 = inlined_call_operand.vmem [shape: f32[1,32], index: 4, kind: input, shape index: {}]   ;;  %s2708_s5 = inlined_call_operand.vmem [shape: bf16[32,32], index: 5, kind: input, shape index: {}]   ;;  %s2709_s6 = inlined_call_operand.vmem [shape: f32[1,32], index: 6, kind: input, shape index: {}]   ;;  %s2710_s7 = inlined_call_operand.vmem [shape: bf16[32,32], index: 7, kind: input, shape index: {}]   ;;  %s2711_s8 = inlined_call_operand.vmem [shape: f32[1,32], index: 8, kind: input, shape index: {}]   ;;  %s2712_s9 = inlined_call_operand.vmem [shape: bf16[32,32], index: 9, kind: input, shape index: {}]   ;;  %s2713_s10 = inlined_call_operand.vmem [shape: f32[1,32], index: 10, kind: input, shape index: {}]   ;;  %s2714_s11 = inlined_call_operand.vmem [shape: f32[1,16,64], index: 11, kind: input, shape index: {}]   ;;  %s2715_s12 = inlined_call_operand.vmem [shape: bf16[64,32], index: 12, kind: input, shape index: {}]   ;;  %s2716_s13 = inlined_call_operand.vmem [shape: f32[64,64], index: 13, kind: input, shape index: {}]   ;;  %s2717_s14 = inlined_call_operand.vmem [shape: f32[8,16,32], index: 14, kind: output, shape index: {}]  }
   0x1 LB: > { %s1755_s30 = sadd.s32 4294967295, %s2152_s29   ;;  %p1759_p0 = scmp.ge.s32.totalorder %s2152_s29, 1  ;;  %s2152_s29 = sphi %s2231_s29, %s24_s29  }
   0x2   : > { %p414_p1 = scmp.lt.s32.totalorder %s2152_s29, 3 }
   0x4   : > { %p415_p2 = pnand %p1759_p0, %p414_p1 }
   0x5   : > { %s1760_s15 = sshll.u32 (!%p415_p2), %s1755_s30, 2 }
   0x6   : > { %418 = sbr.rel (%p415_p2) target bundleno = 1585 (0x631), region = 76  ;;  %p463_p3 = scmp.lt.s32.totalorder (!%p415_p2), %s1760_s15, 7 }
   0xb   : > { %s2719_s15 = smov (!%p463_p3, %s1760_s15), 7  ;;  %vm487_vm0 = vcmask 261120   ;;  %v2086_v56 = vld [vmem:[%s2706_s3 + $0x8] sm:$0xff]   ;;  %v2087_v57 = vld [vmem:[%s2706_s3] sm:$0xff]   ;;  %vm2155_vm1 = vmmov 0   ;;  %vm1203_vm2 = vcmask 523264  }
   0xc   : > { %s1818_s16 = sshll.u32 %s2719_s15, 4  ;;  %2072 = vmatprep.subr.bf16.mxu1 %v2086_v56  ;;  %1900 = vmatprep.subr.bf16.mxu0 %v2086_v56  ;;  %v2304_v58 = vld [vmem:[%s2708_s5 + $0x8] sm:$0xff]  }
   0xd   : > { %s467_s19 = scalar_lea.vmem %s2703_s0, %s1818_s16  ;;  %2074 = vmatpush3.bf16.msra.mxu1 %v2086_v56  ;;  %1901 = vmatpush3.bf16.msra.mxu0 %v2086_v56  ;;  %v2310_v59 = vld [vmem:[%s2710_s7 + $0x8] sm:$0xff]   ;;  %s474_s26 = scalar_lea.vmem %s2717_s14, %s1818_s16 }
   0xe   : > { %v481_v0 = vld [vmem:[%s467_s19 + $0x20] sm:$0xff]  ;;  %v483_v1 = vld [vmem:[%s467_s19 + $0x30] sm:$0xff]  ;;  %v482_v2 = vld [vmem:[%s467_s19 + $0x28] sm:$0xff]  ;;  %2073 = vmatprep.subr.bf16.mxu1 %v2087_v57  ;;  %1902 = vmatprep.subr.bf16.mxu0 %v2087_v57 }
   0xf   : > { %v500_v3 = vsel %vm487_vm0, %v481_v0, 0.0  ;;  %v506_v4 = vsel %vm487_vm0, %v483_v1, 0.0  ;;  %v484_v5 = vld [vmem:[%s467_s19 + $0x38] sm:$0xff]  ;;  %v503_v6 = vsel %vm487_vm0, %v482_v2, 0.0  ;;  %v477_v7 = vld [vmem:[%s467_s19] sm:$0xff]  ;;  %v478_v9 = vld [vmem:[%s467_s19 + $0x8] sm:$0xff] }
  0x10   : > { %501 = vadd.xlane.f32.xlu0 %v500_v3  ;;  %507 = vadd.xlane.f32.xlu1 %v506_v4  ;;  %v509_v8 = vsel %vm487_vm0, %v484_v5, 0.0  ;;  %v488_v10 = vsel %vm487_vm0, %v477_v7, 0.0  ;;  %v491_v11 = vsel %vm487_vm0, %v478_v9, 0.0  ;;  %v479_v12 = vld [vmem:[%s467_s19 + $0x10] sm:$0xff]  ;;  %v480_v13 = vld [vmem:[%s467_s19 + $0x18] sm:$0xff] }
  0x11   : > { %v494_v14 = vsel %vm487_vm0, %v479_v12, 0.0  ;;  %v497_v15 = vsel %vm487_vm0, %v480_v13, 0.0  ;;  %2075 = vmatpush3.bf16.msra.mxu1 %v2087_v57  ;;  %1903 = vmatpush3.bf16.msra.mxu0 %v2087_v57 }
  0x12   : > { %1912 = vmatprep.subr.bf16.mxu1 %v2304_v58  ;;  %1924 = vmatprep.subr.bf16.mxu0 %v2310_v59 }
  0x14   : > { %504 = vadd.xlane.f32.xlu0 %v503_v6  ;;  %510 = vadd.xlane.f32.xlu1 %v509_v8 }
  0x18   : > { %489 = vadd.xlane.f32.xlu0 %v488_v10  ;;  %492 = vadd.xlane.f32.xlu1 %v491_v11 }
  0x1c   : > { %495 = vadd.xlane.f32.xlu0 %v494_v14  ;;  %498 = vadd.xlane.f32.xlu1 %v497_v15 }
  0x99   : > { %v502_v16 = vpop.xlane.xlu0 %501  ;;  %v508_v17 = vpop.xlane.xlu1 %507 }
  0x9a   : > { %v517_v18 = vmul.f32 0.03125, %v502_v16  ;;  %v519_v19 = vmul.f32 0.03125, %v508_v17 }
  0x9c   : > { %v2255_v20 = vsub.f32 %v481_v0, %v517_v18  ;;  %v2257_v21 = vsub.f32 %v483_v1, %v519_v19 }
  0x9d   : > { %v505_v22 = vpop.xlane.xlu0 %504  ;;  %v511_v23 = vpop.xlane.xlu1 %510 }
  0x9e   : > { %v518_v24 = vmul.f32 0.03125, %v505_v22  ;;  %v520_v25 = vmul.f32 0.03125, %v511_v23  ;;  %v533_v26 = vmul.f32 %v2255_v20, %v2255_v20  ;;  %v535_v27 = vmul.f32 %v2257_v21, %v2257_v21 }
  0xa0   : > { %v2263_v28 = vsub.f32 %v482_v2, %v518_v24  ;;  %v2265_v29 = vsub.f32 %v484_v5, %v520_v25  ;;  %v549_v30 = vsel %vm487_vm0, %v533_v26, 0.0  ;;  %v555_v33 = vsel %vm487_vm0, %v535_v27, 0.0  ;;  %v1766_v24 = vld [vmem:[%s2704_s1] ss:$0 sm:$0xff] }
  0xa1   : > { %550 = vadd.xlane.f32.xlu0 %v549_v30  ;;  %v490_v31 = vpop.xlane.xlu0 %489  ;;  %v493_v32 = vpop.xlane.xlu1 %492 }
  0xa2   : > { %v513_v34 = vmul.f32 0.03125, %v490_v31  ;;  %v534_v35 = vmul.f32 %v2263_v28, %v2263_v28  ;;  %v514_v36 = vmul.f32 0.03125, %v493_v32  ;;  %v536_v37 = vmul.f32 %v2265_v29, %v2265_v29  ;;  %v1767_v31 = vld [vmem:[%s2705_s2] ss:$0 sm:$0xff] }
  0xa4   : > { %v2273_v38 = vsub.f32 %v477_v7, %v513_v34  ;;  %v552_v39 = vsel %vm487_vm0, %v534_v35, 0.0  ;;  %v2276_v40 = vsub.f32 %v478_v9, %v514_v36  ;;  %v558_v42 = vsel %vm487_vm0, %v536_v37, 0.0 }
  0xa5   : > { %553 = vadd.xlane.f32.xlu1 %v552_v39  ;;  %556 = vadd.xlane.f32.xlu0 %v555_v33  ;;  %v496_v41 = vpop.xlane.xlu0 %495  ;;  %v499_v43 = vpop.xlane.xlu1 %498 }
  0xa6   : > { %v515_v44 = vmul.f32 0.03125, %v496_v41  ;;  %v516_v45 = vmul.f32 0.03125, %v499_v43  ;;  %v529_v46 = vmul.f32 %v2273_v38, %v2273_v38  ;;  %v530_v47 = vmul.f32 %v2276_v40, %v2276_v40 }
  0xa8   : > { %v2283_v48 = vsub.f32 %v479_v12, %v515_v44  ;;  %v2285_v49 = vsub.f32 %v480_v13, %v516_v45  ;;  %v537_v50 = vsel %vm487_vm0, %v529_v46, 0.0  ;;  %v540_v51 = vsel %vm487_vm0, %v530_v47, 0.0 }
  0xa9   : > { %559 = vadd.xlane.f32.xlu1 %v558_v42  ;;  %538 = vadd.xlane.f32.xlu0 %v537_v50 }
  0xaa   : > { %v531_v52 = vmul.f32 %v2283_v48, %v2283_v48  ;;  %v532_v53 = vmul.f32 %v2285_v49, %v2285_v49 }
  0xac   : > { %v543_v54 = vsel %vm487_vm0, %v531_v52, 0.0  ;;  %v546_v55 = vsel %vm487_vm0, %v532_v53, 0.0 }
  0xad   : > { %541 = vadd.xlane.f32.xlu1 %v540_v51  ;;  %544 = vadd.xlane.f32.xlu0 %v543_v54 }
  0xb1   : > { %547 = vadd.xlane.f32.xlu1 %v546_v55 }
 0x12a   : > { %v551_v60 = vpop.xlane.xlu0 %550 }
 0x12b   : > { %v565_v61 = vmul.f32 0.03125, %v551_v60 }
 0x12d   : > { %v573_v62 = vadd.f32 1e-05, %v565_v61 }
 0x12e   : > { %v554_v63 = vpop.xlane.xlu1 %553  ;;  %v557_v0 = vpop.xlane.xlu0 %556 }
 0x12f   : > { %2098 = vrsqrt.f32 %v573_v62  ;;  %v566_v1 = vmul.f32 0.03125, %v554_v63  ;;  %v567_v2 = vmul.f32 0.03125, %v557_v0  ;;  %v2091_v62 = vld [vmem:[%s2710_s7] sm:$0xff]  }
 0x131   : > { %v574_v3 = vadd.f32 1e-05, %v566_v1  ;;  %v575_v4 = vadd.f32 1e-05, %v567_v2 }
 0x132   : > { %v560_v5 = vpop.xlane.xlu1 %559  ;;  %v539_v6 = vpop.xlane.xlu0 %538 }
 0x133   : > { %2100 = vrsqrt.f32 %v574_v3  ;;  %v568_v7 = vmul.f32 0.03125, %v560_v5  ;;  %v561_v8 = vmul.f32 0.03125, %v539_v6 }
 0x134   : > { %2102 = vrsqrt.f32 %v575_v4 }
 0x135   : > { %v576_v9 = vadd.f32 1e-05, %v568_v7  ;;  %v569_v10 = vadd.f32 1e-05, %v561_v8 }
 0x136   : > { %v542_v11 = vpop.xlane.xlu1 %541  ;;  %v545_v12 = vpop.xlane.xlu0 %544 }
 0x137   : > { %2104 = vrsqrt.f32 %v576_v9  ;;  %v562_v13 = vmul.f32 0.03125, %v542_v11  ;;  %v563_v14 = vmul.f32 0.03125, %v545_v12 }
 0x138   : > { %2106 = vrsqrt.f32 %v569_v10  ;;  %v2379_v10 = vld [vmem:[%s2709_s6] ss:$0 sm:$0xff] }
 0x139   : > { %v570_v15 = vadd.f32 1e-05, %v562_v13  ;;  %v571_v16 = vadd.f32 1e-05, %v563_v14 }
 0x13a   : > { %v548_v17 = vpop.xlane.xlu1 %547 }
 0x13b   : > { %2108 = vrsqrt.f32 %v570_v15  ;;  %v564_v18 = vmul.f32 0.03125, %v548_v17 }
 0x13c   : > { %v2099_v19 = vpop.eup %2098  ;;  %2110 = vrsqrt.f32 %v571_v16 }
 0x13d   : > { %v572_v22 = vadd.f32 1e-05, %v564_v18  ;;  %v589_v23 = vmul.f32 %v2099_v19, %v2255_v20  ;;  %v2392_v19 = vld [vmem:[%s2711_s8] ss:$0 sm:$0xff] }
 0x13f   : > { %2112 = vrsqrt.f32 %v572_v22  ;;  %v603_v30 = vmul.f32 %v1766_v24, %v589_v23  ;;  %v2397_v22 = vld [vmem:[%s2715_s12 + $0x18] sm:$0xff]  }
 0x140   : > { %v2101_v25 = vpop.eup %2100 }
 0x141   : > { %v2103_v26 = vpop.eup %2102  ;;  %v590_v27 = vmul.f32 %v2101_v25, %v2263_v28  ;;  %v617_v20 = vadd.f32 %v1767_v31, %v603_v30 }
 0x142   : > { %v591_v32 = vmul.f32 %v2103_v26, %v2257_v21 }
 0x143   : > { %v604_v33 = vmul.f32 %v1766_v24, %v590_v27 }
 0x144   : > { %v2105_v34 = vpop.eup %2104  ;;  %v605_v39 = vmul.f32 %v1766_v24, %v591_v32 }
 0x145   : > { %v2107_v35 = vpop.eup %2106  ;;  %v618_v36 = vadd.f32 %v1767_v31, %v604_v33  ;;  %v592_v37 = vmul.f32 %v2105_v34, %v2265_v29  ;;  %v2089_v29 = vld [vmem:[%s2708_s5] sm:$0xff]  }
 0x146   : > { %v585_v41 = vmul.f32 %v2107_v35, %v2273_v38  ;;  %v619_v45 = vadd.f32 %v1767_v31, %v605_v39 }
 0x147   : > { %v623_v42 = vpack.c.bf16 %v618_v36, %v617_v20  ;;  %v606_v43 = vmul.f32 %v1766_v24, %v592_v37  ;;  %v2416_v20 = vld [vmem:[%s2715_s12 + $0x10] sm:$0xff]  }
 0x148   : > { %v2109_v28 = vpop.eup %2108  ;;  %v599_v47 = vmul.f32 %v1766_v24, %v585_v41 }
 0x149   : > { %v2111_v44 = vpop.eup %2110  ;;  %1908 = vmatprep.mubr.msk.bf16.mxu1 %vm487_vm0, %v623_v42  ;;  %v620_v46 = vadd.f32 %v1767_v31, %v606_v43  ;;  %v586_v21 = vmul.f32 %v2109_v28, %v2276_v40 }
 0x14a   : > { %v587_v50 = vmul.f32 %v2111_v44, %v2283_v48  ;;  %v613_v53 = vadd.f32 %v1767_v31, %v599_v47 }
 0x14b   : > { %v624_v51 = vpack.c.bf16 %v620_v46, %v619_v45  ;;  %v600_v52 = vmul.f32 %v1766_v24, %v586_v21 }
 0x14c   : > { %v2113_v38 = vpop.eup %2112  ;;  %v601_v56 = vmul.f32 %v1766_v24, %v587_v50  ;;  %v2437_v50 = vld [vmem:[%s2715_s12 + $0x8] sm:$0xff]  }
 0x14d   : > { %1909 = vmatmul.mubr.msk.bf16.vlgmr.msra.gmra.mxu1 %vm487_vm0, %v624_v51  ;;  %v614_v54 = vadd.f32 %v1767_v31, %v600_v52  ;;  %v588_v55 = vmul.f32 %v2113_v38, %v2285_v49  ;;  %v2154_v49 = vmov 0.0  }
 0x14e   : > { %1913 = vmatpush3.bf16.msra.mxu1 %v2304_v58  ;;  %v615_v48 = vadd.f32 %v1767_v31, %v601_v56 }
 0x14f   : > { %1914 = vmatprep.subr.bf16.mxu1 %v2089_v29  ;;  %v621_v40 = vpack.c.bf16 %v614_v54, %v613_v53  ;;  %v602_v57 = vmul.f32 %v1766_v24, %v588_v55  ;;  %v2446_v55 = vld [vmem:[%s2715_s12] sm:$0xff]  }
 0x151   : > { %1904 = vmatprep.mubr.msk.bf16.mxu0 %vm487_vm0, %v621_v40  ;;  %1916 = vmatprep.mubr.msk.bf16.mxu1 %vm487_vm0, %v621_v40  ;;  %v616_v60 = vadd.f32 %v1767_v31, %v602_v57 }
 0x152   : > { %1915 = vmatpush3.bf16.msra.mxu1 %v2089_v29 }
 0x153   : > { %v622_v61 = vpack.c.bf16 %v616_v60, %v615_v48  ;;  %1936 = vmatprep.subr.bf16.mxu1 %v2154_v49 }
 0x155   : > { %1905 = vmatmul.mubr.msk.bf16.vlgmr.msra.gmra.mxu0 %vm487_vm0, %v622_v61  ;;  %1917 = vmatmul.mubr.msk.bf16.vlgmr.msra.gmra.mxu1 %vm487_vm0, %v622_v61 }
 0x156   : > { %1920 = vmatprep.mubr.msk.bf16.mxu1 %vm487_vm0, %v623_v42  ;;  %1925 = vmatpush3.bf16.msra.mxu0 %v2310_v59  ;;  %v2356_v59 = vld [vmem:[%s2707_s4] ss:$0 sm:$0xff] }
 0x157   : > { %1928 = vmatprep.mubr.msk.bf16.mxu0 %vm487_vm0, %v621_v40  ;;  %1926 = vmatprep.subr.bf16.mxu0 %v2091_v62 }
 0x15a   : > { %1927 = vmatpush3.bf16.msra.mxu0 %v2091_v62 }
 0x15b   : > { %1948 = vmatprep.subr.bf16.mxu0 %v2154_v49 }
 0x15d   : > { %1921 = vmatmul.mubr.msk.bf16.gmra.mxu1 %vm487_vm0, %v624_v51  ;;  %1929 = vmatmul.mubr.msk.bf16.vlgmr.msra.gmra.mxu0 %vm487_vm0, %v622_v61 }
 0x15e   : > { %1932 = vmatprep.mubr.msk.bf16.mxu0 %vm487_vm0, %v623_v42  ;;  %1944 = vmatprep.mubr.msk.bf16.mxu1 %vm2155_vm1, %v2154_v49 }
 0x165   : > { %1933 = vmatmul.mubr.msk.bf16.gmra.mxu0 %vm487_vm0, %v624_v51 }
 0x166   : > { %1956 = vmatprep.mubr.msk.bf16.mxu0 %vm2155_vm1, %v2154_v49 }
 0x20d   : > { %v1910_v58 = vpop.f32.mrf.mxu1 }
 0x20e   : > { %v2359_v1 = vadd.f32 %v1910_v58, %v2356_v59 }
 0x20f   : > { %v710_v63 = vpop.f32.mrf.mxu1 }
 0x210   : > { %v2365_v4 = vadd.f32 %v2356_v59, %v710_v63 }
 0x211   : > { %v1911_v0 = vpop.f32.mrf.mxu1 }
 0x212   : > { %v2362_v2 = vadd.f32 %v1911_v0, %v2356_v59 }
 0x213   : > { %v713_v3 = vpop.f32.mrf.mxu1 }
 0x214   : > { %v728_v5 = vpack.c.bf16 %v2362_v2, %v2359_v1  ;;  %v2370_v6 = vadd.f32 %v2356_v59, %v713_v3 }
 0x215   : > { %v2372_v7 = vpop.f32.mrf.mxu0  ;;  %v1918_v8 = vpop.f32.mrf.mxu1 }
 0x216   : > { %v727_v9 = vpack.c.bf16 %v2370_v6, %v2365_v4  ;;  %v795_v15 = vadd.f32 %v1918_v8, %v2379_v10 }
 0x217   : > { %v2381_v11 = vpop.f32.mrf.mxu0  ;;  %v786_v12 = vpop.f32.mrf.mxu1 }
 0x218   : > { %v787_v23 = vadd.f32 %v2379_v10, %v786_v12 }
 0x219   : > { %v2383_v13 = vpop.f32.mrf.mxu0  ;;  %v1919_v14 = vpop.f32.mrf.mxu1 }
 0x21a   : > { %v798_v16 = vadd.f32 %v1919_v14, %v2379_v10 }
 0x21b   : > { %v2387_v17 = vpop.f32.mrf.mxu0  ;;  %v789_v18 = vpop.f32.mrf.mxu1 }
 0x21c   : > { %v2400_v24 = vpack.c.bf16 %v798_v16, %v795_v15  ;;  %v790_v25 = vadd.f32 %v2379_v10, %v789_v18 }
 0x21d   : > { %v1930_v26 = vpop.f32.mrf.mxu0  ;;  %v1922_v45 = vpop.f32.mrf.mxu1 }
 0x21e   : > { %v2403_v27 = vpack.c.bf16 %v790_v25, %v787_v23  ;;  %v887_v30 = vadd.f32 %v1930_v26, %v2392_v19  ;;  %v952_v32 = vmul.bf16 %v2397_v22, %v2400_v24  ;;  %v951_v43 = vmul.bf16 %v2416_v20, %v2400_v24 }
 0x21f   : > { %v2406_v31 = vpop.f32.mrf.mxu0  ;;  %v802_v53 = vpop.f32.mrf.mxu1  ;;  %v950_v57 = vmul.bf16 %v2437_v50, %v2400_v24 }
 0x220   : > { %v948_v33 = vmul.bf16 %v2397_v22, %v2403_v27  ;;  %v1048_v35 = vsel %vm487_vm0, %v952_v32, 0  ;;  %v947_v44 = vmul.bf16 %v2416_v20, %v2403_v27  ;;  %v1045_v29 = vsel %vm487_vm0, %v951_v43, 0 }
 0x221   : > { %v1931_v34 = vpop.f32.mrf.mxu0  ;;  %1949 = vmatpush3.bf16.xpose.msra.mxu0 %v1048_v35  ;;  %v946_v48 = vmul.bf16 %v2437_v50, %v2403_v27  ;;  %v1923_v8 = vpop.f32.mrf.mxu1  ;;  %v1042_v23 = vsel %vm487_vm0, %v950_v57, 0  ;;  %v949_v32 = vmul.bf16 %v2446_v55, %v2400_v24  ;;  %v811_v35 = vadd.f32 %v1922_v45, %v2379_v10 }
 0x222   : > { %v890_v36 = vadd.f32 %v1931_v34, %v2392_v19  ;;  %v992_v37 = vsel %vm487_vm0, %v948_v33, 0  ;;  %1950 = vmatprep.subr.bf16.mxu0 %v2154_v49  ;;  %v989_v38 = vsel %vm487_vm0, %v947_v44, 0  ;;  %v945_v34 = vmul.bf16 %v2446_v55, %v2403_v27 }
 0x223   : > { %v2420_v39 = vpop.f32.mrf.mxu0  ;;  %1937 = vmatpush3.bf16.xpose.msra.mxu1 %v992_v37  ;;  %v986_v25 = vsel %vm487_vm0, %v946_v48, 0  ;;  %v805_v26 = vpop.f32.mrf.mxu1  ;;  %v706_v44 = vadd.f32 %v2383_v13, %v2356_v59  ;;  %v698_v24 = vadd.f32 %v2356_v59, %v2387_v17  ;;  %v695_v45 = vadd.f32 %v2356_v59, %v2381_v11 }
 0x224   : > { %v2423_v41 = vpack.c.bf16 %v890_v36, %v887_v30  ;;  %1938 = vmatprep.subr.bf16.mxu1 %v2154_v49  ;;  %v814_v30 = vadd.f32 %v1923_v8, %v2379_v10  ;;  %v806_v33 = vadd.f32 %v2379_v10, %v805_v26  ;;  %v803_v36 = vadd.f32 %v2379_v10, %v802_v53 }
 0x225   : > { %v1934_v42 = vpop.f32.mrf.mxu0  ;;  %v703_v10 = vadd.f32 %v2372_v7, %v2356_v59  ;;  %v725_v13 = vpack.c.bf16 %v698_v24, %v695_v45  ;;  %v882_v48 = vadd.f32 %v2392_v19, %v2420_v39  ;;  %v1258_v45 = vld [vmem:[%s2716_s13 + $0x30] sm:$0xff] }
 0x226   : > { %v903_v28 = vadd.f32 %v1934_v42, %v2392_v19  ;;  %v968_v21 = vmul.bf16 %v2397_v22, %v2423_v41  ;;  %v967_v60 = vmul.bf16 %v2416_v20, %v2423_v41  ;;  %v966_v61 = vmul.bf16 %v2437_v50, %v2423_v41 }
 0x227   : > { %v894_v46 = vpop.f32.mrf.mxu0  ;;  %v965_v62 = vmul.bf16 %v2446_v55, %v2423_v41  ;;  %v820_v37 = vpack.c.bf16 %v814_v30, %v811_v35  ;;  %v1039_v42 = vsel %vm487_vm0, %v949_v32, 0  ;;  %v819_v43 = vpack.c.bf16 %v806_v33, %v803_v36  ;;  %v978_v35 = vld [vmem:[%s2714_s11 + $0x8] sm:$0xff] }
 0x228   : > { %v895_v47 = vadd.f32 %v2392_v19, %v894_v46 }
 0x229   : > { %v1935_v51 = vpop.f32.mrf.mxu0  ;;  %1951 = vmatpush3.bf16.xpose.msra.mxu0 %v1045_v29  ;;  %v960_v27 = vmul.bf16 %v2397_v22, %v820_v37  ;;  %v956_v46 = vmul.bf16 %v2397_v22, %v819_v43  ;;  %v959_v59 = vmul.bf16 %v2416_v20, %v820_v37  ;;  %v955_v7 = vmul.bf16 %v2416_v20, %v819_v43 }
 0x22a   : > { %v906_v52 = vadd.f32 %v1935_v51, %v2392_v19  ;;  %1952 = vmatprep.subr.bf16.mxu0 %v2154_v49  ;;  %v953_v57 = vmul.bf16 %v2446_v55, %v819_v43 }
 0x22b   : > { %v897_v54 = vpop.f32.mrf.mxu0  ;;  %1939 = vmatpush3.bf16.xpose.msra.mxu1 %v989_v38  ;;  %v1160_v51 = vsel %vm487_vm0, %v960_v27, 0  ;;  %v1104_v17 = vsel %vm487_vm0, %v956_v46, 0  ;;  %v1157_v11 = vsel %vm487_vm0, %v959_v59, 0  ;;  %v1101_v29 = vsel %vm487_vm0, %v955_v7, 0  ;;  %v1259_v27 = vld [vmem:[%s2716_s13 + $0x38] sm:$0xff]  ;;  %v1257_v46 = vld [vmem:[%s2716_s13 + $0x28] sm:$0xff] }
 0x22c   : > { %v2448_v56 = vpack.c.bf16 %v906_v52, %v903_v28  ;;  %v898_v40 = vadd.f32 %v2392_v19, %v897_v54  ;;  %1940 = vmatprep.subr.bf16.mxu1 %v2154_v49  ;;  %v983_v28 = vsel %vm487_vm0, %v945_v34, 0  ;;  %v958_v52 = vmul.bf16 %v2437_v50, %v820_v37  ;;  %v1253_v7 = vld [vmem:[%s2716_s13 + $0x8] sm:$0xff] }
 0x22d   : > { %v954_v38 = vmul.bf16 %v2437_v50, %v819_v43 }
 0x22e   : > { %v2462_v58 = vpack.c.bf16 %v898_v40, %v895_v47  ;;  %v976_v63 = vmul.bf16 %v2397_v22, %v2448_v56  ;;  %v975_v0 = vmul.bf16 %v2416_v20, %v2448_v56  ;;  %v974_v3 = vmul.bf16 %v2437_v50, %v2448_v56 }
 0x22f   : > { %v973_v12 = vmul.bf16 %v2446_v55, %v2448_v56  ;;  %v726_v47 = vpack.c.bf16 %v706_v44, %v703_v10  ;;  %v1154_v53 = vsel %vm487_vm0, %v958_v52, 0  ;;  %v1098_v54 = vsel %vm487_vm0, %v954_v38, 0  ;;  %v1252_v38 = vld [vmem:[%s2716_s13] sm:$0xff] }
 0x230   : > { %v972_v14 = vmul.bf16 %v2397_v22, %v2462_v58  ;;  %v971_v15 = vmul.bf16 %v2416_v20, %v2462_v58  ;;  %v970_v16 = vmul.bf16 %v2437_v50, %v2462_v58  ;;  %v969_v18 = vmul.bf16 %v2446_v55, %v2462_v58  ;;  %v2097_v56 = vld [vmem:[%s2712_s9] sm:$0xff]  }
 0x231   : > { %1953 = vmatpush3.bf16.xpose.msra.mxu0 %v1042_v23  ;;  %v957_v40 = vmul.bf16 %v2446_v55, %v820_v37  ;;  %v879_v23 = vadd.f32 %v2392_v19, %v2406_v31 }
 0x232   : > { %1954 = vmatprep.subr.bf16.mxu0 %v2154_v49 }
 0x233   : > { %1941 = vmatpush3.bf16.xpose.msra.mxu1 %v986_v25  ;;  %v1151_v8 = vsel %vm487_vm0, %v957_v40, 0  ;;  %v1095_v25 = vsel %vm487_vm0, %v953_v57, 0  ;;  %v909_v26 = vpack.c.bf16 %v882_v48, %v879_v23 }
 0x234   : > { %1942 = vmatprep.subr.bf16.mxu1 %v2154_v49 }
 0x235   : > { %v964_v30 = vmul.bf16 %v2397_v22, %v909_v26  ;;  %v963_v19 = vmul.bf16 %v2416_v20, %v909_v26  ;;  %v962_v1 = vmul.bf16 %v2437_v50, %v909_v26  ;;  %v961_v2 = vmul.bf16 %v2446_v55, %v909_v26  ;;  %v2096_v55 = vld [vmem:[%s2712_s9 + $0x8] sm:$0xff]  }
 0x239   : > { %1955 = vmatpush3.bf16.xpose.msra.mxu0 %v1039_v42 }
 0x23a   : > { %1972 = vmatprep.subr.bf16.mxu0 %v2154_v49 }
 0x23b   : > { %1943 = vmatpush3.bf16.xpose.msra.mxu1 %v983_v28 }
 0x23c   : > { %1960 = vmatprep.subr.bf16.mxu1 %v2154_v49 }
 0x240   : > { %1957 = vmatmul.mubr.msk.bf16.vlgmr.msra.gmra.mxu0 %vm487_vm0, %v726_v47  ;;  %v1256_v47 = vld [vmem:[%s2716_s13 + $0x20] sm:$0xff] }
 0x241   : > { %1973 = vmatpush3.bf16.xpose.msra.mxu0 %v1160_v51  ;;  %1980 = vmatprep.mubr.msk.bf16.mxu0 %vm2155_vm1, %v2154_v49  ;;  %v1254_v51 = vld [vmem:[%s2716_s13 + $0x10] sm:$0xff] }
 0x242   : > { %1945 = vmatmul.mubr.msk.bf16.vlgmr.msra.gmra.mxu1 %vm487_vm0, %v725_v13  ;;  %1974 = vmatprep.subr.bf16.mxu0 %v2154_v49  ;;  %v1255_v13 = vld [vmem:[%s2716_s13 + $0x18] sm:$0xff] }
 0x243   : > { %1961 = vmatpush3.bf16.xpose.msra.mxu1 %v1104_v17  ;;  %1968 = vmatprep.mubr.msk.bf16.mxu1 %vm2155_vm1, %v2154_v49 }
 0x244   : > { %1962 = vmatprep.subr.bf16.mxu1 %v2154_v49 }
 0x249   : > { %1975 = vmatpush3.bf16.xpose.msra.mxu0 %v1157_v11 }
 0x24a   : > { %1976 = vmatprep.subr.bf16.mxu0 %v2154_v49 }
 0x24b   : > { %1963 = vmatpush3.bf16.xpose.msra.mxu1 %v1101_v29 }
 0x24c   : > { %1964 = vmatprep.subr.bf16.mxu1 %v2154_v49 }
 0x251   : > { %1977 = vmatpush3.bf16.xpose.msra.mxu0 %v1154_v53 }
 0x252   : > { %1978 = vmatprep.subr.bf16.mxu0 %v2154_v49 }
 0x253   : > { %1965 = vmatpush3.bf16.xpose.msra.mxu1 %v1098_v54 }
 0x254   : > { %1966 = vmatprep.subr.bf16.mxu1 %v2154_v49 }
 0x259   : > { %1979 = vmatpush3.bf16.xpose.msra.mxu0 %v1151_v8 }
 0x25a   : > { %2012 = vmatprep.subr.bf16.mxu0 %v2154_v49 }
 0x25b   : > { %1967 = vmatpush3.bf16.xpose.msra.mxu1 %v1095_v25 }
 0x25c   : > { %1984 = vmatprep.subr.mxu1 %v1259_v27 }
 0x260   : > { %1981 = vmatmul.mubr.msk.bf16.vlgmr.msra.gmra.mxu0 %vm487_vm0, %v728_v5  ;;  %v977_v5 = vld [vmem:[%s2714_s11] sm:$0xff] }
 0x261   : > { %2013 = vmatpush3.bf16.msra.mxu0 %v964_v30  ;;  %2020 = vmatprep.mubr.msk.bf16.mxu0 %vm2155_vm1, %v2154_v49 }
 0x262   : > { %1969 = vmatmul.mubr.msk.bf16.vlgmr.msra.gmra.mxu1 %vm487_vm0, %v727_v9  ;;  %2014 = vmatprep.subr.bf16.mxu0 %v2154_v49 }
 0x263   : > { %1985 = vmatpush3.msra.mxu1 %v1259_v27 }
 0x264   : > { %1986 = vmatprep.subr.mxu1 %v1258_v45 }
 0x265   : > { %2015 = vmatpush3.bf16.msra.mxu0 %v963_v19  ;;  %1987 = vmatpush3.msra.mxu1 %v1258_v45 }
 0x266   : > { %2016 = vmatprep.subr.bf16.mxu0 %v2154_v49  ;;  %1988 = vmatprep.subr.mxu1 %v1257_v46 }
 0x267   : > { %1989 = vmatpush3.msra.mxu1 %v1257_v46 }
 0x268   : > { %1990 = vmatprep.subr.mxu1 %v1256_v47 }
 0x269   : > { %2017 = vmatpush3.bf16.msra.mxu0 %v962_v1  ;;  %1991 = vmatpush3.msra.mxu1 %v1256_v47 }
 0x26a   : > { %2018 = vmatprep.subr.bf16.mxu0 %v2154_v49  ;;  %1992 = vmatprep.subr.mxu1 %v1255_v13 }
 0x26b   : > { %1993 = vmatpush3.msra.mxu1 %v1255_v13 }
 0x26c   : > { %1994 = vmatprep.subr.mxu1 %v1254_v51 }
 0x26d   : > { %2019 = vmatpush3.bf16.msra.mxu0 %v961_v2  ;;  %1995 = vmatpush3.msra.mxu1 %v1254_v51 }
 0x26e   : > { %2036 = vmatprep.subr.bf16.mxu0 %v2154_v49  ;;  %1996 = vmatprep.subr.mxu1 %v1253_v7 }
 0x26f   : > { %1997 = vmatpush3.msra.mxu1 %v1253_v7 }
 0x270   : > { %1998 = vmatprep.subr.mxu1 %v1252_v38 }
 0x271   : > { %1999 = vmatpush3.msra.mxu1 %v1252_v38 }
 0x272   : > { %2024 = vmatprep.subr.bf16.mxu1 %v2154_v49 }
 0x300   : > { %v1084_v4 = vpop.f32.mrf.mxu0 }
 0x301   : > { %v2560_v32 = vadd.f32 %v1084_v4, %v977_v5 }
 0x302   : > { %v1028_v6 = vpop.f32.mrf.mxu1  ;;  %v1958_v31 = vpop.f32.mrf.mxu0 }
 0x303   : > { %v2558_v9 = vadd.f32 %v1028_v6, %v977_v5  ;;  %v1210_v44 = vsel %vm1203_vm2, %v2560_v32, -inf }
 0x304   : > { %v1946_v39 = vpop.f32.mrf.mxu1  ;;  %v1087_v33 = vpop.f32.mrf.mxu0 }
 0x305   : > { %v1204_v34 = vsel %vm1203_vm2, %v2558_v9, -inf  ;;  %v2569_v28 = vadd.f32 %v1087_v33, %v978_v35 }
 0x306   : > { %1205 = vmax.xlane.f32.xlu0 %v1204_v34  ;;  %v1031_v36 = vpop.f32.mrf.mxu1  ;;  %v1959_v37 = vpop.f32.mrf.mxu0 }
 0x307   : > { %v2567_v42 = vadd.f32 %v1031_v36, %v978_v35  ;;  %v1213_v10 = vsel %vm1203_vm2, %v2569_v28, -inf }
 0x308   : > { %v1947_v43 = vpop.f32.mrf.mxu1 }
 0x309   : > { %v1207_v24 = vsel %vm1203_vm2, %v2567_v42, -inf }
 0x30a   : > { %1211 = vmax.xlane.f32.xlu0 %v1210_v44  ;;  %1208 = vmax.xlane.f32.xlu1 %v1207_v24 }
 0x30e   : > { %1214 = vmax.xlane.f32.xlu1 %v1213_v10 }
 0x320   : > { %v1196_v17 = vpop.f32.mrf.mxu0 }
 0x321   : > { %v1197_v53 = vadd.f32 %v1196_v17, %v977_v5 }
 0x322   : > { %v1140_v59 = vpop.f32.mrf.mxu1  ;;  %v1982_v29 = vpop.f32.mrf.mxu0 }
 0x323   : > { %v1141_v11 = vadd.f32 %v1140_v59, %v977_v5  ;;  %v1222_v26 = vsel %vm1203_vm2, %v1197_v53, -inf }
 0x324   : > { %v1970_v52 = vpop.f32.mrf.mxu1  ;;  %v1199_v54 = vpop.f32.mrf.mxu0 }
 0x325   : > { %v1216_v40 = vsel %vm1203_vm2, %v1141_v11, -inf  ;;  %v1200_v25 = vadd.f32 %v1199_v54, %v978_v35 }
 0x326   : > { %1217 = vmax.xlane.f32.xlu0 %v1216_v40  ;;  %v1143_v57 = vpop.f32.mrf.mxu1  ;;  %v1983_v48 = vpop.f32.mrf.mxu0 }
 0x327   : > { %v1144_v8 = vadd.f32 %v1143_v57, %v978_v35  ;;  %v1225_v19 = vsel %vm1203_vm2, %v1200_v25, -inf }
 0x328   : > { %v1971_v23 = vpop.f32.mrf.mxu1 }
 0x329   : > { %v1219_v30 = vsel %vm1203_vm2, %v1144_v8, -inf }
 0x32a   : > { %1223 = vmax.xlane.f32.xlu0 %v1222_v26  ;;  %1220 = vmax.xlane.f32.xlu1 %v1219_v30 }
 0x32e   : > { %1226 = vmax.xlane.f32.xlu1 %v1225_v19 }
 0x38f   : > { %v1206_v1 = vpop.xlane.xlu0 %1205 }
 0x390   : > { %v1228_v2 = vsub.f32 %v2558_v9, %v1206_v1 }
 0x392   : > { %v1236_v4 = vmul.f32 1.442695, %v1228_v2 }
 0x393   : > { %v1212_v5 = vpop.xlane.xlu0 %1211  ;;  %v1209_v6 = vpop.xlane.xlu1 %1208 }
 0x394   : > { %2114 = vpow2.f32 %v1236_v4  ;;  %v1230_v31 = vsub.f32 %v2560_v32, %v1212_v5  ;;  %v1229_v39 = vsub.f32 %v2567_v42, %v1209_v6 }
 0x396   : > { %v1240_v33 = vmul.f32 1.442695, %v1230_v31  ;;  %v1238_v34 = vmul.f32 1.442695, %v1229_v39 }
 0x397   : > { %v1215_v35 = vpop.xlane.xlu1 %1214 }
 0x398   : > { %2116 = vpow2.f32 %v1240_v33  ;;  %v1231_v36 = vsub.f32 %v2569_v28, %v1215_v35 }
 0x399   : > { %2118 = vpow2.f32 %v1238_v34 }
 0x39a   : > { %v1242_v37 = vmul.f32 1.442695, %v1231_v36 }
 0x39c   : > { %2120 = vpow2.f32 %v1242_v37 }
 0x3a1   : > { %v2115_v43 = vpop.eup %2114 }
 0x3a2   : > { %2000 = vmatprep.mubr.msk.f32.mxu1 %vm1203_vm2, %v2115_v43 }
 0x3a5   : > { %v2117_v9 = vpop.eup %2116 }
 0x3a6   : > { %v2119_v44 = vpop.eup %2118 }
 0x3a7   : > { %2001 = vmatmul.mubr.msk.f32.vlgmr.msra.gmra.mxu1 %vm1203_vm2, %v2119_v44 }
 0x3a8   : > { %2025 = vmatpush3.bf16.msra.mxu1 %v968_v21  ;;  %2003 = vmatprep.mubr.msk.f32.mxu1 %vm1203_vm2, %v2117_v9 }
 0x3a9   : > { %v2121_v32 = vpop.eup %2120  ;;  %2026 = vmatprep.subr.bf16.mxu1 %v2154_v49 }
 0x3ab   : > { %2004 = vmatmul.mubr.msk.f32.gmra.mxu1 %vm1203_vm2, %v2121_v32 }
 0x3ac   : > { %2027 = vmatpush3.bf16.msra.mxu1 %v967_v60 }
 0x3ad   : > { %2028 = vmatprep.subr.bf16.mxu1 %v2154_v49 }
 0x3af   : > { %v1218_v42 = vpop.xlane.xlu0 %1217 }
 0x3b0   : > { %2029 = vmatpush3.bf16.msra.mxu1 %v966_v61  ;;  %v1232_v28 = vsub.f32 %v1141_v11, %v1218_v42 }
 0x3b1   : > { %2030 = vmatprep.subr.bf16.mxu1 %v2154_v49 }
 0x3b2   : > { %v1244_v21 = vmul.f32 1.442695, %v1232_v28 }
 0x3b3   : > { %v1224_v24 = vpop.xlane.xlu0 %1223  ;;  %v1221_v10 = vpop.xlane.xlu1 %1220 }
 0x3b4   : > { %2122 = vpow2.f32 %v1244_v21  ;;  %2031 = vmatpush3.bf16.msra.mxu1 %v965_v62  ;;  %v1234_v27 = vsub.f32 %v1197_v53, %v1224_v24  ;;  %v1233_v60 = vsub.f32 %v1144_v8, %v1221_v10  ;;  %v1809_v24 = vld [vmem:[%s2713_s10] ss:$0 sm:$0xff] }
 0x3b5   : > { %2048 = vmatprep.subr.bf16.mxu1 %v2154_v49 }
 0x3b6   : > { %v1248_v45 = vmul.f32 1.442695, %v1234_v27  ;;  %v1246_v46 = vmul.f32 1.442695, %v1233_v60 }
 0x3b7   : > { %v1227_v47 = vpop.xlane.xlu1 %1226 }
 0x3b8   : > { %2124 = vpow2.f32 %v1248_v45  ;;  %v1235_v61 = vsub.f32 %v1200_v25, %v1227_v47 }
 0x3b9   : > { %2126 = vpow2.f32 %v1246_v46 }
 0x3ba   : > { %v1250_v13 = vmul.f32 1.442695, %v1235_v61 }
 0x3bc   : > { %2128 = vpow2.f32 %v1250_v13 }
 0x3c1   : > { %v2123_v51 = vpop.eup %2122 }
 0x3c2   : > { %2006 = vmatprep.mubr.msk.f32.mxu1 %vm1203_vm2, %v2123_v51 }
 0x3c5   : > { %v2125_v17 = vpop.eup %2124 }
 0x3c6   : > { %v2127_v59 = vpop.eup %2126 }
 0x3c7   : > { %2007 = vmatmul.mubr.msk.f32.gmra.mxu1 %vm1203_vm2, %v2127_v59 }
 0x3c8   : > { %2009 = vmatprep.mubr.msk.f32.mxu1 %vm1203_vm2, %v2125_v17 }
 0x3c9   : > { %v2129_v41 = vpop.eup %2128 }
 0x3cb   : > { %2010 = vmatmul.mubr.msk.f32.gmra.mxu1 %vm1203_vm2, %v2129_v41 }
 0x3cc   : > { %2032 = vmatprep.mubr.msk.bf16.mxu1 %vm2155_vm1, %v2154_v49 }
 0x467   : > { %v2002_v62 = vpop.f32.mrf.mxu1 }
 0x468   : > { %2130 = vrcp.f32 %v2002_v62 }
 0x469   : > { %v1350_v7 = vpop.f32.mrf.mxu1 }
 0x46a   : > { %2132 = vrcp.f32 %v1350_v7 }
 0x46b   : > { %v2005_v11 = vpop.f32.mrf.mxu1 }
 0x46c   : > { %2134 = vrcp.f32 %v2005_v11 }
 0x46d   : > { %v1360_v29 = vpop.f32.mrf.mxu1 }
 0x46e   : > { %2136 = vrcp.f32 %v1360_v29 }
 0x475   : > { %v2131_v52 = vpop.eup %2130 }
 0x476   : > { %v1398_v54 = vmul.f32 %v2131_v52, %v2119_v44 }
 0x477   : > { %v2133_v38 = vpop.eup %2132 }
 0x478   : > { %v1397_v53 = vmul.f32 %v2133_v38, %v2115_v43 }
 0x479   : > { %v2135_v40 = vpop.eup %2134 }
 0x47a   : > { %v1405_v57 = vpack.c.bf16 %v1398_v54, %v1397_v53  ;;  %v1400_v8 = vmul.f32 %v2135_v40, %v2121_v32 }
 0x47b   : > { %v2137_v48 = vpop.eup %2136 }
 0x47c   : > { %v1399_v23 = vmul.f32 %v2137_v48, %v2117_v9  ;;  %2021 = vmatmul.mubr.msk.bf16.vlgmr.msra.gmra.mxu0 %vm1203_vm2, %v1405_v57 }
 0x47d   : > { %2037 = vmatpush3.bf16.msra.mxu0 %v972_v14  ;;  %2044 = vmatprep.mubr.msk.bf16.mxu0 %vm2155_vm1, %v2154_v49 }
 0x47e   : > { %v1406_v25 = vpack.c.bf16 %v1400_v8, %v1399_v23  ;;  %2038 = vmatprep.subr.bf16.mxu0 %v2154_v49 }
 0x480   : > { %2033 = vmatmul.mubr.msk.bf16.vlgmr.msra.gmra.mxu1 %vm1203_vm2, %v1406_v25 }
 0x481   : > { %2039 = vmatpush3.bf16.msra.mxu0 %v971_v15  ;;  %2049 = vmatpush3.bf16.msra.mxu1 %v976_v63 }
 0x482   : > { %2040 = vmatprep.subr.bf16.mxu0 %v2154_v49  ;;  %2050 = vmatprep.subr.bf16.mxu1 %v2154_v49 }
 0x483   : > { %2056 = vmatprep.mubr.msk.bf16.mxu1 %vm2155_vm1, %v2154_v49 }
 0x485   : > { %2041 = vmatpush3.bf16.msra.mxu0 %v970_v16  ;;  %2051 = vmatpush3.bf16.msra.mxu1 %v975_v0 }
 0x486   : > { %2042 = vmatprep.subr.bf16.mxu0 %v2154_v49  ;;  %2052 = vmatprep.subr.bf16.mxu1 %v2154_v49 }
 0x487   : > { %v2008_v22 = vpop.f32.mrf.mxu1 }
 0x488   : > { %2138 = vrcp.f32 %v2008_v22 }
 0x489   : > { %2043 = vmatpush3.bf16.msra.mxu0 %v969_v18  ;;  %2053 = vmatpush3.bf16.msra.mxu1 %v974_v3  ;;  %v1370_v63 = vpop.f32.mrf.mxu1 }
 0x48a   : > { %2140 = vrcp.f32 %v1370_v63  ;;  %2054 = vmatprep.subr.bf16.mxu1 %v2154_v49  ;;  %2060 = vmatprep.subr.bf16.mxu0 %v2096_v55 }
 0x48b   : > { %v2011_v20 = vpop.f32.mrf.mxu1 }
 0x48c   : > { %2142 = vrcp.f32 %v2011_v20 }
 0x48d   : > { %2055 = vmatpush3.bf16.msra.mxu1 %v973_v12  ;;  %v1380_v0 = vpop.f32.mrf.mxu1 }
 0x48e   : > { %2144 = vrcp.f32 %v1380_v0 }
 0x495   : > { %v2139_v14 = vpop.eup %2138 }
 0x496   : > { %v1402_v16 = vmul.f32 %v2139_v14, %v2127_v59 }
 0x497   : > { %v2141_v15 = vpop.eup %2140 }
 0x498   : > { %v1401_v58 = vmul.f32 %v2141_v15, %v2123_v51 }
 0x499   : > { %v2143_v18 = vpop.eup %2142 }
 0x49a   : > { %v1407_v26 = vpack.c.bf16 %v1402_v16, %v1401_v58  ;;  %v1404_v30 = vmul.f32 %v2143_v18, %v2129_v41 }
 0x49b   : > { %v2145_v50 = vpop.eup %2144 }
 0x49c   : > { %2045 = vmatmul.mubr.msk.bf16.vlgmr.msra.gmra.mxu0 %vm1203_vm2, %v1407_v26  ;;  %v1403_v3 = vmul.f32 %v2145_v50, %v2125_v17 }
 0x49d   : > { %2061 = vmatpush3.bf16.msra.mxu0 %v2096_v55 }
 0x49e   : > { %v1408_v49 = vpack.c.bf16 %v1404_v30, %v1403_v3  ;;  %2062 = vmatprep.subr.bf16.mxu0 %v2097_v56 }
 0x4a0   : > { %2057 = vmatmul.mubr.msk.bf16.vlgmr.msra.gmra.mxu1 %vm1203_vm2, %v1408_v49 }
 0x4a1   : > { %2063 = vmatpush3.bf16.msra.mxu0 %v2097_v56 }
 0x53c   : > { %v1446_v12 = vpop.f32.mrf.mxu0 }
 0x53e   : > { %v2022_v19 = vpop.f32.mrf.mxu0 }
 0x540   : > { %v1449_v1 = vpop.f32.mrf.mxu0  ;;  %v1490_v2 = vpop.f32.mrf.mxu1 }
 0x541   : > { %v1585_v4 = vpack.c.bf16 %v1449_v1, %v1446_v12 }
 0x542   : > { %v2023_v5 = vpop.f32.mrf.mxu0  ;;  %v2034_v6 = vpop.f32.mrf.mxu1 }
 0x543   : > { %2064 = vmatprep.mubr.msk.bf16.mxu0 %vm487_vm0, %v1585_v4 }
 0x544   : > { %v1493_v31 = vpop.f32.mrf.mxu1 }
 0x545   : > { %v1586_v39 = vpack.c.bf16 %v1493_v31, %v1490_v2 }
 0x546   : > { %v2035_v33 = vpop.f32.mrf.mxu1 }
 0x547   : > { %2065 = vmatmul.mubr.msk.bf16.vlgmr.msra.gmra.mxu0 %vm487_vm0, %v1586_v39 }
 0x55c   : > { %v1534_v34 = vpop.f32.mrf.mxu0 }
 0x55e   : > { %v2046_v35 = vpop.f32.mrf.mxu0 }
 0x560   : > { %v1537_v36 = vpop.f32.mrf.mxu0  ;;  %v1578_v37 = vpop.f32.mrf.mxu1 }
 0x561   : > { %v1587_v43 = vpack.c.bf16 %v1537_v36, %v1534_v34 }
 0x562   : > { %v2047_v9 = vpop.f32.mrf.mxu0  ;;  %v2058_v44 = vpop.f32.mrf.mxu1 }
 0x563   : > { %2068 = vmatprep.mubr.msk.bf16.mxu0 %vm487_vm0, %v1587_v43 }
 0x564   : > { %v1581_v32 = vpop.f32.mrf.mxu1 }
 0x565   : > { %v1588_v42 = vpack.c.bf16 %v1581_v32, %v1578_v37 }
 0x566   : > { %v2059_v28 = vpop.f32.mrf.mxu1 }
 0x567   : > { %2069 = vmatmul.mubr.msk.bf16.gmra.mxu0 %vm487_vm0, %v1588_v42 }
 0x607   : > { %v2066_v21 = vpop.f32.mrf.mxu0 }
 0x608   : > { %v1667_v60 = vadd.f32 %v2066_v21, %v1809_v24 }
 0x609   : > { %v1658_v10 = vpop.f32.mrf.mxu0 }
 0x60a   : > { %v1659_v27 = vadd.f32 %v1809_v24, %v1658_v10  ;;  %1691 = vst.msk [vmem:[%s474_s26 + $0x10] sm:$0xff] %vm487_vm0, %v1667_v60 }
 0x60b   : > { %v2067_v45 = vpop.f32.mrf.mxu0 }
 0x60c   : > { %1689 = vst.msk [vmem:[%s474_s26] sm:$0xff] %vm487_vm0, %v1659_v27  ;;  %v1670_v61 = vadd.f32 %v2067_v45, %v1809_v24 }
 0x60d   : > { %v1661_v46 = vpop.f32.mrf.mxu0 }
 0x60e   : > { %v1662_v47 = vadd.f32 %v1809_v24, %v1661_v46  ;;  %1692 = vst.msk [vmem:[%s474_s26 + $0x18] sm:$0xff] %vm487_vm0, %v1670_v61 }
 0x610   : > { %1690 = vst.msk [vmem:[%s474_s26 + $0x8] sm:$0xff] %vm487_vm0, %v1662_v47 }
 0x627   : > { %v2070_v13 = vpop.f32.mrf.mxu0 }
 0x628   : > { %v1683_v59 = vadd.f32 %v2070_v13, %v1809_v24 }
 0x629   : > { %v1674_v51 = vpop.f32.mrf.mxu0 }
 0x62a   : > { %v1675_v17 = vadd.f32 %v1809_v24, %v1674_v51  ;;  %1695 = vst.msk [vmem:[%s474_s26 + $0x30] sm:$0xff] %vm487_vm0, %v1683_v59 }
 0x62b   : > { %v2071_v41 = vpop.f32.mrf.mxu0 }
 0x62c   : > { %1693 = vst.msk [vmem:[%s474_s26 + $0x20] sm:$0xff] %vm487_vm0, %v1675_v17  ;;  %v1686_v11 = vadd.f32 %v2071_v41, %v1809_v24 }
 0x62d   : > { %v1677_v62 = vpop.f32.mrf.mxu0 }
 0x62e   : > { %v1678_v7 = vadd.f32 %v1809_v24, %v1677_v62  ;;  %1696 = vst.msk [vmem:[%s474_s26 + $0x38] sm:$0xff] %vm487_vm0, %v1686_v11 }
 0x630   : > { %1694 = vst.msk [vmem:[%s474_s26 + $0x28] sm:$0xff] %vm487_vm0, %v1678_v7 }
 0x631 PF: > { %s24_s29 = sadd.s32 1, %s2152_s29  }
 0x632   : > { %p21_p4 = scmp.ge.s32.totalorder %s24_s29, 4  }
 0x634   :  { %23 = sbr.rel (!%p21_p4) target bundleno = 1 (0x1), region = 106 }

// kernel: rstb_forward.7
= control target key start
LH: loop header
LB: loop body
LE: loop exit
PB: predicated region body
PF: predicated region fallthrough
CT: control target
= control target key end

     0   :  { %s2237_s29 = smov 0   ;;  %s2727_s0 = inlined_call_operand.vmem [shape: f32[8,16,32], index: 0, kind: input, shape index: {}]   ;;  %s2728_s1 = inlined_call_operand.vmem [shape: f32[1,32], index: 1, kind: input, shape index: {}]   ;;  %s2729_s2 = inlined_call_operand.vmem [shape: f32[1,32], index: 2, kind: input, shape index: {}]   ;;  %s2730_s3 = inlined_call_operand.vmem [shape: bf16[32,32], index: 3, kind: input, shape index: {}]   ;;  %s2731_s4 = inlined_call_operand.vmem [shape: f32[1,32], index: 4, kind: input, shape index: {}]   ;;  %s2732_s5 = inlined_call_operand.vmem [shape: bf16[32,32], index: 5, kind: input, shape index: {}]   ;;  %s2733_s6 = inlined_call_operand.vmem [shape: f32[1,32], index: 6, kind: input, shape index: {}]   ;;  %s2734_s7 = inlined_call_operand.vmem [shape: bf16[32,32], index: 7, kind: input, shape index: {}]   ;;  %s2735_s8 = inlined_call_operand.vmem [shape: f32[1,32], index: 8, kind: input, shape index: {}]   ;;  %s2736_s9 = inlined_call_operand.vmem [shape: bf16[32,32], index: 9, kind: input, shape index: {}]   ;;  %s2737_s10 = inlined_call_operand.vmem [shape: f32[1,32], index: 10, kind: input, shape index: {}]   ;;  %s2738_s11 = inlined_call_operand.vmem [shape: f32[4,16,64], index: 11, kind: input, shape index: {}]   ;;  %s2739_s12 = inlined_call_operand.vmem [shape: bf16[64,32], index: 12, kind: input, shape index: {}]   ;;  %s2740_s13 = inlined_call_operand.vmem [shape: f32[64,64], index: 13, kind: input, shape index: {}]   ;;  %s2741_s14 = inlined_call_operand.vmem [shape: f32[8,16,32], index: 14, kind: output, shape index: {}]  }
   0x1 LB: > { %s1761_s30 = sadd.s32 4294967295, %s2158_s29   ;;  %p1765_p0 = scmp.ge.s32.totalorder %s2158_s29, 1  ;;  %s2158_s29 = sphi %s2237_s29, %s24_s29  }
   0x2   : > { %p414_p1 = scmp.lt.s32.totalorder %s2158_s29, 3 }
   0x4   : > { %p415_p2 = pnand %p1765_p0, %p414_p1 }
   0x5   : > { %s1766_s15 = sshll.u32 (!%p415_p2), %s1761_s30, 2 }
   0x6   : > { %418 = sbr.rel (%p415_p2) target bundleno = 1585 (0x631), region = 76  ;;  %p463_p3 = scmp.lt.s32.totalorder (!%p415_p2), %s1766_s15, 7 }
   0xb   : > { %s2743_s15 = smov (!%p463_p3, %s1766_s15), 7  ;;  %vm487_vm0 = vcmask 261120   ;;  %v2092_v56 = vld [vmem:[%s2730_s3 + $0x8] sm:$0xff]   ;;  %v2093_v57 = vld [vmem:[%s2730_s3] sm:$0xff]   ;;  %vm2161_vm1 = vmmov 0   ;;  %vm1209_vm2 = vcmask 523264  }
   0xc   : > { %s1824_s16 = sshll.u32 %s2743_s15, 4  ;;  %2078 = vmatprep.subr.bf16.mxu1 %v2092_v56  ;;  %1906 = vmatprep.subr.bf16.mxu0 %v2092_v56  ;;  %v2310_v58 = vld [vmem:[%s2732_s5 + $0x8] sm:$0xff]  }
   0xd   : > { %s467_s19 = scalar_lea.vmem %s2727_s0, %s1824_s16  ;;  %2080 = vmatpush3.bf16.msra.mxu1 %v2092_v56  ;;  %1907 = vmatpush3.bf16.msra.mxu0 %v2092_v56  ;;  %v2316_v59 = vld [vmem:[%s2734_s7 + $0x8] sm:$0xff]   ;;  %s474_s25 = scalar_lea.vmem %s2741_s14, %s1824_s16 }
   0xe   : > { %v481_v0 = vld [vmem:[%s467_s19 + $0x20] sm:$0xff]  ;;  %v483_v1 = vld [vmem:[%s467_s19 + $0x30] sm:$0xff]  ;;  %v482_v2 = vld [vmem:[%s467_s19 + $0x28] sm:$0xff]  ;;  %2079 = vmatprep.subr.bf16.mxu1 %v2093_v57  ;;  %1908 = vmatprep.subr.bf16.mxu0 %v2093_v57 }
   0xf   : > { %v500_v3 = vsel %vm487_vm0, %v481_v0, 0.0  ;;  %v506_v4 = vsel %vm487_vm0, %v483_v1, 0.0  ;;  %v484_v5 = vld [vmem:[%s467_s19 + $0x38] sm:$0xff]  ;;  %v503_v6 = vsel %vm487_vm0, %v482_v2, 0.0  ;;  %v477_v7 = vld [vmem:[%s467_s19] sm:$0xff]  ;;  %v478_v9 = vld [vmem:[%s467_s19 + $0x8] sm:$0xff] }
  0x10   : > { %501 = vadd.xlane.f32.xlu0 %v500_v3  ;;  %507 = vadd.xlane.f32.xlu1 %v506_v4  ;;  %v509_v8 = vsel %vm487_vm0, %v484_v5, 0.0  ;;  %v488_v10 = vsel %vm487_vm0, %v477_v7, 0.0  ;;  %v491_v11 = vsel %vm487_vm0, %v478_v9, 0.0  ;;  %v479_v12 = vld [vmem:[%s467_s19 + $0x10] sm:$0xff]  ;;  %v480_v13 = vld [vmem:[%s467_s19 + $0x18] sm:$0xff] }
  0x11   : > { %v494_v14 = vsel %vm487_vm0, %v479_v12, 0.0  ;;  %v497_v15 = vsel %vm487_vm0, %v480_v13, 0.0  ;;  %2081 = vmatpush3.bf16.msra.mxu1 %v2093_v57  ;;  %1909 = vmatpush3.bf16.msra.mxu0 %v2093_v57 }
  0x12   : > { %1918 = vmatprep.subr.bf16.mxu1 %v2310_v58  ;;  %1930 = vmatprep.subr.bf16.mxu0 %v2316_v59 }
  0x14   : > { %504 = vadd.xlane.f32.xlu0 %v503_v6  ;;  %510 = vadd.xlane.f32.xlu1 %v509_v8 }
  0x18   : > { %489 = vadd.xlane.f32.xlu0 %v488_v10  ;;  %492 = vadd.xlane.f32.xlu1 %v491_v11 }
  0x1c   : > { %495 = vadd.xlane.f32.xlu0 %v494_v14  ;;  %498 = vadd.xlane.f32.xlu1 %v497_v15 }
  0x99   : > { %v502_v16 = vpop.xlane.xlu0 %501  ;;  %v508_v17 = vpop.xlane.xlu1 %507 }
  0x9a   : > { %v517_v18 = vmul.f32 0.03125, %v502_v16  ;;  %v519_v19 = vmul.f32 0.03125, %v508_v17 }
  0x9c   : > { %v2261_v20 = vsub.f32 %v481_v0, %v517_v18  ;;  %v2263_v21 = vsub.f32 %v483_v1, %v519_v19 }
  0x9d   : > { %v505_v22 = vpop.xlane.xlu0 %504  ;;  %v511_v23 = vpop.xlane.xlu1 %510 }
  0x9e   : > { %v518_v24 = vmul.f32 0.03125, %v505_v22  ;;  %v520_v25 = vmul.f32 0.03125, %v511_v23  ;;  %v533_v26 = vmul.f32 %v2261_v20, %v2261_v20  ;;  %v535_v27 = vmul.f32 %v2263_v21, %v2263_v21 }
  0xa0   : > { %v2269_v28 = vsub.f32 %v482_v2, %v518_v24  ;;  %v2271_v29 = vsub.f32 %v484_v5, %v520_v25  ;;  %v549_v30 = vsel %vm487_vm0, %v533_v26, 0.0  ;;  %v555_v33 = vsel %vm487_vm0, %v535_v27, 0.0  ;;  %v1772_v24 = vld [vmem:[%s2728_s1] ss:$0 sm:$0xff] }
  0xa1   : > { %550 = vadd.xlane.f32.xlu0 %v549_v30  ;;  %v490_v31 = vpop.xlane.xlu0 %489  ;;  %v493_v32 = vpop.xlane.xlu1 %492 }
  0xa2   : > { %v513_v34 = vmul.f32 0.03125, %v490_v31  ;;  %v534_v35 = vmul.f32 %v2269_v28, %v2269_v28  ;;  %v514_v36 = vmul.f32 0.03125, %v493_v32  ;;  %v536_v37 = vmul.f32 %v2271_v29, %v2271_v29  ;;  %v1773_v31 = vld [vmem:[%s2729_s2] ss:$0 sm:$0xff] }
  0xa4   : > { %v2279_v38 = vsub.f32 %v477_v7, %v513_v34  ;;  %v552_v39 = vsel %vm487_vm0, %v534_v35, 0.0  ;;  %v2282_v40 = vsub.f32 %v478_v9, %v514_v36  ;;  %v558_v42 = vsel %vm487_vm0, %v536_v37, 0.0 }
  0xa5   : > { %553 = vadd.xlane.f32.xlu1 %v552_v39  ;;  %556 = vadd.xlane.f32.xlu0 %v555_v33  ;;  %v496_v41 = vpop.xlane.xlu0 %495  ;;  %v499_v43 = vpop.xlane.xlu1 %498 }
  0xa6   : > { %v515_v44 = vmul.f32 0.03125, %v496_v41  ;;  %v516_v45 = vmul.f32 0.03125, %v499_v43  ;;  %v529_v46 = vmul.f32 %v2279_v38, %v2279_v38  ;;  %v530_v47 = vmul.f32 %v2282_v40, %v2282_v40 }
  0xa8   : > { %v2289_v48 = vsub.f32 %v479_v12, %v515_v44  ;;  %v2291_v49 = vsub.f32 %v480_v13, %v516_v45  ;;  %v537_v50 = vsel %vm487_vm0, %v529_v46, 0.0  ;;  %v540_v51 = vsel %vm487_vm0, %v530_v47, 0.0 }
  0xa9   : > { %559 = vadd.xlane.f32.xlu1 %v558_v42  ;;  %538 = vadd.xlane.f32.xlu0 %v537_v50 }
  0xaa   : > { %v531_v52 = vmul.f32 %v2289_v48, %v2289_v48  ;;  %v532_v53 = vmul.f32 %v2291_v49, %v2291_v49 }
  0xac   : > { %v543_v54 = vsel %vm487_vm0, %v531_v52, 0.0  ;;  %v546_v55 = vsel %vm487_vm0, %v532_v53, 0.0 }
  0xad   : > { %541 = vadd.xlane.f32.xlu1 %v540_v51  ;;  %544 = vadd.xlane.f32.xlu0 %v543_v54 }
  0xb1   : > { %547 = vadd.xlane.f32.xlu1 %v546_v55 }
 0x12a   : > { %v551_v60 = vpop.xlane.xlu0 %550 }
 0x12b   : > { %v565_v61 = vmul.f32 0.03125, %v551_v60 }
 0x12d   : > { %v573_v62 = vadd.f32 1e-05, %v565_v61 }
 0x12e   : > { %v554_v63 = vpop.xlane.xlu1 %553  ;;  %v557_v0 = vpop.xlane.xlu0 %556 }
 0x12f   : > { %2104 = vrsqrt.f32 %v573_v62  ;;  %v566_v1 = vmul.f32 0.03125, %v554_v63  ;;  %v567_v2 = vmul.f32 0.03125, %v557_v0  ;;  %v2097_v62 = vld [vmem:[%s2734_s7] sm:$0xff]  }
 0x131   : > { %v574_v3 = vadd.f32 1e-05, %v566_v1  ;;  %v575_v4 = vadd.f32 1e-05, %v567_v2 }
 0x132   : > { %v560_v5 = vpop.xlane.xlu1 %559  ;;  %v539_v6 = vpop.xlane.xlu0 %538 }
 0x133   : > { %2106 = vrsqrt.f32 %v574_v3  ;;  %v568_v7 = vmul.f32 0.03125, %v560_v5  ;;  %v561_v8 = vmul.f32 0.03125, %v539_v6 }
 0x134   : > { %2108 = vrsqrt.f32 %v575_v4 }
 0x135   : > { %v576_v9 = vadd.f32 1e-05, %v568_v7  ;;  %v569_v10 = vadd.f32 1e-05, %v561_v8 }
 0x136   : > { %v542_v11 = vpop.xlane.xlu1 %541  ;;  %v545_v12 = vpop.xlane.xlu0 %544 }
 0x137   : > { %2110 = vrsqrt.f32 %v576_v9  ;;  %v562_v13 = vmul.f32 0.03125, %v542_v11  ;;  %v563_v14 = vmul.f32 0.03125, %v545_v12 }
 0x138   : > { %2112 = vrsqrt.f32 %v569_v10  ;;  %v2385_v10 = vld [vmem:[%s2733_s6] ss:$0 sm:$0xff] }
 0x139   : > { %v570_v15 = vadd.f32 1e-05, %v562_v13  ;;  %v571_v16 = vadd.f32 1e-05, %v563_v14 }
 0x13a   : > { %v548_v17 = vpop.xlane.xlu1 %547 }
 0x13b   : > { %2114 = vrsqrt.f32 %v570_v15  ;;  %v564_v18 = vmul.f32 0.03125, %v548_v17 }
 0x13c   : > { %v2105_v19 = vpop.eup %2104  ;;  %2116 = vrsqrt.f32 %v571_v16 }
 0x13d   : > { %v572_v22 = vadd.f32 1e-05, %v564_v18  ;;  %v589_v23 = vmul.f32 %v2105_v19, %v2261_v20  ;;  %v2398_v19 = vld [vmem:[%s2735_s8] ss:$0 sm:$0xff] }
 0x13f   : > { %2118 = vrsqrt.f32 %v572_v22  ;;  %v603_v30 = vmul.f32 %v1772_v24, %v589_v23  ;;  %v2403_v22 = vld [vmem:[%s2739_s12 + $0x18] sm:$0xff]  }
 0x140   : > { %v2107_v25 = vpop.eup %2106 }
 0x141   : > { %v2109_v26 = vpop.eup %2108  ;;  %v590_v27 = vmul.f32 %v2107_v25, %v2269_v28  ;;  %v617_v20 = vadd.f32 %v1773_v31, %v603_v30 }
 0x142   : > { %v591_v32 = vmul.f32 %v2109_v26, %v2263_v21 }
 0x143   : > { %v604_v33 = vmul.f32 %v1772_v24, %v590_v27 }
 0x144   : > { %v2111_v34 = vpop.eup %2110  ;;  %v605_v39 = vmul.f32 %v1772_v24, %v591_v32 }
 0x145   : > { %v2113_v35 = vpop.eup %2112  ;;  %v618_v36 = vadd.f32 %v1773_v31, %v604_v33  ;;  %v592_v37 = vmul.f32 %v2111_v34, %v2271_v29  ;;  %v2095_v29 = vld [vmem:[%s2732_s5] sm:$0xff]  }
 0x146   : > { %v585_v41 = vmul.f32 %v2113_v35, %v2279_v38  ;;  %v619_v45 = vadd.f32 %v1773_v31, %v605_v39 }
 0x147   : > { %v623_v42 = vpack.c.bf16 %v618_v36, %v617_v20  ;;  %v606_v43 = vmul.f32 %v1772_v24, %v592_v37  ;;  %v2422_v20 = vld [vmem:[%s2739_s12 + $0x10] sm:$0xff]  }
 0x148   : > { %v2115_v28 = vpop.eup %2114  ;;  %v599_v47 = vmul.f32 %v1772_v24, %v585_v41 }
 0x149   : > { %v2117_v44 = vpop.eup %2116  ;;  %1914 = vmatprep.mubr.msk.bf16.mxu1 %vm487_vm0, %v623_v42  ;;  %v620_v46 = vadd.f32 %v1773_v31, %v606_v43  ;;  %v586_v21 = vmul.f32 %v2115_v28, %v2282_v40 }
 0x14a   : > { %v587_v50 = vmul.f32 %v2117_v44, %v2289_v48  ;;  %v613_v53 = vadd.f32 %v1773_v31, %v599_v47 }
 0x14b   : > { %v624_v51 = vpack.c.bf16 %v620_v46, %v619_v45  ;;  %v600_v52 = vmul.f32 %v1772_v24, %v586_v21 }
 0x14c   : > { %v2119_v38 = vpop.eup %2118  ;;  %v601_v56 = vmul.f32 %v1772_v24, %v587_v50  ;;  %v2443_v50 = vld [vmem:[%s2739_s12 + $0x8] sm:$0xff]  }
 0x14d   : > { %1915 = vmatmul.mubr.msk.bf16.vlgmr.msra.gmra.mxu1 %vm487_vm0, %v624_v51  ;;  %v614_v54 = vadd.f32 %v1773_v31, %v600_v52  ;;  %v588_v55 = vmul.f32 %v2119_v38, %v2291_v49  ;;  %v2160_v49 = vmov 0.0  }
 0x14e   : > { %1919 = vmatpush3.bf16.msra.mxu1 %v2310_v58  ;;  %v615_v48 = vadd.f32 %v1773_v31, %v601_v56 }
 0x14f   : > { %1920 = vmatprep.subr.bf16.mxu1 %v2095_v29  ;;  %v621_v40 = vpack.c.bf16 %v614_v54, %v613_v53  ;;  %v602_v57 = vmul.f32 %v1772_v24, %v588_v55  ;;  %v2452_v55 = vld [vmem:[%s2739_s12] sm:$0xff]  }
 0x151   : > { %1910 = vmatprep.mubr.msk.bf16.mxu0 %vm487_vm0, %v621_v40  ;;  %1922 = vmatprep.mubr.msk.bf16.mxu1 %vm487_vm0, %v621_v40  ;;  %v616_v60 = vadd.f32 %v1773_v31, %v602_v57 }
 0x152   : > { %1921 = vmatpush3.bf16.msra.mxu1 %v2095_v29 }
 0x153   : > { %v622_v61 = vpack.c.bf16 %v616_v60, %v615_v48  ;;  %1942 = vmatprep.subr.bf16.mxu1 %v2160_v49 }
 0x155   : > { %1911 = vmatmul.mubr.msk.bf16.vlgmr.msra.gmra.mxu0 %vm487_vm0, %v622_v61  ;;  %1923 = vmatmul.mubr.msk.bf16.vlgmr.msra.gmra.mxu1 %vm487_vm0, %v622_v61 }
 0x156   : > { %1926 = vmatprep.mubr.msk.bf16.mxu1 %vm487_vm0, %v623_v42  ;;  %1931 = vmatpush3.bf16.msra.mxu0 %v2316_v59  ;;  %v2362_v59 = vld [vmem:[%s2731_s4] ss:$0 sm:$0xff] }
 0x157   : > { %1934 = vmatprep.mubr.msk.bf16.mxu0 %vm487_vm0, %v621_v40  ;;  %1932 = vmatprep.subr.bf16.mxu0 %v2097_v62 }
 0x15a   : > { %1933 = vmatpush3.bf16.msra.mxu0 %v2097_v62 }
 0x15b   : > { %1954 = vmatprep.subr.bf16.mxu0 %v2160_v49 }
 0x15d   : > { %1927 = vmatmul.mubr.msk.bf16.gmra.mxu1 %vm487_vm0, %v624_v51  ;;  %1935 = vmatmul.mubr.msk.bf16.vlgmr.msra.gmra.mxu0 %vm487_vm0, %v622_v61 }
 0x15e   : > { %1938 = vmatprep.mubr.msk.bf16.mxu0 %vm487_vm0, %v623_v42  ;;  %1950 = vmatprep.mubr.msk.bf16.mxu1 %vm2161_vm1, %v2160_v49 }
 0x165   : > { %1939 = vmatmul.mubr.msk.bf16.gmra.mxu0 %vm487_vm0, %v624_v51 }
 0x166   : > { %1962 = vmatprep.mubr.msk.bf16.mxu0 %vm2161_vm1, %v2160_v49 }
 0x20d   : > { %v1916_v58 = vpop.f32.mrf.mxu1 }
 0x20e   : > { %v2365_v1 = vadd.f32 %v1916_v58, %v2362_v59 }
 0x20f   : > { %v710_v63 = vpop.f32.mrf.mxu1 }
 0x210   : > { %v2371_v4 = vadd.f32 %v2362_v59, %v710_v63 }
 0x211   : > { %v1917_v0 = vpop.f32.mrf.mxu1 }
 0x212   : > { %v2368_v2 = vadd.f32 %v1917_v0, %v2362_v59 }
 0x213   : > { %v713_v3 = vpop.f32.mrf.mxu1 }
 0x214   : > { %v728_v5 = vpack.c.bf16 %v2368_v2, %v2365_v1  ;;  %v2376_v6 = vadd.f32 %v2362_v59, %v713_v3 }
 0x215   : > { %v2378_v7 = vpop.f32.mrf.mxu0  ;;  %v1924_v8 = vpop.f32.mrf.mxu1 }
 0x216   : > { %v727_v9 = vpack.c.bf16 %v2376_v6, %v2371_v4  ;;  %v795_v15 = vadd.f32 %v1924_v8, %v2385_v10  ;;  %v977_v4 = vld [vmem:[%s2738_s11] sm:$0xff]  ;;  %v979_v6 = vld [vmem:[%s2738_s11 + $0x10] sm:$0xff] }
 0x217   : > { %v2387_v11 = vpop.f32.mrf.mxu0  ;;  %v786_v12 = vpop.f32.mrf.mxu1 }
 0x218   : > { %v787_v23 = vadd.f32 %v2385_v10, %v786_v12 }
 0x219   : > { %v2389_v13 = vpop.f32.mrf.mxu0  ;;  %v1925_v14 = vpop.f32.mrf.mxu1 }
 0x21a   : > { %v798_v16 = vadd.f32 %v1925_v14, %v2385_v10 }
 0x21b   : > { %v2393_v17 = vpop.f32.mrf.mxu0  ;;  %v789_v18 = vpop.f32.mrf.mxu1 }
 0x21c   : > { %v2406_v24 = vpack.c.bf16 %v798_v16, %v795_v15  ;;  %v790_v25 = vadd.f32 %v2385_v10, %v789_v18 }
 0x21d   : > { %v1936_v26 = vpop.f32.mrf.mxu0  ;;  %v1928_v45 = vpop.f32.mrf.mxu1 }
 0x21e   : > { %v2409_v27 = vpack.c.bf16 %v790_v25, %v787_v23  ;;  %v887_v30 = vadd.f32 %v1936_v26, %v2398_v19  ;;  %v952_v32 = vmul.bf16 %v2403_v22, %v2406_v24  ;;  %v951_v43 = vmul.bf16 %v2422_v20, %v2406_v24 }
 0x21f   : > { %v2412_v31 = vpop.f32.mrf.mxu0  ;;  %v802_v53 = vpop.f32.mrf.mxu1  ;;  %v950_v57 = vmul.bf16 %v2443_v50, %v2406_v24 }
 0x220   : > { %v948_v33 = vmul.bf16 %v2403_v22, %v2409_v27  ;;  %v1054_v35 = vsel %vm487_vm0, %v952_v32, 0  ;;  %v947_v44 = vmul.bf16 %v2422_v20, %v2409_v27  ;;  %v1051_v29 = vsel %vm487_vm0, %v951_v43, 0 }
 0x221   : > { %v1937_v34 = vpop.f32.mrf.mxu0  ;;  %1955 = vmatpush3.bf16.xpose.msra.mxu0 %v1054_v35  ;;  %v946_v48 = vmul.bf16 %v2443_v50, %v2409_v27  ;;  %v1929_v8 = vpop.f32.mrf.mxu1  ;;  %v1048_v23 = vsel %vm487_vm0, %v950_v57, 0  ;;  %v949_v32 = vmul.bf16 %v2452_v55, %v2406_v24  ;;  %v811_v35 = vadd.f32 %v1928_v45, %v2385_v10 }
 0x222   : > { %v890_v36 = vadd.f32 %v1937_v34, %v2398_v19  ;;  %v998_v37 = vsel %vm487_vm0, %v948_v33, 0  ;;  %1956 = vmatprep.subr.bf16.mxu0 %v2160_v49  ;;  %v995_v38 = vsel %vm487_vm0, %v947_v44, 0  ;;  %v945_v34 = vmul.bf16 %v2452_v55, %v2409_v27 }
 0x223   : > { %v2426_v39 = vpop.f32.mrf.mxu0  ;;  %1943 = vmatpush3.bf16.xpose.msra.mxu1 %v998_v37  ;;  %v992_v25 = vsel %vm487_vm0, %v946_v48, 0  ;;  %v805_v26 = vpop.f32.mrf.mxu1  ;;  %v706_v44 = vadd.f32 %v2389_v13, %v2362_v59  ;;  %v698_v24 = vadd.f32 %v2362_v59, %v2393_v17  ;;  %v695_v45 = vadd.f32 %v2362_v59, %v2387_v11 }
 0x224   : > { %v2429_v41 = vpack.c.bf16 %v890_v36, %v887_v30  ;;  %1944 = vmatprep.subr.bf16.mxu1 %v2160_v49  ;;  %v814_v30 = vadd.f32 %v1929_v8, %v2385_v10  ;;  %v806_v33 = vadd.f32 %v2385_v10, %v805_v26  ;;  %v803_v36 = vadd.f32 %v2385_v10, %v802_v53 }
 0x225   : > { %v1940_v42 = vpop.f32.mrf.mxu0  ;;  %v703_v10 = vadd.f32 %v2378_v7, %v2362_v59  ;;  %v725_v13 = vpack.c.bf16 %v698_v24, %v695_v45  ;;  %v882_v48 = vadd.f32 %v2398_v19, %v2426_v39 }
 0x226   : > { %v903_v28 = vadd.f32 %v1940_v42, %v2398_v19  ;;  %v968_v21 = vmul.bf16 %v2403_v22, %v2429_v41  ;;  %v967_v60 = vmul.bf16 %v2422_v20, %v2429_v41  ;;  %v966_v61 = vmul.bf16 %v2443_v50, %v2429_v41 }
 0x227   : > { %v894_v46 = vpop.f32.mrf.mxu0  ;;  %v965_v62 = vmul.bf16 %v2452_v55, %v2429_v41  ;;  %v820_v37 = vpack.c.bf16 %v814_v30, %v811_v35  ;;  %v1045_v42 = vsel %vm487_vm0, %v949_v32, 0  ;;  %v819_v43 = vpack.c.bf16 %v806_v33, %v803_v36  ;;  %v978_v33 = vld [vmem:[%s2738_s11 + $0x8] sm:$0xff] }
 0x228   : > { %v895_v47 = vadd.f32 %v2398_v19, %v894_v46 }
 0x229   : > { %v1941_v51 = vpop.f32.mrf.mxu0  ;;  %1957 = vmatpush3.bf16.xpose.msra.mxu0 %v1051_v29  ;;  %v960_v27 = vmul.bf16 %v2403_v22, %v820_v37  ;;  %v956_v46 = vmul.bf16 %v2403_v22, %v819_v43  ;;  %v959_v59 = vmul.bf16 %v2422_v20, %v820_v37  ;;  %v955_v7 = vmul.bf16 %v2422_v20, %v819_v43 }
 0x22a   : > { %v906_v52 = vadd.f32 %v1941_v51, %v2398_v19  ;;  %1958 = vmatprep.subr.bf16.mxu0 %v2160_v49  ;;  %v953_v57 = vmul.bf16 %v2452_v55, %v819_v43 }
 0x22b   : > { %v897_v54 = vpop.f32.mrf.mxu0  ;;  %1945 = vmatpush3.bf16.xpose.msra.mxu1 %v995_v38  ;;  %v1166_v51 = vsel %vm487_vm0, %v960_v27, 0  ;;  %v1110_v17 = vsel %vm487_vm0, %v956_v46, 0  ;;  %v1163_v11 = vsel %vm487_vm0, %v959_v59, 0  ;;  %v1107_v29 = vsel %vm487_vm0, %v955_v7, 0  ;;  %v1265_v46 = vld [vmem:[%s2740_s13 + $0x38] sm:$0xff]  ;;  %v981_v59 = vld [vmem:[%s2738_s11 + $0x20] sm:$0xff] }
 0x22c   : > { %v2454_v56 = vpack.c.bf16 %v906_v52, %v903_v28  ;;  %v898_v40 = vadd.f32 %v2398_v19, %v897_v54  ;;  %1946 = vmatprep.subr.bf16.mxu1 %v2160_v49  ;;  %v989_v28 = vsel %vm487_vm0, %v945_v34, 0  ;;  %v958_v52 = vmul.bf16 %v2443_v50, %v820_v37  ;;  %v1260_v7 = vld [vmem:[%s2740_s13 + $0x10] sm:$0xff] }
 0x22d   : > { %v954_v38 = vmul.bf16 %v2443_v50, %v819_v43 }
 0x22e   : > { %v2468_v58 = vpack.c.bf16 %v898_v40, %v895_v47  ;;  %v976_v63 = vmul.bf16 %v2403_v22, %v2454_v56  ;;  %v975_v0 = vmul.bf16 %v2422_v20, %v2454_v56  ;;  %v974_v3 = vmul.bf16 %v2443_v50, %v2454_v56 }
 0x22f   : > { %v973_v12 = vmul.bf16 %v2452_v55, %v2454_v56  ;;  %v726_v47 = vpack.c.bf16 %v706_v44, %v703_v10  ;;  %v1160_v53 = vsel %vm487_vm0, %v958_v52, 0  ;;  %v1104_v54 = vsel %vm487_vm0, %v954_v38, 0  ;;  %v1259_v38 = vld [vmem:[%s2740_s13 + $0x8] sm:$0xff]  ;;  %v2103_v56 = vld [vmem:[%s2736_s9] sm:$0xff]  }
 0x230   : > { %v972_v14 = vmul.bf16 %v2403_v22, %v2468_v58  ;;  %v971_v15 = vmul.bf16 %v2422_v20, %v2468_v58  ;;  %v970_v16 = vmul.bf16 %v2443_v50, %v2468_v58  ;;  %v969_v18 = vmul.bf16 %v2452_v55, %v2468_v58 }
 0x231   : > { %1959 = vmatpush3.bf16.xpose.msra.mxu0 %v1048_v23  ;;  %v957_v40 = vmul.bf16 %v2452_v55, %v820_v37  ;;  %v879_v23 = vadd.f32 %v2398_v19, %v2412_v31  ;;  %v980_v37 = vld [vmem:[%s2738_s11 + $0x18] sm:$0xff] }
 0x232   : > { %1960 = vmatprep.subr.bf16.mxu0 %v2160_v49 }
 0x233   : > { %1947 = vmatpush3.bf16.xpose.msra.mxu1 %v992_v25  ;;  %v1157_v8 = vsel %vm487_vm0, %v957_v40, 0  ;;  %v1101_v25 = vsel %vm487_vm0, %v953_v57, 0  ;;  %v909_v26 = vpack.c.bf16 %v882_v48, %v879_v23  ;;  %v982_v57 = vld [vmem:[%s2738_s11 + $0x28] sm:$0xff]  ;;  %v1258_v48 = vld [vmem:[%s2740_s13] sm:$0xff] }
 0x234   : > { %1948 = vmatprep.subr.bf16.mxu1 %v2160_v49 }
 0x235   : > { %v964_v30 = vmul.bf16 %v2403_v22, %v909_v26  ;;  %v963_v19 = vmul.bf16 %v2422_v20, %v909_v26  ;;  %v962_v1 = vmul.bf16 %v2443_v50, %v909_v26  ;;  %v961_v2 = vmul.bf16 %v2452_v55, %v909_v26  ;;  %v984_v26 = vld [vmem:[%s2738_s11 + $0x38] sm:$0xff]  ;;  %v2102_v55 = vld [vmem:[%s2736_s9 + $0x8] sm:$0xff]  }
 0x239   : > { %1961 = vmatpush3.bf16.xpose.msra.mxu0 %v1045_v42 }
 0x23a   : > { %1978 = vmatprep.subr.bf16.mxu0 %v2160_v49 }
 0x23b   : > { %1949 = vmatpush3.bf16.xpose.msra.mxu1 %v989_v28 }
 0x23c   : > { %1966 = vmatprep.subr.bf16.mxu1 %v2160_v49 }
 0x240   : > { %1963 = vmatmul.mubr.msk.bf16.vlgmr.msra.gmra.mxu0 %vm487_vm0, %v726_v47  ;;  %v1264_v47 = vld [vmem:[%s2740_s13 + $0x30] sm:$0xff] }
 0x241   : > { %1979 = vmatpush3.bf16.xpose.msra.mxu0 %v1166_v51  ;;  %1986 = vmatprep.mubr.msk.bf16.mxu0 %vm2161_vm1, %v2160_v49  ;;  %v1262_v51 = vld [vmem:[%s2740_s13 + $0x20] sm:$0xff] }
 0x242   : > { %1951 = vmatmul.mubr.msk.bf16.vlgmr.msra.gmra.mxu1 %vm487_vm0, %v725_v13  ;;  %1980 = vmatprep.subr.bf16.mxu0 %v2160_v49  ;;  %v1263_v13 = vld [vmem:[%s2740_s13 + $0x28] sm:$0xff] }
 0x243   : > { %1967 = vmatpush3.bf16.xpose.msra.mxu1 %v1110_v17  ;;  %1974 = vmatprep.mubr.msk.bf16.mxu1 %vm2161_vm1, %v2160_v49  ;;  %v1261_v17 = vld [vmem:[%s2740_s13 + $0x18] sm:$0xff] }
 0x244   : > { %1968 = vmatprep.subr.bf16.mxu1 %v2160_v49 }
 0x249   : > { %1981 = vmatpush3.bf16.xpose.msra.mxu0 %v1163_v11 }
 0x24a   : > { %1982 = vmatprep.subr.bf16.mxu0 %v2160_v49 }
 0x24b   : > { %1969 = vmatpush3.bf16.xpose.msra.mxu1 %v1107_v29  ;;  %v983_v29 = vld [vmem:[%s2738_s11 + $0x30] sm:$0xff] }
 0x24c   : > { %1970 = vmatprep.subr.bf16.mxu1 %v2160_v49 }
 0x251   : > { %1983 = vmatpush3.bf16.xpose.msra.mxu0 %v1160_v53 }
 0x252   : > { %1984 = vmatprep.subr.bf16.mxu0 %v2160_v49 }
 0x253   : > { %1971 = vmatpush3.bf16.xpose.msra.mxu1 %v1104_v54 }
 0x254   : > { %1972 = vmatprep.subr.bf16.mxu1 %v2160_v49 }
 0x259   : > { %1985 = vmatpush3.bf16.xpose.msra.mxu0 %v1157_v8 }
 0x25a   : > { %2018 = vmatprep.subr.bf16.mxu0 %v2160_v49 }
 0x25b   : > { %1973 = vmatpush3.bf16.xpose.msra.mxu1 %v1101_v25 }
 0x25c   : > { %1990 = vmatprep.subr.mxu1 %v1265_v46 }
 0x260   : > { %1987 = vmatmul.mubr.msk.bf16.vlgmr.msra.gmra.mxu0 %vm487_vm0, %v728_v5 }
 0x261   : > { %2019 = vmatpush3.bf16.msra.mxu0 %v964_v30  ;;  %2026 = vmatprep.mubr.msk.bf16.mxu0 %vm2161_vm1, %v2160_v49 }
 0x262   : > { %1975 = vmatmul.mubr.msk.bf16.vlgmr.msra.gmra.mxu1 %vm487_vm0, %v727_v9  ;;  %2020 = vmatprep.subr.bf16.mxu0 %v2160_v49 }
 0x263   : > { %1991 = vmatpush3.msra.mxu1 %v1265_v46 }
 0x264   : > { %1992 = vmatprep.subr.mxu1 %v1264_v47 }
 0x265   : > { %2021 = vmatpush3.bf16.msra.mxu0 %v963_v19  ;;  %1993 = vmatpush3.msra.mxu1 %v1264_v47 }
 0x266   : > { %2022 = vmatprep.subr.bf16.mxu0 %v2160_v49  ;;  %1994 = vmatprep.subr.mxu1 %v1263_v13 }
 0x267   : > { %1995 = vmatpush3.msra.mxu1 %v1263_v13 }
 0x268   : > { %1996 = vmatprep.subr.mxu1 %v1262_v51 }
 0x269   : > { %2023 = vmatpush3.bf16.msra.mxu0 %v962_v1  ;;  %1997 = vmatpush3.msra.mxu1 %v1262_v51 }
 0x26a   : > { %2024 = vmatprep.subr.bf16.mxu0 %v2160_v49  ;;  %1998 = vmatprep.subr.mxu1 %v1261_v17 }
 0x26b   : > { %1999 = vmatpush3.msra.mxu1 %v1261_v17 }
 0x26c   : > { %2000 = vmatprep.subr.mxu1 %v1260_v7 }
 0x26d   : > { %2025 = vmatpush3.bf16.msra.mxu0 %v961_v2  ;;  %2001 = vmatpush3.msra.mxu1 %v1260_v7 }
 0x26e   : > { %2042 = vmatprep.subr.bf16.mxu0 %v2160_v49  ;;  %2002 = vmatprep.subr.mxu1 %v1259_v38 }
 0x26f   : > { %2003 = vmatpush3.msra.mxu1 %v1259_v38 }
 0x270   : > { %2004 = vmatprep.subr.mxu1 %v1258_v48 }
 0x271   : > { %2005 = vmatpush3.msra.mxu1 %v1258_v48 }
 0x272   : > { %2030 = vmatprep.subr.bf16.mxu1 %v2160_v49 }
 0x300   : > { %v1090_v5 = vpop.f32.mrf.mxu0 }
 0x301   : > { %v2572_v34 = vadd.f32 %v1090_v5, %v979_v6 }
 0x302   : > { %v1034_v9 = vpop.f32.mrf.mxu1  ;;  %v1964_v39 = vpop.f32.mrf.mxu0 }
 0x303   : > { %v2567_v31 = vadd.f32 %v1034_v9, %v977_v4  ;;  %v1216_v10 = vsel %vm1209_vm2, %v2572_v34, -inf }
 0x304   : > { %v1952_v32 = vpop.f32.mrf.mxu1  ;;  %v1093_v35 = vpop.f32.mrf.mxu0 }
 0x305   : > { %v1210_v36 = vsel %vm1209_vm2, %v2567_v31, -inf  ;;  %v2581_v24 = vadd.f32 %v1093_v35, %v980_v37 }
 0x306   : > { %1211 = vmax.xlane.f32.xlu0 %v1210_v36  ;;  %v1037_v42 = vpop.f32.mrf.mxu1  ;;  %v1965_v43 = vpop.f32.mrf.mxu0 }
 0x307   : > { %v2579_v28 = vadd.f32 %v1037_v42, %v978_v33  ;;  %v1219_v45 = vsel %vm1209_vm2, %v2581_v24, -inf }
 0x308   : > { %v1953_v44 = vpop.f32.mrf.mxu1 }
 0x309   : > { %v1213_v27 = vsel %vm1209_vm2, %v2579_v28, -inf }
 0x30a   : > { %1217 = vmax.xlane.f32.xlu0 %v1216_v10  ;;  %1214 = vmax.xlane.f32.xlu1 %v1213_v27 }
 0x30e   : > { %1220 = vmax.xlane.f32.xlu1 %v1219_v45 }
 0x320   : > { %v1202_v11 = vpop.f32.mrf.mxu0 }
 0x321   : > { %v1203_v8 = vadd.f32 %v1202_v11, %v983_v29 }
 0x322   : > { %v1146_v52 = vpop.f32.mrf.mxu1  ;;  %v1988_v54 = vpop.f32.mrf.mxu0 }
 0x323   : > { %v1147_v53 = vadd.f32 %v1146_v52, %v981_v59  ;;  %v1228_v5 = vsel %vm1209_vm2, %v1203_v8, -inf }
 0x324   : > { %v1976_v40 = vpop.f32.mrf.mxu1  ;;  %v1205_v23 = vpop.f32.mrf.mxu0 }
 0x325   : > { %v1222_v25 = vsel %vm1209_vm2, %v1147_v53, -inf  ;;  %v1206_v4 = vadd.f32 %v1205_v23, %v984_v26 }
 0x326   : > { %1223 = vmax.xlane.f32.xlu0 %v1222_v25  ;;  %v1149_v30 = vpop.f32.mrf.mxu1  ;;  %v1989_v19 = vpop.f32.mrf.mxu0 }
 0x327   : > { %v1150_v1 = vadd.f32 %v1149_v30, %v982_v57  ;;  %v1231_v9 = vsel %vm1209_vm2, %v1206_v4, -inf }
 0x328   : > { %v1977_v2 = vpop.f32.mrf.mxu1 }
 0x329   : > { %v1225_v6 = vsel %vm1209_vm2, %v1150_v1, -inf }
 0x32a   : > { %1229 = vmax.xlane.f32.xlu0 %v1228_v5  ;;  %1226 = vmax.xlane.f32.xlu1 %v1225_v6 }
 0x32e   : > { %1232 = vmax.xlane.f32.xlu1 %v1231_v9 }
 0x38f   : > { %v1212_v39 = vpop.xlane.xlu0 %1211 }
 0x390   : > { %v1234_v32 = vsub.f32 %v2567_v31, %v1212_v39 }
 0x392   : > { %v1242_v33 = vmul.f32 1.442695, %v1234_v32 }
 0x393   : > { %v1218_v35 = vpop.xlane.xlu0 %1217  ;;  %v1215_v36 = vpop.xlane.xlu1 %1214 }
 0x394   : > { %2120 = vpow2.f32 %v1242_v33  ;;  %v1236_v37 = vsub.f32 %v2572_v34, %v1218_v35  ;;  %v1235_v42 = vsub.f32 %v2579_v28, %v1215_v36 }
 0x396   : > { %v1246_v43 = vmul.f32 1.442695, %v1236_v37  ;;  %v1244_v44 = vmul.f32 1.442695, %v1235_v42 }
 0x397   : > { %v1221_v10 = vpop.xlane.xlu1 %1220 }
 0x398   : > { %2122 = vpow2.f32 %v1246_v43  ;;  %v1237_v27 = vsub.f32 %v2581_v24, %v1221_v10 }
 0x399   : > { %2124 = vpow2.f32 %v1244_v44 }
 0x39a   : > { %v1248_v45 = vmul.f32 1.442695, %v1237_v27 }
 0x39c   : > { %2126 = vpow2.f32 %v1248_v45 }
 0x3a1   : > { %v2121_v46 = vpop.eup %2120 }
 0x3a2   : > { %2006 = vmatprep.mubr.msk.f32.mxu1 %vm1209_vm2, %v2121_v46 }
 0x3a5   : > { %v2123_v31 = vpop.eup %2122 }
 0x3a6   : > { %v2125_v47 = vpop.eup %2124 }
 0x3a7   : > { %2007 = vmatmul.mubr.msk.f32.vlgmr.msra.gmra.mxu1 %vm1209_vm2, %v2125_v47 }
 0x3a8   : > { %2031 = vmatpush3.bf16.msra.mxu1 %v968_v21  ;;  %2009 = vmatprep.mubr.msk.f32.mxu1 %vm1209_vm2, %v2123_v31 }
 0x3a9   : > { %v2127_v34 = vpop.eup %2126  ;;  %2032 = vmatprep.subr.bf16.mxu1 %v2160_v49 }
 0x3ab   : > { %2010 = vmatmul.mubr.msk.f32.gmra.mxu1 %vm1209_vm2, %v2127_v34 }
 0x3ac   : > { %2033 = vmatpush3.bf16.msra.mxu1 %v967_v60 }
 0x3ad   : > { %2034 = vmatprep.subr.bf16.mxu1 %v2160_v49 }
 0x3af   : > { %v1224_v28 = vpop.xlane.xlu0 %1223 }
 0x3b0   : > { %2035 = vmatpush3.bf16.msra.mxu1 %v966_v61  ;;  %v1238_v24 = vsub.f32 %v1147_v53, %v1224_v28 }
 0x3b1   : > { %2036 = vmatprep.subr.bf16.mxu1 %v2160_v49 }
 0x3b2   : > { %v1250_v21 = vmul.f32 1.442695, %v1238_v24 }
 0x3b3   : > { %v1230_v13 = vpop.xlane.xlu0 %1229  ;;  %v1227_v51 = vpop.xlane.xlu1 %1226 }
 0x3b4   : > { %2128 = vpow2.f32 %v1250_v21  ;;  %2037 = vmatpush3.bf16.msra.mxu1 %v965_v62  ;;  %v1240_v17 = vsub.f32 %v1203_v8, %v1230_v13  ;;  %v1239_v60 = vsub.f32 %v1150_v1, %v1227_v51  ;;  %v1815_v13 = vld [vmem:[%s2737_s10] ss:$0 sm:$0xff] }
 0x3b5   : > { %2054 = vmatprep.subr.bf16.mxu1 %v2160_v49 }
 0x3b6   : > { %v1254_v59 = vmul.f32 1.442695, %v1240_v17  ;;  %v1252_v7 = vmul.f32 1.442695, %v1239_v60 }
 0x3b7   : > { %v1233_v11 = vpop.xlane.xlu1 %1232 }
 0x3b8   : > { %2130 = vpow2.f32 %v1254_v59  ;;  %v1241_v61 = vsub.f32 %v1206_v4, %v1233_v11 }
 0x3b9   : > { %2132 = vpow2.f32 %v1252_v7 }
 0x3ba   : > { %v1256_v29 = vmul.f32 1.442695, %v1241_v61 }
 0x3bc   : > { %2134 = vpow2.f32 %v1256_v29 }
 0x3c1   : > { %v2129_v52 = vpop.eup %2128 }
 0x3c2   : > { %2012 = vmatprep.mubr.msk.f32.mxu1 %vm1209_vm2, %v2129_v52 }
 0x3c5   : > { %v2131_v38 = vpop.eup %2130 }
 0x3c6   : > { %v2133_v53 = vpop.eup %2132 }
 0x3c7   : > { %2013 = vmatmul.mubr.msk.f32.gmra.mxu1 %vm1209_vm2, %v2133_v53 }
 0x3c8   : > { %2015 = vmatprep.mubr.msk.f32.mxu1 %vm1209_vm2, %v2131_v38 }
 0x3c9   : > { %v2135_v41 = vpop.eup %2134 }
 0x3cb   : > { %2016 = vmatmul.mubr.msk.f32.gmra.mxu1 %vm1209_vm2, %v2135_v41 }
 0x3cc   : > { %2038 = vmatprep.mubr.msk.bf16.mxu1 %vm2161_vm1, %v2160_v49 }
 0x467   : > { %v2008_v62 = vpop.f32.mrf.mxu1 }
 0x468   : > { %2136 = vrcp.f32 %v2008_v62 }
 0x469   : > { %v1356_v54 = vpop.f32.mrf.mxu1 }
 0x46a   : > { %2138 = vrcp.f32 %v1356_v54 }
 0x46b   : > { %v2011_v40 = vpop.f32.mrf.mxu1 }
 0x46c   : > { %2140 = vrcp.f32 %v2011_v40 }
 0x46d   : > { %v1366_v57 = vpop.f32.mrf.mxu1 }
 0x46e   : > { %2142 = vrcp.f32 %v1366_v57 }
 0x475   : > { %v2137_v48 = vpop.eup %2136 }
 0x476   : > { %v1404_v25 = vmul.f32 %v2137_v48, %v2125_v47 }
 0x477   : > { %v2139_v8 = vpop.eup %2138 }
 0x478   : > { %v1403_v23 = vmul.f32 %v2139_v8, %v2121_v46 }
 0x479   : > { %v2141_v26 = vpop.eup %2140 }
 0x47a   : > { %v1411_v30 = vpack.c.bf16 %v1404_v25, %v1403_v23  ;;  %v1406_v1 = vmul.f32 %v2141_v26, %v2127_v34 }
 0x47b   : > { %v2143_v19 = vpop.eup %2142 }
 0x47c   : > { %v1405_v2 = vmul.f32 %v2143_v19, %v2123_v31  ;;  %2027 = vmatmul.mubr.msk.bf16.vlgmr.msra.gmra.mxu0 %vm1209_vm2, %v1411_v30 }
 0x47d   : > { %2043 = vmatpush3.bf16.msra.mxu0 %v972_v14  ;;  %2050 = vmatprep.mubr.msk.bf16.mxu0 %vm2161_vm1, %v2160_v49 }
 0x47e   : > { %v1412_v4 = vpack.c.bf16 %v1406_v1, %v1405_v2  ;;  %2044 = vmatprep.subr.bf16.mxu0 %v2160_v49 }
 0x480   : > { %2039 = vmatmul.mubr.msk.bf16.vlgmr.msra.gmra.mxu1 %vm1209_vm2, %v1412_v4 }
 0x481   : > { %2045 = vmatpush3.bf16.msra.mxu0 %v971_v15  ;;  %2055 = vmatpush3.bf16.msra.mxu1 %v976_v63 }
 0x482   : > { %2046 = vmatprep.subr.bf16.mxu0 %v2160_v49  ;;  %2056 = vmatprep.subr.bf16.mxu1 %v2160_v49 }
 0x483   : > { %2062 = vmatprep.mubr.msk.bf16.mxu1 %vm2161_vm1, %v2160_v49 }
 0x485   : > { %2047 = vmatpush3.bf16.msra.mxu0 %v970_v16  ;;  %2057 = vmatpush3.bf16.msra.mxu1 %v975_v0 }
 0x486   : > { %2048 = vmatprep.subr.bf16.mxu0 %v2160_v49  ;;  %2058 = vmatprep.subr.bf16.mxu1 %v2160_v49 }
 0x487   : > { %v2014_v22 = vpop.f32.mrf.mxu1 }
 0x488   : > { %2144 = vrcp.f32 %v2014_v22 }
 0x489   : > { %2049 = vmatpush3.bf16.msra.mxu0 %v969_v18  ;;  %2059 = vmatpush3.bf16.msra.mxu1 %v974_v3  ;;  %v1376_v63 = vpop.f32.mrf.mxu1 }
 0x48a   : > { %2146 = vrcp.f32 %v1376_v63  ;;  %2060 = vmatprep.subr.bf16.mxu1 %v2160_v49  ;;  %2066 = vmatprep.subr.bf16.mxu0 %v2102_v55 }
 0x48b   : > { %v2017_v20 = vpop.f32.mrf.mxu1 }
 0x48c   : > { %2148 = vrcp.f32 %v2017_v20 }
 0x48d   : > { %2061 = vmatpush3.bf16.msra.mxu1 %v973_v12  ;;  %v1386_v0 = vpop.f32.mrf.mxu1 }
 0x48e   : > { %2150 = vrcp.f32 %v1386_v0 }
 0x495   : > { %v2145_v14 = vpop.eup %2144 }
 0x496   : > { %v1408_v16 = vmul.f32 %v2145_v14, %v2133_v53 }
 0x497   : > { %v2147_v15 = vpop.eup %2146 }
 0x498   : > { %v1407_v58 = vmul.f32 %v2147_v15, %v2129_v52 }
 0x499   : > { %v2149_v18 = vpop.eup %2148 }
 0x49a   : > { %v1413_v5 = vpack.c.bf16 %v1408_v16, %v1407_v58  ;;  %v1410_v6 = vmul.f32 %v2149_v18, %v2135_v41 }
 0x49b   : > { %v2151_v50 = vpop.eup %2150 }
 0x49c   : > { %2051 = vmatmul.mubr.msk.bf16.vlgmr.msra.gmra.mxu0 %vm1209_vm2, %v1413_v5  ;;  %v1409_v3 = vmul.f32 %v2151_v50, %v2131_v38 }
 0x49d   : > { %2067 = vmatpush3.bf16.msra.mxu0 %v2102_v55 }
 0x49e   : > { %v1414_v49 = vpack.c.bf16 %v1410_v6, %v1409_v3  ;;  %2068 = vmatprep.subr.bf16.mxu0 %v2103_v56 }
 0x4a0   : > { %2063 = vmatmul.mubr.msk.bf16.vlgmr.msra.gmra.mxu1 %vm1209_vm2, %v1414_v49 }
 0x4a1   : > { %2069 = vmatpush3.bf16.msra.mxu0 %v2103_v56 }
 0x53c   : > { %v1452_v12 = vpop.f32.mrf.mxu0 }
 0x53e   : > { %v2028_v9 = vpop.f32.mrf.mxu0 }
 0x540   : > { %v1455_v39 = vpop.f32.mrf.mxu0  ;;  %v1496_v32 = vpop.f32.mrf.mxu1 }
 0x541   : > { %v1591_v33 = vpack.c.bf16 %v1455_v39, %v1452_v12 }
 0x542   : > { %v2029_v35 = vpop.f32.mrf.mxu0  ;;  %v2040_v36 = vpop.f32.mrf.mxu1 }
 0x543   : > { %2070 = vmatprep.mubr.msk.bf16.mxu0 %vm487_vm0, %v1591_v33 }
 0x544   : > { %v1499_v37 = vpop.f32.mrf.mxu1 }
 0x545   : > { %v1592_v42 = vpack.c.bf16 %v1499_v37, %v1496_v32 }
 0x546   : > { %v2041_v43 = vpop.f32.mrf.mxu1 }
 0x547   : > { %2071 = vmatmul.mubr.msk.bf16.vlgmr.msra.gmra.mxu0 %vm487_vm0, %v1592_v42 }
 0x55c   : > { %v1540_v44 = vpop.f32.mrf.mxu0 }
 0x55e   : > { %v2052_v10 = vpop.f32.mrf.mxu0 }
 0x560   : > { %v1543_v27 = vpop.f32.mrf.mxu0  ;;  %v1584_v45 = vpop.f32.mrf.mxu1 }
 0x561   : > { %v1593_v46 = vpack.c.bf16 %v1543_v27, %v1540_v44 }
 0x562   : > { %v2053_v31 = vpop.f32.mrf.mxu0  ;;  %v2064_v47 = vpop.f32.mrf.mxu1 }
 0x563   : > { %2074 = vmatprep.mubr.msk.bf16.mxu0 %vm487_vm0, %v1593_v46 }
 0x564   : > { %v1587_v34 = vpop.f32.mrf.mxu1 }
 0x565   : > { %v1594_v28 = vpack.c.bf16 %v1587_v34, %v1584_v45 }
 0x566   : > { %v2065_v24 = vpop.f32.mrf.mxu1 }
 0x567   : > { %2075 = vmatmul.mubr.msk.bf16.gmra.mxu0 %vm487_vm0, %v1594_v28 }
 0x607   : > { %v2072_v21 = vpop.f32.mrf.mxu0 }
 0x608   : > { %v1673_v60 = vadd.f32 %v2072_v21, %v1815_v13 }
 0x609   : > { %v1664_v51 = vpop.f32.mrf.mxu0 }
 0x60a   : > { %v1665_v17 = vadd.f32 %v1815_v13, %v1664_v51  ;;  %1697 = vst.msk [vmem:[%s474_s25 + $0x10] sm:$0xff] %vm487_vm0, %v1673_v60 }
 0x60b   : > { %v2073_v59 = vpop.f32.mrf.mxu0 }
 0x60c   : > { %1695 = vst.msk [vmem:[%s474_s25] sm:$0xff] %vm487_vm0, %v1665_v17  ;;  %v1676_v61 = vadd.f32 %v2073_v59, %v1815_v13 }
 0x60d   : > { %v1667_v7 = vpop.f32.mrf.mxu0 }
 0x60e   : > { %v1668_v11 = vadd.f32 %v1815_v13, %v1667_v7  ;;  %1698 = vst.msk [vmem:[%s474_s25 + $0x18] sm:$0xff] %vm487_vm0, %v1676_v61 }
 0x610   : > { %1696 = vst.msk [vmem:[%s474_s25 + $0x8] sm:$0xff] %vm487_vm0, %v1668_v11 }
 0x627   : > { %v2076_v29 = vpop.f32.mrf.mxu0 }
 0x628   : > { %v1689_v53 = vadd.f32 %v2076_v29, %v1815_v13 }
 0x629   : > { %v1680_v52 = vpop.f32.mrf.mxu0 }
 0x62a   : > { %v1681_v38 = vadd.f32 %v1815_v13, %v1680_v52  ;;  %1701 = vst.msk [vmem:[%s474_s25 + $0x30] sm:$0xff] %vm487_vm0, %v1689_v53 }
 0x62b   : > { %v2077_v41 = vpop.f32.mrf.mxu0 }
 0x62c   : > { %1699 = vst.msk [vmem:[%s474_s25 + $0x20] sm:$0xff] %vm487_vm0, %v1681_v38  ;;  %v1692_v40 = vadd.f32 %v2077_v41, %v1815_v13 }
 0x62d   : > { %v1683_v62 = vpop.f32.mrf.mxu0 }
 0x62e   : > { %v1684_v54 = vadd.f32 %v1815_v13, %v1683_v62  ;;  %1702 = vst.msk [vmem:[%s474_s25 + $0x38] sm:$0xff] %vm487_vm0, %v1692_v40 }
 0x630   : > { %1700 = vst.msk [vmem:[%s474_s25 + $0x28] sm:$0xff] %vm487_vm0, %v1684_v54 }
 0x631 PF: > { %s24_s29 = sadd.s32 1, %s2158_s29  }
 0x632   : > { %p21_p4 = scmp.ge.s32.totalorder %s24_s29, 4  }
 0x634   :  { %23 = sbr.rel (!%p21_p4) target bundleno = 1 (0x1), region = 106 }

// kernel: rstb_forward.9
= control target key start
LH: loop header
LB: loop body
LE: loop exit
PB: predicated region body
PF: predicated region fallthrough
CT: control target
= control target key end

     0   :  { %s819_s15 = smov 0   ;;  %s958_s0 = inlined_call_operand.vmem [shape: f32[128,288], index: 0, kind: input, shape index: {}]   ;;  %s959_s1 = inlined_call_operand.vmem [shape: bf16[288,32], index: 1, kind: input, shape index: {}]   ;;  %s960_s2 = inlined_call_operand.vmem [shape: f32[1,32], index: 2, kind: input, shape index: {}]   ;;  %s961_s3 = inlined_call_operand.vmem [shape: f32[128,32], index: 3, kind: input, shape index: {}]   ;;  %s962_s4 = inlined_call_operand.vmem [shape: f32[128,32], index: 4, kind: output, shape index: {}]  }
   0x1 LB: > { %s649_s16 = sadd.s32 4294967295, %s792_s15   ;;  %p653_p0 = scmp.ge.s32.totalorder %s792_s15, 1  ;;  %s792_s15 = sphi %s819_s15, %s14_s15  }
   0x2   : > { %p175_p1 = scmp.lt.s32.totalorder %s792_s15, 3 }
   0x4   : > { %p176_p2 = pnand %p653_p0, %p175_p1 }
   0x5   : > { %s654_s19 = sshll.u32 (!%p176_p2), %s649_s16, 3 }
   0x6   : > { %179 = sbr.rel (%p176_p2) target bundleno = 268 (0x10c), region = 36  ;;  %p208_p3 = scmp.lt.s32.totalorder (!%p176_p2), %s654_s19, 15 }
   0xb   : > { %v768_v0 = vld [vmem:[%s959_s1 + $0x78] sm:$0xff]   ;;  %v770_v2 = vld [vmem:[%s959_s1 + $0x70] sm:$0xff]   ;;  %v772_v4 = vld [vmem:[%s959_s1 + $0x68] sm:$0xff]   ;;  %s964_s19 = smov (!%p208_p3, %s654_s19), 15  ;;  %vm414_vm0 = vcmask 261120  }
   0xc   : > { %v769_v1 = vld [vmem:[%s959_s1 + $0x38] sm:$0xff]   ;;  %685 = vmatprep.subr.bf16.mxu0 %v768_v0  ;;  %743 = vmatprep.subr.bf16.mxu1 %v768_v0  ;;  %v771_v3 = vld [vmem:[%s959_s1 + $0x30] sm:$0xff]   ;;  %v773_v5 = vld [vmem:[%s959_s1 + $0x28] sm:$0xff]   ;;  %s759_s6 = smul.u32 24, %s964_s19  ;;  %s657_s8 = sshll.u32 %s964_s19, 3 }
   0xd   : > { %686 = vmatpush3.bf16.msra.mxu0 %v769_v1  ;;  %751 = vmatpush3.bf16.msra.mxu1 %v769_v1  ;;  %v774_v6 = vld [vmem:[%s959_s1 + $0x60] sm:$0xff]   ;;  %v776_v8 = vld [vmem:[%s959_s1 + $0x58] sm:$0xff]   ;;  %v778_v10 = vld [vmem:[%s959_s1 + $0x50] sm:$0xff]   ;;  %s930_s16 = scalar_lea.vmem %s962_s4, %s657_s8 }
   0xe   : > { %687 = vmatprep.subr.bf16.mxu0 %v770_v2  ;;  %744 = vmatprep.subr.bf16.mxu1 %v770_v2  ;;  %v775_v7 = vld [vmem:[%s959_s1 + $0x20] sm:$0xff]   ;;  %s860_s13 = scalar_lea.vmem %s958_s0, %s759_s6  ;;  %v777_v9 = vld [vmem:[%s959_s1 + $0x18] sm:$0xff]   ;;  %v779_v17 = vld [vmem:[%s959_s1 + $0x10] sm:$0xff]  }
   0xf   : > { %v228_v11 = vld [vmem:[%s860_s13 + $0x8] sm:$0xff]  ;;  %v231_v12 = vld [vmem:[%s860_s13 + $0x20] sm:$0xff]  ;;  %v246_v13 = vld [vmem:[%s860_s13 + $0x98] sm:$0xff] }
  0x10   : > { %v252_v14 = vpack.c.bf16 %v231_v12, %v228_v11  ;;  %v249_v15 = vld [vmem:[%s860_s13 + $0xb0] sm:$0xff]  ;;  %v780_v18 = vld [vmem:[%s959_s1 + $0x48] sm:$0xff]   ;;  %v782_v20 = vld [vmem:[%s959_s1 + $0x40] sm:$0xff]  }
  0x11   : > { %688 = vmatpush3.bf16.msra.mxu0 %v771_v3  ;;  %752 = vmatpush3.bf16.msra.mxu1 %v771_v3  ;;  %v261_v16 = vpack.c.bf16 %v249_v15, %v246_v13  ;;  %v781_v19 = vld [vmem:[%s959_s1 + $0x8] sm:$0xff]   ;;  %v783_v21 = vld [vmem:[%s959_s1] sm:$0xff]   ;;  %v230_v23 = vld [vmem:[%s860_s13 + $0x18] sm:$0xff] }
  0x12   : > { %689 = vmatprep.subr.bf16.mxu0 %v772_v4  ;;  %745 = vmatprep.subr.bf16.mxu1 %v772_v4  ;;  %v227_v22 = vld [vmem:[%s860_s13] sm:$0xff]  ;;  %v245_v24 = vld [vmem:[%s860_s13 + $0x90] sm:$0xff]  ;;  %v248_v25 = vld [vmem:[%s860_s13 + $0xa8] sm:$0xff] }
  0x13   : > { %459 = vmatprep.mubr.bf16.mxu0 %v252_v14  ;;  %483 = vmatprep.mubr.bf16.mxu1 %v261_v16  ;;  %v784_v26 = vld [vmem:[%s959_s1 + $0x88] sm:$0xff]   ;;  %v234_v27 = vld [vmem:[%s860_s13 + $0x38] sm:$0xff]  ;;  %v237_v28 = vld [vmem:[%s860_s13 + $0x50] sm:$0xff]  ;;  %v251_v31 = vpack.c.bf16 %v230_v23, %v227_v22  ;;  %v260_v32 = vpack.c.bf16 %v248_v25, %v245_v24 }
  0x14   : > { %v229_v29 = vld [vmem:[%s860_s13 + $0x10] sm:$0xff]  ;;  %v232_v30 = vld [vmem:[%s860_s13 + $0x28] sm:$0xff]  ;;  %v255_v33 = vpack.c.bf16 %v237_v28, %v234_v27  ;;  %v785_v34 = vld [vmem:[%s959_s1 + $0x80] sm:$0xff]  }
  0x15   : > { %690 = vmatpush3.bf16.msra.mxu0 %v773_v5  ;;  %753 = vmatpush3.bf16.msra.mxu1 %v773_v5  ;;  %v253_v35 = vpack.c.bf16 %v232_v30, %v229_v29  ;;  %v233_v36 = vld [vmem:[%s860_s13 + $0x30] sm:$0xff]  ;;  %v236_v37 = vld [vmem:[%s860_s13 + $0x48] sm:$0xff]  ;;  %v235_v38 = vld [vmem:[%s860_s13 + $0x40] sm:$0xff] }
  0x16   : > { %691 = vmatprep.subr.bf16.mxu0 %v774_v6  ;;  %746 = vmatprep.subr.bf16.mxu1 %v774_v6  ;;  %v238_v39 = vld [vmem:[%s860_s13 + $0x58] sm:$0xff]  ;;  %v240_v40 = vld [vmem:[%s860_s13 + $0x68] sm:$0xff]  ;;  %v243_v41 = vld [vmem:[%s860_s13 + $0x80] sm:$0xff]  ;;  %v254_v44 = vpack.c.bf16 %v236_v37, %v233_v36 }
  0x17   : > { %v241_v42 = vld [vmem:[%s860_s13 + $0x70] sm:$0xff]  ;;  %v244_v43 = vld [vmem:[%s860_s13 + $0x88] sm:$0xff]  ;;  %v256_v45 = vpack.c.bf16 %v238_v39, %v235_v38  ;;  %v258_v46 = vpack.c.bf16 %v243_v41, %v240_v40  ;;  %v239_v48 = vld [vmem:[%s860_s13 + $0x60] sm:$0xff] }
  0x18   : > { %v259_v47 = vpack.c.bf16 %v244_v43, %v241_v42  ;;  %v242_v49 = vld [vmem:[%s860_s13 + $0x78] sm:$0xff]  ;;  %v247_v50 = vld [vmem:[%s860_s13 + $0xa0] sm:$0xff] }
  0x19   : > { %692 = vmatpush3.bf16.msra.mxu0 %v775_v7  ;;  %754 = vmatpush3.bf16.msra.mxu1 %v775_v7  ;;  %v250_v51 = vld [vmem:[%s860_s13 + $0xb8] sm:$0xff]  ;;  %v257_v52 = vpack.c.bf16 %v242_v49, %v239_v48  ;;  %v660_v63 = vld [vmem:[%s960_s2] ss:$0 sm:$0xff]  ;;  %s924_s13 = scalar_lea.vmem %s961_s3, %s657_s8 }
  0x1a   : > { %693 = vmatprep.subr.bf16.mxu0 %v776_v8  ;;  %747 = vmatprep.subr.bf16.mxu1 %v776_v8  ;;  %v262_v53 = vpack.c.bf16 %v250_v51, %v247_v50  ;;  %v557_v7 = vld [vmem:[%s924_s13] sm:$0xff]  ;;  %v559_v15 = vld [vmem:[%s924_s13 + $0x10] sm:$0xff]  ;;  %v564_v40 = vld [vmem:[%s924_s13 + $0x38] sm:$0xff] }
  0x1d   : > { %694 = vmatpush3.bf16.msra.mxu0 %v777_v9  ;;  %755 = vmatpush3.bf16.msra.mxu1 %v777_v9 }
  0x1e   : > { %695 = vmatprep.subr.bf16.mxu0 %v778_v10  ;;  %748 = vmatprep.subr.bf16.mxu1 %v778_v10 }
  0x21   : > { %696 = vmatpush3.bf16.msra.mxu0 %v779_v17  ;;  %756 = vmatpush3.bf16.msra.mxu1 %v779_v17 }
  0x22   : > { %697 = vmatprep.subr.bf16.mxu0 %v780_v18  ;;  %749 = vmatprep.subr.bf16.mxu1 %v780_v18  ;;  %v558_v18 = vld [vmem:[%s924_s13 + $0x8] sm:$0xff] }
  0x25   : > { %698 = vmatpush3.bf16.msra.mxu0 %v781_v19  ;;  %757 = vmatpush3.bf16.msra.mxu1 %v781_v19 }
  0x26   : > { %699 = vmatprep.subr.bf16.mxu0 %v782_v20  ;;  %750 = vmatprep.subr.bf16.mxu1 %v782_v20 }
  0x29   : > { %700 = vmatpush3.bf16.msra.mxu0 %v783_v21  ;;  %758 = vmatpush3.bf16.msra.mxu1 %v783_v21 }
  0x2a   : > { %731 = vmatprep.subr.bf16.mxu1 %v784_v26 }
  0x2c   : > { %460 = vmatmul.mubr.bf16.vlgmr.msra.gmra.mxu0 %v251_v31  ;;  %484 = vmatmul.mubr.bf16.vlgmr.msra.gmra.mxu1 %v260_v32  ;;  %v560_v31 = vld [vmem:[%s924_s13 + $0x18] sm:$0xff] }
  0x2d   : > { %732 = vmatpush3.bf16.msra.mxu1 %v784_v26  ;;  %467 = vmatprep.mubr.bf16.mxu0 %v255_v33  ;;  %v563_v26 = vld [vmem:[%s924_s13 + $0x30] sm:$0xff] }
  0x2e   : > { %733 = vmatprep.subr.bf16.mxu1 %v785_v34  ;;  %735 = vmatprep.mubr.msk.bf16.mxu1 %vm414_vm0, %v253_v35 }
  0x31   : > { %734 = vmatpush3.bf16.msra.mxu1 %v785_v34 }
  0x34   : > { %468 = vmatmul.mubr.bf16.gmra.mxu0 %v254_v44  ;;  %736 = vmatmul.mubr.msk.bf16.vlgmr.msra.gmra.mxu1 %vm414_vm0, %v256_v45  ;;  %v561_v44 = vld [vmem:[%s924_s13 + $0x20] sm:$0xff] }
  0x35   : > { %475 = vmatprep.mubr.bf16.mxu0 %v258_v46  ;;  %739 = vmatprep.mubr.msk.bf16.mxu1 %vm414_vm0, %v259_v47 }
  0x3c   : > { %476 = vmatmul.mubr.bf16.gmra.mxu0 %v257_v52  ;;  %740 = vmatmul.mubr.msk.bf16.gmra.mxu1 %vm414_vm0, %v262_v53  ;;  %v562_v52 = vld [vmem:[%s924_s13 + $0x28] sm:$0xff] }
  0xec   : > { %v701_v54 = vpop.f32.mrf.mxu0  ;;  %v719_v55 = vpop.f32.mrf.mxu1 }
  0xee   : > { %v702_v56 = vpop.f32.mrf.mxu0  ;;  %v720_v57 = vpop.f32.mrf.mxu1 }
  0xef   : > { %v703_v60 = vadd.f32 %v702_v56, %v701_v54  ;;  %v721_v4 = vadd.f32 %v720_v57, %v719_v55 }
  0xf0   : > { %v704_v58 = vpop.f32.mrf.mxu0  ;;  %v722_v59 = vpop.f32.mrf.mxu1 }
  0xf1   : > { %v462_v3 = vadd.f32 %v703_v60, %v660_v63  ;;  %v486_v19 = vadd.f32 %v721_v4, %v660_v63 }
  0xf2   : > { %v705_v61 = vpop.f32.mrf.mxu0  ;;  %v723_v62 = vpop.f32.mrf.mxu1 }
  0xf3   : > { %v706_v2 = vadd.f32 %v705_v61, %v704_v58  ;;  %v724_v20 = vadd.f32 %v723_v62, %v722_v59 }
  0xf4   : > { %v707_v0 = vpop.f32.mrf.mxu0  ;;  %v737_v1 = vpop.f32.mrf.mxu1 }
  0xf5   : > { %v465_v14 = vadd.f32 %v706_v2, %v660_v63  ;;  %v489_v37 = vadd.f32 %v724_v20, %v660_v63 }
  0xf6   : > { %v708_v5 = vpop.f32.mrf.mxu0  ;;  %v526_v6 = vpop.f32.mrf.mxu1 }
  0xf7   : > { %v709_v8 = vadd.f32 %v708_v5, %v707_v0  ;;  %v527_v9 = vadd.f32 %v526_v6, %v462_v3 }
  0xf8   : > { %v710_v10 = vpop.f32.mrf.mxu0  ;;  %v738_v11 = vpop.f32.mrf.mxu1 }
  0xf9   : > { %v470_v12 = vadd.f32 %v709_v8, %v660_v63  ;;  %v565_v13 = vadd.f32 %v557_v7, %v527_v9 }
  0xfa   : > { %v711_v16 = vpop.f32.mrf.mxu0  ;;  %v529_v17 = vpop.f32.mrf.mxu1 }
  0xfb   : > { %v535_v21 = vadd.f32 %v737_v1, %v470_v12  ;;  %573 = vst.msk [vmem:[%s930_s16] sm:$0xff] %vm414_vm0, %v565_v13  ;;  %v712_v22 = vadd.f32 %v711_v16, %v710_v10  ;;  %v530_v23 = vadd.f32 %v529_v17, %v465_v14 }
  0xfc   : > { %v713_v24 = vpop.f32.mrf.mxu0  ;;  %v741_v25 = vpop.f32.mrf.mxu1 }
  0xfd   : > { %v567_v27 = vadd.f32 %v559_v15, %v535_v21  ;;  %v473_v28 = vadd.f32 %v712_v22, %v660_v63  ;;  %v566_v29 = vadd.f32 %v558_v18, %v530_v23  ;;  %v551_v30 = vadd.f32 %v741_v25, %v486_v19 }
  0xfe   : > { %v714_v32 = vpop.f32.mrf.mxu0  ;;  %v542_v33 = vpop.f32.mrf.mxu1 }
  0xff   : > { %575 = vst.msk [vmem:[%s930_s16 + $0x10] sm:$0xff] %vm414_vm0, %v567_v27  ;;  %v538_v34 = vadd.f32 %v738_v11, %v473_v28  ;;  %574 = vst.msk [vmem:[%s930_s16 + $0x8] sm:$0xff] %vm414_vm0, %v566_v29  ;;  %v571_v35 = vadd.f32 %v563_v26, %v551_v30  ;;  %v715_v36 = vadd.f32 %v714_v32, %v713_v24 }
 0x100   : > { %v716_v38 = vpop.f32.mrf.mxu0  ;;  %v742_v39 = vpop.f32.mrf.mxu1 }
 0x101   : > { %v568_v41 = vadd.f32 %v560_v31, %v538_v34  ;;  %579 = vst.msk [vmem:[%s930_s16 + $0x30] sm:$0xff] %vm414_vm0, %v571_v35  ;;  %v478_v42 = vadd.f32 %v715_v36, %v660_v63  ;;  %v554_v43 = vadd.f32 %v742_v39, %v489_v37 }
 0x102   : > { %v717_v45 = vpop.f32.mrf.mxu0  ;;  %v545_v51 = vpop.f32.mrf.mxu1 }
 0x103   : > { %576 = vst.msk [vmem:[%s930_s16 + $0x18] sm:$0xff] %vm414_vm0, %v568_v41  ;;  %v543_v46 = vadd.f32 %v542_v33, %v478_v42  ;;  %v572_v47 = vadd.f32 %v564_v40, %v554_v43  ;;  %v718_v48 = vadd.f32 %v717_v45, %v716_v38 }
 0x105   : > { %v569_v49 = vadd.f32 %v561_v44, %v543_v46  ;;  %580 = vst.msk [vmem:[%s930_s16 + $0x38] sm:$0xff] %vm414_vm0, %v572_v47  ;;  %v481_v50 = vadd.f32 %v718_v48, %v660_v63 }
 0x107   : > { %577 = vst.msk [vmem:[%s930_s16 + $0x20] sm:$0xff] %vm414_vm0, %v569_v49  ;;  %v546_v53 = vadd.f32 %v545_v51, %v481_v50 }
 0x109   : > { %v570_v54 = vadd.f32 %v562_v52, %v546_v53 }
 0x10b   : > { %578 = vst.msk [vmem:[%s930_s16 + $0x28] sm:$0xff] %vm414_vm0, %v570_v54 }
 0x10c PF: > { %s14_s15 = sadd.s32 1, %s792_s15  }
 0x10d   : > { %p11_p4 = scmp.ge.s32.totalorder %s14_s15, 4  }
 0x10f   :  { %13 = sbr.rel (!%p11_p4) target bundleno = 1 (0x1), region = 69 }

</bundles_post_ra>
